<compile_context>
chip_gen: v7x
topology: tpu7x:2x2x1
jax: 0.10.0
libtpu: 0.0.40
codegen_flags: <defaults>
</compile_context>

<pallas_src>
import functools

import jax
import jax.numpy as jnp
from jax.experimental import pallas as pl
from jax.experimental.pallas import tpu as pltpu

ORDER_1 = (5, 6, 7, 9, 8, 10, 11, 12, 13, 15, 14, 16)
ORDER_2 = (0, 1, 0, 2, 0, 3, 3, 4, 3, 5)
# order_2 grouped into (kernel=2, stride=2) pairs over the concatenated [head, out_1]
CONV2_PAIRS = ((0, 1), (0, 2), (0, 3), (3, 4), (3, 5))
NUM_SEQ = 17  # forward indexes sequence positions 0..16


def _round_up(v, m):
    return (v + m - 1) // m * m


# ---------------------------------------------------------------------------
# Pallas kernel: three fused dot + bias + relu stages, node-major.
#   x_ref : (tn, 17*D)  raw input block (contiguous, no wrapper relayout)
#   wa/ba : (17*D, 7*H), (1, 7*H)   head + conv_1 + seq-gather as one matmul
#   wb/bb : (7*H, 5*H),  (1, 5*H)   conv_2 (order_2 pairs folded into wb)
#   wc/bc : (5*H, D),    (1, D)     final Linear (channel-major flatten folded in)
#   o_ref : (tn, D)
# Weights are stored in `compute_dtype` (bf16 in production); the x block and
# the stage outputs are cast to it before each dot so the MXU runs at bf16
# rate, while accumulation / bias / relu stay in f32.
# ---------------------------------------------------------------------------
def _hierarch_kernel(x_ref, wa_ref, ba_ref, wb_ref, bb_ref, wc_ref, bc_ref,
                     o_ref, *, compute_dtype):
    f32 = jnp.float32
    cdt = compute_dtype

    x = x_ref[...].astype(cdt)                                     # (tn, 17D)
    pos = jnp.maximum(
        jnp.dot(x, wa_ref[...], preferred_element_type=f32)
        + ba_ref[...], 0.0)                                        # (tn, 7H) f32
    g = jnp.maximum(
        jnp.dot(pos.astype(cdt), wb_ref[...], preferred_element_type=f32)
        + bb_ref[...], 0.0)                                        # (tn, 5H) f32
    o_ref[...] = jnp.maximum(
        jnp.dot(g.astype(cdt), wc_ref[...], preferred_element_type=f32)
        + bc_ref[...], 0.0).astype(o_ref.dtype)                    # (tn, D)


# ---------------------------------------------------------------------------
# Parameters (deterministic, torch-style shapes) + kernel-layout packing.
# ---------------------------------------------------------------------------
def init_torch_params(key, node_dim):
    d, h = node_dim, node_dim // 2
    ks = jax.random.split(key, 8)

    def u(k, shape, fan_in):
        bound = 1.0 / jnp.sqrt(jnp.float32(fan_in))
        return jax.random.uniform(k, shape, jnp.float32, -bound, bound)

    return dict(
        Wh=u(ks[0], (h, 4 * d), 4 * d), Bh=u(ks[1], (h,), 4 * d),   # Linear(4D, H)
        W1=u(ks[2], (h, d, 2), 2 * d),  B1=u(ks[3], (h,), 2 * d),   # Conv1d(D, H, 2, 2)
        W2=u(ks[4], (h, h, 2), 2 * h),  B2=u(ks[5], (h,), 2 * h),   # Conv1d(H, H, 2, 2)
        Wf=u(ks[6], (d, 5 * h), 5 * h), Bf=u(ks[7], (d,), 5 * h),   # Linear(5H, D)
    )


def pack_params(tp, node_dim, compute_dtype=jnp.bfloat16):
    """Pack torch-style params into the three node-major kernel matmuls."""
    d, h = node_dim, node_dim // 2

    # --- stage A: head + conv_1 as one (7H, 17D) weight; the sequence gather
    # is folded in by writing each block at column seq_pos*D.  x2 column index
    # for seq position s, channel c is s*D + c (value x[n, s, c]).
    # head: torch flattens update[:, :, :4] (NCW) as c*4 + p -> permute columns.
    wh = tp['Wh'].reshape(h, d, 4).transpose(0, 2, 1).reshape(h, 4 * d)
    wa = jnp.zeros((7 * h, NUM_SEQ * d), jnp.float32)
    wa = wa.at[:h, :4 * d].set(wh)                       # head uses seq 0..3
    for j in range(6):
        a, b = ORDER_1[2 * j], ORDER_1[2 * j + 1]
        rows = slice((1 + j) * h, (2 + j) * h)
        wa = wa.at[rows, a * d:(a + 1) * d].add(tp['W1'][:, :, 0])
        wa = wa.at[rows, b * d:(b + 1) * d].add(tp['W1'][:, :, 1])
    ba = jnp.concatenate([tp['Bh'], jnp.tile(tp['B1'], 6)])

    # --- stage B: conv_2 over the order_2 pairs as one (5H, 7H) weight ---
    wb = jnp.zeros((5 * h, 7 * h), jnp.float32)
    for j, (a, b) in enumerate(CONV2_PAIRS):
        rows = slice(j * h, (j + 1) * h)
        wb = wb.at[rows, a * h:(a + 1) * h].add(tp['W2'][:, :, 0])
        wb = wb.at[rows, b * h:(b + 1) * h].add(tp['W2'][:, :, 1])
    bb = jnp.tile(tp['B2'], 5)

    # --- stage C: final Linear; torch flattens conv_2 output channel-major
    # (idx = c*5 + j), stage-B columns are j*H + c -> permute Wf's columns.
    wc = jnp.transpose(tp['Wf'].reshape(d, h, 5), (0, 2, 1)).reshape(d, 5 * h)
    bc = tp['Bf']

    cd = compute_dtype
    return (wa.T.astype(cd), ba.reshape(1, -1).astype(jnp.float32),
            wb.T.astype(cd), bb.reshape(1, -1).astype(jnp.float32),
            wc.T.astype(cd), bc.reshape(1, -1).astype(jnp.float32))


# ---------------------------------------------------------------------------
# Wrapper: no relayout copies — x is consumed in its native (n, 17*D) layout.
# ---------------------------------------------------------------------------
def hierarch_update_cnn(x, kernel_params, *, tn=1024):
    n, s, d = x.shape
    h = d // 2
    assert s >= NUM_SEQ, "forward indexes sequence position 16"
    assert d % 8 == 0

    wa, ba, wb, bb, wc, bc = kernel_params
    compute_dtype = wa.dtype

    # first 17 seq positions, flattened: a free view when s == 17.
    x2 = x[:, :NUM_SEQ, :].reshape(n, NUM_SEQ * d)

    # Effective node tile: sublane-aligned; when n is large enough keep >= 2
    # grid blocks so the "parallel" axis can shard across both TCs on v7x.
    # tn = 1024 f32 keeps the double-buffered x block ~4.5 MiB (fits v5e's
    # 16 MiB scoped-VMEM default with room to spare).
    if n >= 512:
        tn_eff = min(tn, _round_up(-(-n // 2), 128))
    else:
        tn_eff = _round_up(max(n, 1), 8)
    n_pad = _round_up(n, tn_eff)
    if n_pad != n:
        x2 = jnp.pad(x2, ((0, n_pad - n), (0, 0)))

    def const2d(arr):
        return pl.BlockSpec(arr.shape, lambda i: (0, 0))

    cost = pl.CostEstimate(
        flops=2 * n_pad * (NUM_SEQ * d * 7 * h + 7 * h * 5 * h + 5 * h * d),
        transcendentals=0,
        bytes_accessed=(4 * n_pad * (NUM_SEQ * d + d)
                        + wa.dtype.itemsize * (wa.size + wb.size + wc.size)
                        + 4 * (ba.size + bb.size + bc.size)),
    )

    out = pl.pallas_call(
        functools.partial(_hierarch_kernel, compute_dtype=compute_dtype),
        out_shape=jax.ShapeDtypeStruct((n_pad, d), jnp.float32),
        grid_spec=pltpu.PrefetchScalarGridSpec(
            num_scalar_prefetch=0,
            grid=(n_pad // tn_eff,),
            in_specs=[
                pl.BlockSpec((tn_eff, NUM_SEQ * d), lambda i: (i, 0)),
                const2d(wa), const2d(ba),
                const2d(wb), const2d(bb),
                const2d(wc), const2d(bc),
            ],
            out_specs=pl.BlockSpec((tn_eff, d), lambda i: (i, 0)),
        ),
        compiler_params=pltpu.CompilerParams(
            dimension_semantics=("parallel",)),
        cost_estimate=cost,
    )(x2, wa, ba, wb, bb, wc, bc)

    # padded rows hold relu(bias) garbage -> must keep this slice.
    return out[:n]


# ---------------------------------------------------------------------------
# Pure-JAX reference (mirrors the PyTorch forward exactly) for verification.
# ---------------------------------------------------------------------------
def reference_forward(x, tp):
    n, s, d = x.shape
    u = jnp.transpose(x, (0, 2, 1))                     # (N, D, S), NCW like torch

    def conv1d_k2s2(inp, W, B):                         # inp (N, C, L), W (O, C, 2)
        x0, x1 = inp[:, :, 0::2], inp[:, :, 1::2]
        out = (jnp.einsum('ncl,oc->nol', x0, W[:, :, 0])
               + jnp.einsum('ncl,oc->nol', x1, W[:, :, 1]))
        return out + B[None, :, None]

    out1 = jax.nn.relu(conv1d_k2s2(u[:, :, jnp.array(ORDER_1)], tp['W1'], tp['B1']))
    head = jax.nn.relu(u[:, :, :4].reshape(n, -1) @ tp['Wh'].T + tp['Bh'])
    upd = jnp.concatenate([head[:, :, None], out1], axis=2)
    out2 = jax.nn.relu(conv1d_k2s2(upd[:, :, jnp.array(ORDER_2)], tp['W2'], tp['B2']))
    return jax.nn.relu(out2.reshape(n, -1) @ tp['Wf'].T + tp['Bf'])


if __name__ == "__main__":
    node_dim = 32            # D; H = 16
    num_nodes = 1024         # -> 2 grid blocks (tn_eff=512): both TCs on v7x
    seq = 17                 # order_1 indexes up to position 16

    key = jax.random.PRNGKey(0)
    kx, kp = jax.random.split(key)
    x = jax.random.normal(kx, (num_nodes, seq, node_dim), jnp.float32)

    torch_params = init_torch_params(kp, node_dim)
    ref = reference_forward(x, torch_params)

    # 1) strict semantic check with an f32 datapath (same kernel, f32 weights)
    params_f32 = pack_params(torch_params, node_dim, compute_dtype=jnp.float32)
    fwd_f32 = jax.jit(functools.partial(hierarch_update_cnn, tn=1024))
    out_f32 = jax.block_until_ready(fwd_f32(x, params_f32))
    assert out_f32.shape == (num_nodes, node_dim)
    assert jnp.allclose(out_f32, ref, rtol=1e-4, atol=1e-4), "f32 mismatch vs reference"

    # 2) production bf16 datapath (MXU/HBM optimized) -- deliberately looser
    #    tolerance, per the bf16-operand optimization.
    params_bf16 = pack_params(torch_params, node_dim, compute_dtype=jnp.bfloat16)
    fwd_bf16 = jax.jit(functools.partial(hierarch_update_cnn, tn=1024))
    out_bf16 = jax.block_until_ready(fwd_bf16(x, params_bf16))
    assert out_bf16.shape == (num_nodes, node_dim)
    assert jnp.allclose(out_bf16, ref, rtol=3e-2, atol=3e-2), "bf16 mismatch vs reference"

    print("KERNEL_OK")
</pallas_src>

<mosaic_0001>
module attributes {stable_mosaic.version = 11 : i64} {
  func.func @_hierarch_kernel(%arg0: i32, %arg1: memref<512x544xf32, #tpu.memory_space<vmem>>, %arg2: memref<544x112xf32, #tpu.memory_space<vmem>>, %arg3: memref<1x112xf32, #tpu.memory_space<vmem>>, %arg4: memref<112x80xf32, #tpu.memory_space<vmem>>, %arg5: memref<1x80xf32, #tpu.memory_space<vmem>>, %arg6: memref<80x32xf32, #tpu.memory_space<vmem>>, %arg7: memref<1x32xf32, #tpu.memory_space<vmem>>, %arg8: memref<512x32xf32, #tpu.memory_space<vmem>>) attributes {dimension_semantics = [#tpu.dimension_semantics<parallel>], iteration_bounds = array<i64: 2>, scalar_prefetch = 0 : i64, scratch_operands = 0 : i64, tpu.core_type = #tpu.core_type<tc>, window_params = [{transform_indices = @transform_0, window_bounds = array<i64: 512, 544>}, {pipeline_mode = #tpu.pipeline_mode<synchronous>, transform_indices = @transform_1, window_bounds = array<i64: 544, 112>}, {pipeline_mode = #tpu.pipeline_mode<synchronous>, transform_indices = @transform_2, window_bounds = array<i64: 1, 112>}, {pipeline_mode = #tpu.pipeline_mode<synchronous>, transform_indices = @transform_3, window_bounds = array<i64: 112, 80>}, {pipeline_mode = #tpu.pipeline_mode<synchronous>, transform_indices = @transform_4, window_bounds = array<i64: 1, 80>}, {pipeline_mode = #tpu.pipeline_mode<synchronous>, transform_indices = @transform_5, window_bounds = array<i64: 80, 32>}, {pipeline_mode = #tpu.pipeline_mode<synchronous>, transform_indices = @transform_6, window_bounds = array<i64: 1, 32>}, {transform_indices = @transform_7, window_bounds = array<i64: 512, 32>}]} {
    %c0 = arith.constant 0 : index
    %c0_0 = arith.constant 0 : index
    %0 = vector.load %arg1[%c0, %c0_0] : memref<512x544xf32, #tpu.memory_space<vmem>>, vector<512x544xf32>
    %c0_1 = arith.constant 0 : index
    %c0_2 = arith.constant 0 : index
    %1 = vector.load %arg2[%c0_1, %c0_2] : memref<544x112xf32, #tpu.memory_space<vmem>>, vector<544x112xf32>
    %cst = arith.constant dense<0.000000e+00> : vector<512x112xf32>
    %2 = tpu.matmul %0, %1, %cst {dimension_numbers = #tpu.dot_dimension_numbers<[1], [0], [0], [1], [0, 0, 1, 1], [], []>} : vector<512x544xf32>, vector<544x112xf32>, vector<512x112xf32> -> vector<512x112xf32>
    %c0_3 = arith.constant 0 : index
    %c0_4 = arith.constant 0 : index
    %3 = vector.load %arg3[%c0_3, %c0_4] : memref<1x112xf32, #tpu.memory_space<vmem>>, vector<1x112xf32>
    %4 = vector.broadcast %3 : vector<1x112xf32> to vector<512x112xf32>
    %5 = arith.addf %2, %4 : vector<512x112xf32>
    %cst_5 = arith.constant 0.000000e+00 : f32
    %6 = vector.broadcast %cst_5 : f32 to vector<512x112xf32>
    %7 = arith.maximumf %5, %6 : vector<512x112xf32>
    %c0_6 = arith.constant 0 : index
    %c0_7 = arith.constant 0 : index
    %8 = vector.load %arg4[%c0_6, %c0_7] : memref<112x80xf32, #tpu.memory_space<vmem>>, vector<112x80xf32>
    %cst_8 = arith.constant dense<0.000000e+00> : vector<512x80xf32>
    %9 = tpu.matmul %7, %8, %cst_8 {dimension_numbers = #tpu.dot_dimension_numbers<[1], [0], [0], [1], [0, 0, 1, 1], [], []>} : vector<512x112xf32>, vector<112x80xf32>, vector<512x80xf32> -> vector<512x80xf32>
    %c0_9 = arith.constant 0 : index
    %c0_10 = arith.constant 0 : index
    %10 = vector.load %arg5[%c0_9, %c0_10] : memref<1x80xf32, #tpu.memory_space<vmem>>, vector<1x80xf32>
    %11 = vector.broadcast %10 : vector<1x80xf32> to vector<512x80xf32>
    %12 = arith.addf %9, %11 : vector<512x80xf32>
    %cst_11 = arith.constant 0.000000e+00 : f32
    %13 = vector.broadcast %cst_11 : f32 to vector<512x80xf32>
    %14 = arith.maximumf %12, %13 : vector<512x80xf32>
    %c0_12 = arith.constant 0 : index
    %c0_13 = arith.constant 0 : index
    %15 = vector.load %arg6[%c0_12, %c0_13] : memref<80x32xf32, #tpu.memory_space<vmem>>, vector<80x32xf32>
    %cst_14 = arith.constant dense<0.000000e+00> : vector<512x32xf32>
    %16 = tpu.matmul %14, %15, %cst_14 {dimension_numbers = #tpu.dot_dimension_numbers<[1], [0], [0], [1], [0, 0, 1, 1], [], []>} : vector<512x80xf32>, vector<80x32xf32>, vector<512x32xf32> -> vector<512x32xf32>
    %c0_15 = arith.constant 0 : index
    %c0_16 = arith.constant 0 : index
    %17 = vector.load %arg7[%c0_15, %c0_16] : memref<1x32xf32, #tpu.memory_space<vmem>>, vector<1x32xf32>
    %18 = vector.broadcast %17 : vector<1x32xf32> to vector<512x32xf32>
    %19 = arith.addf %16, %18 : vector<512x32xf32>
    %cst_17 = arith.constant 0.000000e+00 : f32
    %20 = vector.broadcast %cst_17 : f32 to vector<512x32xf32>
    %21 = arith.maximumf %19, %20 : vector<512x32xf32>
    %c0_18 = arith.constant 0 : index
    %c0_19 = arith.constant 0 : index
    %22 = vector.load %arg8[%c0_18, %c0_19] : memref<512x32xf32, #tpu.memory_space<vmem>>, vector<512x32xf32>
    tpu.vector_store %arg8[%c0_18, %c0_19], %21 {strides = array<i32>} : memref<512x32xf32, #tpu.memory_space<vmem>>, vector<512x32xf32>,
    return
  }
  func.func @transform_0(%arg0: i32) -> (i32, i32) {
    %c0_i32 = arith.constant 0 : i32
    %c0_i32_0 = arith.constant 0 : i32
    return %arg0, %c0_i32 : i32, i32
  }
  func.func @transform_1(%arg0: i32) -> (i32, i32) {
    %c0_i32 = arith.constant 0 : i32
    %c0_i32_0 = arith.constant 0 : i32
    %c0_i32_1 = arith.constant 0 : i32
    return %c0_i32, %c0_i32_0 : i32, i32
  }
  func.func @transform_2(%arg0: i32) -> (i32, i32) {
    %c0_i32 = arith.constant 0 : i32
    %c0_i32_0 = arith.constant 0 : i32
    %c0_i32_1 = arith.constant 0 : i32
    return %c0_i32, %c0_i32_0 : i32, i32
  }
  func.func @transform_3(%arg0: i32) -> (i32, i32) {
    %c0_i32 = arith.constant 0 : i32
    %c0_i32_0 = arith.constant 0 : i32
    %c0_i32_1 = arith.constant 0 : i32
    return %c0_i32, %c0_i32_0 : i32, i32
  }
  func.func @transform_4(%arg0: i32) -> (i32, i32) {
    %c0_i32 = arith.constant 0 : i32
    %c0_i32_0 = arith.constant 0 : i32
    %c0_i32_1 = arith.constant 0 : i32
    return %c0_i32, %c0_i32_0 : i32, i32
  }
  func.func @transform_5(%arg0: i32) -> (i32, i32) {
    %c0_i32 = arith.constant 0 : i32
    %c0_i32_0 = arith.constant 0 : i32
    %c0_i32_1 = arith.constant 0 : i32
    return %c0_i32, %c0_i32_0 : i32, i32
  }
  func.func @transform_6(%arg0: i32) -> (i32, i32) {
    %c0_i32 = arith.constant 0 : i32
    %c0_i32_0 = arith.constant 0 : i32
    %c0_i32_1 = arith.constant 0 : i32
    return %c0_i32, %c0_i32_0 : i32, i32
  }
  func.func @transform_7(%arg0: i32) -> (i32, i32) {
    %c0_i32 = arith.constant 0 : i32
    %c0_i32_0 = arith.constant 0 : i32
    return %arg0, %c0_i32 : i32, i32
  }
}

</mosaic_0001>

<bundles_post_ra>
// kernel: hierarch_update_cnn.1
= control target key start
LH: loop header
LB: loop body
LE: loop exit
PB: predicated region body
PF: predicated region fallthrough
CT: control target
= control target key end

     0   :  { %s4723_s24 = smov 0   ;;  %s6162_s0 = inlined_call_operand.vmem [shape: f32[1024,544], index: 0, kind: input, shape index: {}]   ;;  %s6163_s1 = inlined_call_operand.vmem [shape: f32[544,112], index: 1, kind: input, shape index: {}]   ;;  %s6164_s2 = inlined_call_operand.vmem [shape: f32[1,112], index: 2, kind: input, shape index: {}]   ;;  %s6165_s3 = inlined_call_operand.vmem [shape: f32[112,80], index: 3, kind: input, shape index: {}]   ;;  %s6166_s4 = inlined_call_operand.vmem [shape: f32[1,80], index: 4, kind: input, shape index: {}]   ;;  %s6167_s5 = inlined_call_operand.vmem [shape: f32[80,32], index: 5, kind: input, shape index: {}]   ;;  %s6168_s6 = inlined_call_operand.vmem [shape: f32[1,32], index: 6, kind: input, shape index: {}]   ;;  %s6169_s7 = inlined_call_operand.vmem [shape: f32[1024,32], index: 7, kind: output, shape index: {}]  }
   0x1 LB: > { %s3534_s25 = sadd.s32 4294967295, %s4680_s24   ;;  %p3538_p0 = scmp.ge.s32.totalorder %s4680_s24, 1  ;;  %s4680_s24 = sphi %s4723_s24, %s17_s24  }
   0x2   : > { %p239_p1 = scmp.lt.s32.totalorder %s4680_s24, 3 }
   0x4   : > { %p240_p2 = pnand %p3538_p0, %p239_p1 }
   0x6   : > { %243 = sbr.rel (%p240_p2) target bundleno = 1177 (0x499), region = 48 }
   0xd   : > { %v605_v0 = vld [vmem:[%s6163_s1] sm:$0xff]  ;;  %v606_v1 = vld [vmem:[%s6163_s1 + $0x8] sm:$0xff]  ;;  %v607_v2 = vld [vmem:[%s6163_s1 + $0x10] sm:$0xff]  ;;  %s3539_s9 = sshll.u32 %s3534_s25, 6  ;;  %v4682_v3 = vmov 0.0|0.0   ;;  %vm680_vm0 = vcmask 261120  }
   0xe   : > { %4304 = vmatprep.subr.bf16.mxu0 %v4682_v3  ;;  %v4305_v4 = vpack.c.bf16 %v606_v1, %v605_v0  ;;  %v608_v5 = vld [vmem:[%s6163_s1 + $0x18] sm:$0xff]  ;;  %p273_p3 = scmp.lt.s32.totalorder %s3539_s9, 127  ;;  %4456 = vmatprep.subr.bf16.mxu1 %v4682_v3  ;;  %v609_v7 = vld [vmem:[%s6163_s1 + $0x20] sm:$0xff]  ;;  %v610_v8 = vld [vmem:[%s6163_s1 + $0x28] sm:$0xff]  ;;  %vm2113_vm1 = vcmask 916480   ;;  %vm2772_vm2 = vcmask 654336  }
   0xf   : > { %v4308_v6 = vpack.c.bf16 %v608_v5, %v607_v2  ;;  %v4311_v9 = vpack.c.bf16 %v610_v8, %v609_v7  ;;  %v611_v10 = vld [vmem:[%s6163_s1 + $0x30] sm:$0xff]  ;;  %v612_v11 = vld [vmem:[%s6163_s1 + $0x38] sm:$0xff]  ;;  %v613_v14 = vld [vmem:[%s6163_s1 + $0x40] sm:$0xff] }
  0x10   : > { %4306 = vmatpush1.bf16.msra.mxu0 %v4305_v4  ;;  %s6183_s9 = smov (!%p273_p3, %s3539_s9), 127  ;;  %4472 = vmatpush1.bf16.msra.mxu1 %v4305_v4  ;;  %v4314_v13 = vpack.c.bf16 %v612_v11, %v611_v10  ;;  %v614_v15 = vld [vmem:[%s6163_s1 + $0x48] sm:$0xff]  ;;  %v615_v17 = vld [vmem:[%s6163_s1 + $0x50] sm:$0xff]  ;;  %v616_v18 = vld [vmem:[%s6163_s1 + $0x58] sm:$0xff] }
  0x11   : > { %4307 = vmatprep.subr.bf16.mxu0 %v4682_v3  ;;  %4457 = vmatprep.subr.bf16.mxu1 %v4682_v3  ;;  %s4664_s16 = smul.u32 40, %s6183_s9  ;;  %v4317_v16 = vpack.c.bf16 %v614_v15, %v613_v14  ;;  %v4320_v19 = vpack.c.bf16 %v616_v18, %v615_v17  ;;  %v617_v20 = vld [vmem:[%s6163_s1 + $0x60] sm:$0xff]  ;;  %v618_v21 = vld [vmem:[%s6163_s1 + $0x68] sm:$0xff]  ;;  %v619_v23 = vld [vmem:[%s6163_s1 + $0x70] sm:$0xff]  ;;  %s3542_s15 = sshll.u32 %s6183_s9, 3 }
  0x12   : > { %v4323_v22 = vpack.c.bf16 %v618_v21, %v617_v20  ;;  %v620_v24 = vld [vmem:[%s6163_s1 + $0x78] sm:$0xff]  ;;  %v621_v26 = vld [vmem:[%s6163_s1 + $0x80] sm:$0xff]  ;;  %v622_v27 = vld [vmem:[%s6163_s1 + $0x88] sm:$0xff]  ;;  %s5964_s18 = scalar_lea.vmem %s6169_s7, %s3542_s15 }
  0x13   : > { %s4759_s19 = scalar_lea.vmem %s6162_s0, %s4664_s16  ;;  %v4326_v25 = vpack.c.bf16 %v620_v24, %v619_v23  ;;  %v4329_v28 = vpack.c.bf16 %v622_v27, %v621_v26  ;;  %v623_v29 = vld [vmem:[%s6163_s1 + $0x90] sm:$0xff]  ;;  %v624_v30 = vld [vmem:[%s6163_s1 + $0x98] sm:$0xff]  ;;  %v625_v32 = vld [vmem:[%s6163_s1 + $0xa0] sm:$0xff] }
  0x14   : > { %4309 = vmatpush1.bf16.msra.mxu0 %v4308_v6  ;;  %4473 = vmatpush1.bf16.msra.mxu1 %v4308_v6  ;;  %v286_v12 = vld [vmem:[%s4759_s19 + $0x8] sm:$0xff]  ;;  %v4332_v31 = vpack.c.bf16 %v624_v30, %v623_v29  ;;  %v627_v35 = vld [vmem:[%s6163_s1 + $0xb0] sm:$0xff]  ;;  %v628_v36 = vld [vmem:[%s6163_s1 + $0xb8] sm:$0xff] }
  0x15   : > { %4310 = vmatprep.subr.bf16.mxu0 %v4682_v3  ;;  %4458 = vmatprep.subr.bf16.mxu1 %v4682_v3  ;;  %v626_v33 = vld [vmem:[%s6163_s1 + $0xa8] sm:$0xff]  ;;  %v4338_v37 = vpack.c.bf16 %v628_v36, %v627_v35  ;;  %v629_v38 = vld [vmem:[%s6163_s1 + $0xc0] sm:$0xff]  ;;  %v631_v41 = vld [vmem:[%s6163_s1 + $0xd0] sm:$0xff] }
  0x16   : > { %937 = vmatprep.mubr.f32.mxu0 %v286_v12  ;;  %v4335_v34 = vpack.c.bf16 %v626_v33, %v625_v32  ;;  %v630_v39 = vld [vmem:[%s6163_s1 + $0xc8] sm:$0xff]  ;;  %v632_v42 = vld [vmem:[%s6163_s1 + $0xd8] sm:$0xff]  ;;  %v633_v44 = vld [vmem:[%s6163_s1 + $0xe0] sm:$0xff] }
  0x17   : > { %v4341_v40 = vpack.c.bf16 %v630_v39, %v629_v38  ;;  %v4344_v43 = vpack.c.bf16 %v632_v42, %v631_v41  ;;  %v634_v45 = vld [vmem:[%s6163_s1 + $0xe8] sm:$0xff]  ;;  %v635_v47 = vld [vmem:[%s6163_s1 + $0xf0] sm:$0xff]  ;;  %v636_v48 = vld [vmem:[%s6163_s1 + $0xf8] sm:$0xff] }
  0x18   : > { %4312 = vmatpush1.bf16.msra.mxu0 %v4311_v9  ;;  %4474 = vmatpush1.bf16.msra.mxu1 %v4311_v9  ;;  %v4347_v46 = vpack.c.bf16 %v634_v45, %v633_v44  ;;  %v4350_v49 = vpack.c.bf16 %v636_v48, %v635_v47  ;;  %v637_v50 = vld [vmem:[%s6163_s1 + $0x100] sm:$0xff]  ;;  %v638_v51 = vld [vmem:[%s6163_s1 + $0x108] sm:$0xff]  ;;  %v291_v54 = vld [vmem:[%s4759_s19 + $0x30] sm:$0xff] }
  0x19   : > { %4313 = vmatprep.subr.bf16.mxu0 %v4682_v3  ;;  %4459 = vmatprep.subr.bf16.mxu1 %v4682_v3  ;;  %v285_v52 = vld [vmem:[%s4759_s19] sm:$0xff]  ;;  %v4353_v53 = vpack.c.bf16 %v638_v51, %v637_v50  ;;  %v639_v55 = vld [vmem:[%s6163_s1 + $0x110] sm:$0xff]  ;;  %v640_v56 = vld [vmem:[%s6163_s1 + $0x118] sm:$0xff] }
  0x1a   : > { %v526_v57 = vld [vmem:[%s4759_s19 + $0x788] sm:$0xff]  ;;  %v525_v58 = vld [vmem:[%s4759_s19 + $0x780] sm:$0xff]  ;;  %v4356_v60 = vpack.c.bf16 %v640_v56, %v639_v55  ;;  %v296_v61 = vld [vmem:[%s4759_s19 + $0x58] sm:$0xff] }
  0x1b   : > { %1177 = vmatprep.mubr.f32.mxu1 %v526_v57  ;;  %v290_v59 = vld [vmem:[%s4759_s19 + $0x28] sm:$0xff]  ;;  %v641_v62 = vld [vmem:[%s6163_s1 + $0x120] sm:$0xff]  ;;  %v531_v0 = vld [vmem:[%s4759_s19 + $0x7b0] sm:$0xff] }
  0x1c   : > { %4315 = vmatpush1.bf16.msra.mxu0 %v4314_v13  ;;  %4475 = vmatpush1.bf16.msra.mxu1 %v4314_v13  ;;  %v642_v63 = vld [vmem:[%s6163_s1 + $0x128] sm:$0xff]  ;;  %v295_v2 = vld [vmem:[%s4759_s19 + $0x50] sm:$0xff]  ;;  %v301_v5 = vld [vmem:[%s4759_s19 + $0x80] sm:$0xff] }
  0x1d   : > { %4316 = vmatprep.subr.bf16.mxu0 %v4682_v3  ;;  %4460 = vmatprep.subr.bf16.mxu1 %v4682_v3  ;;  %v530_v1 = vld [vmem:[%s4759_s19 + $0x7a8] sm:$0xff]  ;;  %v4359_v4 = vpack.c.bf16 %v642_v63, %v641_v62  ;;  %v643_v6 = vld [vmem:[%s6163_s1 + $0x130] sm:$0xff]  ;;  %v644_v7 = vld [vmem:[%s6163_s1 + $0x138] sm:$0xff] }
  0x1e   : > { %v536_v8 = vld [vmem:[%s4759_s19 + $0x7d8] sm:$0xff]  ;;  %v535_v9 = vld [vmem:[%s4759_s19 + $0x7d0] sm:$0xff]  ;;  %v4362_v11 = vpack.c.bf16 %v644_v7, %v643_v6  ;;  %v306_v12 = vld [vmem:[%s4759_s19 + $0xa8] sm:$0xff] }
  0x1f   : > { %v300_v10 = vld [vmem:[%s4759_s19 + $0x78] sm:$0xff]  ;;  %v645_v13 = vld [vmem:[%s6163_s1 + $0x140] sm:$0xff]  ;;  %v646_v14 = vld [vmem:[%s6163_s1 + $0x148] sm:$0xff] }
  0x20   : > { %4318 = vmatpush1.bf16.msra.mxu0 %v4317_v16  ;;  %4476 = vmatpush1.bf16.msra.mxu1 %v4317_v16  ;;  %v541_v15 = vld [vmem:[%s4759_s19 + $0x800] sm:$0xff]  ;;  %v540_v16 = vld [vmem:[%s4759_s19 + $0x7f8] sm:$0xff]  ;;  %v4365_v18 = vpack.c.bf16 %v646_v14, %v645_v13  ;;  %v647_v20 = vld [vmem:[%s6163_s1 + $0x150] sm:$0xff] }
  0x21   : > { %4319 = vmatprep.subr.bf16.mxu0 %v4682_v3  ;;  %4461 = vmatprep.subr.bf16.mxu1 %v4682_v3  ;;  %v305_v17 = vld [vmem:[%s4759_s19 + $0xa0] sm:$0xff]  ;;  %v648_v21 = vld [vmem:[%s6163_s1 + $0x158] sm:$0xff]  ;;  %v310_v24 = vld [vmem:[%s4759_s19 + $0xc8] sm:$0xff] }
  0x22   : > { %v545_v23 = vld [vmem:[%s4759_s19 + $0x820] sm:$0xff]  ;;  %v316_v26 = vld [vmem:[%s4759_s19 + $0xf8] sm:$0xff]  ;;  %v551_v29 = vld [vmem:[%s4759_s19 + $0x850] sm:$0xff] }
  0x23   : > { %v649_v27 = vld [vmem:[%s6163_s1 + $0x160] sm:$0xff]  ;;  %v550_v30 = vld [vmem:[%s4759_s19 + $0x848] sm:$0xff]  ;;  %v652_v35 = vld [vmem:[%s6163_s1 + $0x178] sm:$0xff] }
  0x24   : > { %4321 = vmatpush1.bf16.msra.mxu0 %v4320_v19  ;;  %4477 = vmatpush1.bf16.msra.mxu1 %v4320_v19  ;;  %v311_v19 = vld [vmem:[%s4759_s19 + $0xd0] sm:$0xff]  ;;  %v321_v33 = vld [vmem:[%s4759_s19 + $0x120] sm:$0xff]  ;;  %v556_v36 = vld [vmem:[%s4759_s19 + $0x878] sm:$0xff] }
  0x25   : > { %4322 = vmatprep.subr.bf16.mxu0 %v4682_v3  ;;  %4462 = vmatprep.subr.bf16.mxu1 %v4682_v3  ;;  %v320_v38 = vld [vmem:[%s4759_s19 + $0x118] sm:$0xff]  ;;  %v653_v41 = vld [vmem:[%s6163_s1 + $0x180] sm:$0xff]  ;;  %v654_v42 = vld [vmem:[%s6163_s1 + $0x188] sm:$0xff] }
  0x26   : > { %v560_v44 = vld [vmem:[%s4759_s19 + $0x898] sm:$0xff]  ;;  %v325_v45 = vld [vmem:[%s4759_s19 + $0x140] sm:$0xff]  ;;  %v331_v47 = vld [vmem:[%s4759_s19 + $0x170] sm:$0xff] }
  0x27   : > { %v655_v48 = vld [vmem:[%s6163_s1 + $0x190] sm:$0xff]  ;;  %v566_v50 = vld [vmem:[%s4759_s19 + $0x8c8] sm:$0xff]  ;;  %v565_v51 = vld [vmem:[%s4759_s19 + $0x8c0] sm:$0xff] }
  0x28   : > { %4324 = vmatpush1.bf16.msra.mxu0 %v4323_v22  ;;  %4478 = vmatpush1.bf16.msra.mxu1 %v4323_v22  ;;  %v546_v22 = vld [vmem:[%s4759_s19 + $0x828] sm:$0xff]  ;;  %v657_v55 = vld [vmem:[%s6163_s1 + $0x1a0] sm:$0xff]  ;;  %v571_v57 = vld [vmem:[%s4759_s19 + $0x8f0] sm:$0xff] }
  0x29   : > { %4325 = vmatprep.subr.bf16.mxu0 %v4682_v3  ;;  %4463 = vmatprep.subr.bf16.mxu1 %v4682_v3  ;;  %v658_v56 = vld [vmem:[%s6163_s1 + $0x1a8] sm:$0xff]  ;;  %v659_v62 = vld [vmem:[%s6163_s1 + $0x1b0] sm:$0xff]  ;;  %v660_v63 = vld [vmem:[%s6163_s1 + $0x1b8] sm:$0xff] }
  0x2a   : > { %v661_v6 = vld [vmem:[%s6163_s1 + $0x1c0] sm:$0xff]  ;;  %v662_v7 = vld [vmem:[%s6163_s1 + $0x1c8] sm:$0xff]  ;;  %v663_v13 = vld [vmem:[%s6163_s1 + $0x1d0] sm:$0xff] }
  0x2b   : > { %v664_v14 = vld [vmem:[%s6163_s1 + $0x1d8] sm:$0xff] }
  0x2c   : > { %4327 = vmatpush1.bf16.msra.mxu0 %v4326_v25  ;;  %4479 = vmatpush1.bf16.msra.mxu1 %v4326_v25  ;;  %v4368_v25 = vpack.c.bf16 %v648_v21, %v647_v20  ;;  %v665_v20 = vld [vmem:[%s6163_s1 + $0x1e0] sm:$0xff]  ;;  %v666_v21 = vld [vmem:[%s6163_s1 + $0x1e8] sm:$0xff] }
  0x2d   : > { %4328 = vmatprep.subr.bf16.mxu0 %v4682_v3  ;;  %4464 = vmatprep.subr.bf16.mxu1 %v4682_v3 }
  0x30   : > { %4330 = vmatpush1.bf16.msra.mxu0 %v4329_v28  ;;  %4480 = vmatpush1.bf16.msra.mxu1 %v4329_v28  ;;  %v650_v28 = vld [vmem:[%s6163_s1 + $0x168] sm:$0xff] }
  0x31   : > { %4331 = vmatprep.subr.bf16.mxu0 %v4682_v3  ;;  %4465 = vmatprep.subr.bf16.mxu1 %v4682_v3  ;;  %v4371_v32 = vpack.c.bf16 %v650_v28, %v649_v27  ;;  %v667_v27 = vld [vmem:[%s6163_s1 + $0x1f0] sm:$0xff]  ;;  %v668_v28 = vld [vmem:[%s6163_s1 + $0x1f8] sm:$0xff] }
  0x34   : > { %4333 = vmatpush1.bf16.msra.mxu0 %v4332_v31  ;;  %4481 = vmatpush1.bf16.msra.mxu1 %v4332_v31  ;;  %v315_v31 = vld [vmem:[%s4759_s19 + $0xf0] sm:$0xff] }
  0x35   : > { %4334 = vmatprep.subr.bf16.mxu0 %v4682_v3  ;;  %4466 = vmatprep.subr.bf16.mxu1 %v4682_v3 }
  0x38   : > { %4336 = vmatpush1.bf16.msra.mxu0 %v4335_v34  ;;  %4482 = vmatpush1.bf16.msra.mxu1 %v4335_v34  ;;  %v651_v34 = vld [vmem:[%s6163_s1 + $0x170] sm:$0xff] }
  0x39   : > { %4337 = vmatprep.subr.bf16.mxu0 %v4682_v3  ;;  %4467 = vmatprep.subr.bf16.mxu1 %v4682_v3  ;;  %v4374_v39 = vpack.c.bf16 %v652_v35, %v651_v34  ;;  %v360_v34 = vld [vmem:[%s4759_s19 + $0x258] sm:$0xff]  ;;  %v4398_v35 = vpack.c.bf16 %v668_v28, %v667_v27  ;;  %v451_v27 = vld [vmem:[%s4759_s19 + $0x530] sm:$0xff]  ;;  %v369_v28 = vld [vmem:[%s4759_s19 + $0x2a0] sm:$0xff] }
  0x3c   : > { %4339 = vmatpush1.bf16.msra.mxu0 %v4338_v37  ;;  %4483 = vmatpush1.bf16.msra.mxu1 %v4338_v37  ;;  %v555_v37 = vld [vmem:[%s4759_s19 + $0x870] sm:$0xff] }
  0x3d   : > { %4340 = vmatprep.subr.bf16.mxu0 %v4682_v3  ;;  %4468 = vmatprep.subr.bf16.mxu1 %v4682_v3 }
  0x40   : > { %4342 = vmatpush1.bf16.msra.mxu0 %v4341_v40  ;;  %4484 = vmatpush1.bf16.msra.mxu1 %v4341_v40  ;;  %v326_v40 = vld [vmem:[%s4759_s19 + $0x148] sm:$0xff] }
  0x41   : > { %4343 = vmatprep.subr.bf16.mxu0 %v4682_v3  ;;  %4469 = vmatprep.subr.bf16.mxu1 %v4682_v3 }
  0x44   : > { %4345 = vmatpush1.bf16.msra.mxu0 %v4344_v43  ;;  %4485 = vmatpush1.bf16.msra.mxu1 %v4344_v43  ;;  %v561_v43 = vld [vmem:[%s4759_s19 + $0x8a0] sm:$0xff] }
  0x45   : > { %4346 = vmatprep.subr.bf16.mxu0 %v4682_v3  ;;  %4470 = vmatprep.subr.bf16.mxu1 %v4682_v3 }
  0x48   : > { %4348 = vmatpush1.bf16.msra.mxu0 %v4347_v46  ;;  %4486 = vmatpush1.bf16.msra.mxu1 %v4347_v46  ;;  %v4377_v46 = vpack.c.bf16 %v654_v42, %v653_v41  ;;  %v600_v41 = vld [vmem:[%s4759_s19 + $0x9d8] sm:$0xff]  ;;  %v371_v42 = vld [vmem:[%s4759_s19 + $0x2b0] sm:$0xff] }
  0x49   : > { %4349 = vmatprep.subr.bf16.mxu0 %v4682_v3  ;;  %4471 = vmatprep.subr.bf16.mxu1 %v4682_v3 }
  0x4c   : > { %4351 = vmatpush1.bf16.msra.mxu0 %v4350_v49  ;;  %4487 = vmatpush1.bf16.msra.mxu1 %v4350_v49  ;;  %v656_v49 = vld [vmem:[%s6163_s1 + $0x198] sm:$0xff] }
  0x4d   : > { %4352 = vmatprep.subr.bf16.mxu0 %v4682_v3 }
  0x4f   : > { %938 = vmatmul.mubr.f32.vlgmr.msra.gmra.mrb[0].mxu0 %v285_v52  ;;  %1178 = vmatmul.mubr.f32.vlgmr.msra.gmra.mrb[0].mxu1 %v525_v58  ;;  %v330_v52 = vld [vmem:[%s4759_s19 + $0x168] sm:$0xff] }
  0x50   : > { %4354 = vmatpush1.bf16.msra.mxu0 %v4353_v53  ;;  %942 = vmatprep.mubr.f32.mxu0 %v291_v54  ;;  %v4380_v53 = vpack.c.bf16 %v656_v49, %v655_v48  ;;  %v336_v54 = vld [vmem:[%s4759_s19 + $0x198] sm:$0xff]  ;;  %v570_v58 = vld [vmem:[%s4759_s19 + $0x8e8] sm:$0xff]  ;;  %v381_v48 = vld [vmem:[%s4759_s19 + $0x300] sm:$0xff] }
  0x51   : > { %4355 = vmatprep.subr.bf16.mxu0 %v4682_v3  ;;  %1182 = vmatprep.mubr.f32.mxu1 %v531_v0  ;;  %v576_v0 = vld [vmem:[%s4759_s19 + $0x918] sm:$0xff]  ;;  %v299_v49 = vld [vmem:[%s4759_s19 + $0x70] sm:$0xff] }
  0x53   : > { %943 = vmatmul.mubr.f32.gmra.mrb[2].mxu0 %v290_v59  ;;  %1183 = vmatmul.mubr.f32.gmra.mrb[2].mxu1 %v530_v1  ;;  %v335_v59 = vld [vmem:[%s4759_s19 + $0x190] sm:$0xff] }
  0x54   : > { %947 = vmatprep.mubr.f32.mxu0 %v296_v61  ;;  %4357 = vmatpush1.bf16.msra.mxu0 %v4356_v60  ;;  %v4383_v60 = vpack.c.bf16 %v658_v56, %v657_v55  ;;  %v341_v61 = vld [vmem:[%s4759_s19 + $0x1c0] sm:$0xff]  ;;  %v575_v1 = vld [vmem:[%s4759_s19 + $0x910] sm:$0xff]  ;;  %v314_v56 = vld [vmem:[%s4759_s19 + $0xe8] sm:$0xff] }
  0x55   : > { %4358 = vmatprep.subr.bf16.mxu0 %v4682_v3  ;;  %1187 = vmatprep.mubr.f32.mxu1 %v536_v8  ;;  %v581_v8 = vld [vmem:[%s4759_s19 + $0x940] sm:$0xff] }
  0x56   : > { %v309_v55 = vld [vmem:[%s4759_s19 + $0xc0] sm:$0xff] }
  0x57   : > { %948 = vmatmul.mubr.f32.gmra.mrb[4].mxu0 %v295_v2  ;;  %1188 = vmatmul.mubr.f32.gmra.mrb[4].mxu1 %v535_v9  ;;  %v340_v2 = vld [vmem:[%s4759_s19 + $0x1b8] sm:$0xff] }
  0x58   : > { %952 = vmatprep.mubr.f32.mxu0 %v301_v5  ;;  %4360 = vmatpush1.bf16.msra.mxu0 %v4359_v4  ;;  %v4386_v4 = vpack.c.bf16 %v660_v63, %v659_v62  ;;  %v346_v5 = vld [vmem:[%s4759_s19 + $0x1e8] sm:$0xff]  ;;  %v580_v9 = vld [vmem:[%s4759_s19 + $0x938] sm:$0xff] }
  0x59   : > { %4361 = vmatprep.subr.bf16.mxu0 %v4682_v3  ;;  %1192 = vmatprep.mubr.f32.mxu1 %v541_v15  ;;  %v586_v15 = vld [vmem:[%s4759_s19 + $0x968] sm:$0xff]  ;;  %v324_v62 = vld [vmem:[%s4759_s19 + $0x138] sm:$0xff] }
  0x5a   : > { %v400_v63 = vld [vmem:[%s4759_s19 + $0x398] sm:$0xff] }
  0x5b   : > { %953 = vmatmul.mubr.f32.gmra.mrb[6].mxu0 %v300_v10  ;;  %1193 = vmatmul.mubr.f32.gmra.mrb[6].mxu1 %v540_v16  ;;  %v345_v10 = vld [vmem:[%s4759_s19 + $0x1e0] sm:$0xff] }
  0x5c   : > { %957 = vmatprep.mubr.f32.mxu0 %v306_v12  ;;  %4363 = vmatpush1.bf16.msra.mxu0 %v4362_v11  ;;  %v4389_v11 = vpack.c.bf16 %v662_v7, %v661_v6  ;;  %v351_v12 = vld [vmem:[%s4759_s19 + $0x210] sm:$0xff]  ;;  %v585_v16 = vld [vmem:[%s4759_s19 + $0x960] sm:$0xff]  ;;  %v410_v6 = vld [vmem:[%s4759_s19 + $0x3e8] sm:$0xff] }
  0x5d   : > { %4364 = vmatprep.subr.bf16.mxu0 %v4682_v3  ;;  %1197 = vmatprep.mubr.f32.mxu1 %v546_v22  ;;  %v591_v22 = vld [vmem:[%s4759_s19 + $0x990] sm:$0xff]  ;;  %v416_v7 = vld [vmem:[%s4759_s19 + $0x418] sm:$0xff] }
  0x5f   : > { %958 = vmatmul.mubr.f32.gmra.mrb[8].mxu0 %v305_v17  ;;  %1198 = vmatmul.mubr.f32.gmra.mrb[8].mxu1 %v545_v23  ;;  %v350_v17 = vld [vmem:[%s4759_s19 + $0x208] sm:$0xff] }
  0x60   : > { %962 = vmatprep.mubr.f32.mxu0 %v311_v19  ;;  %4366 = vmatpush1.bf16.msra.mxu0 %v4365_v18  ;;  %v4392_v18 = vpack.c.bf16 %v664_v14, %v663_v13  ;;  %v356_v19 = vld [vmem:[%s4759_s19 + $0x238] sm:$0xff]  ;;  %v590_v23 = vld [vmem:[%s4759_s19 + $0x988] sm:$0xff]  ;;  %v425_v14 = vld [vmem:[%s4759_s19 + $0x460] sm:$0xff] }
  0x61   : > { %4367 = vmatprep.subr.bf16.mxu0 %v4682_v3  ;;  %1202 = vmatprep.mubr.f32.mxu1 %v551_v29  ;;  %v669_v29 = vld [vmem:[%s6163_s1 + $0x200] sm:$0xff]  ;;  %v426_v13 = vld [vmem:[%s4759_s19 + $0x468] sm:$0xff] }
  0x63   : > { %963 = vmatmul.mubr.f32.gmra.mrb[10].mxu0 %v310_v24  ;;  %1203 = vmatmul.mubr.f32.gmra.mrb[10].mxu1 %v550_v30  ;;  %v355_v24 = vld [vmem:[%s4759_s19 + $0x230] sm:$0xff]  ;;  %v670_v30 = vld [vmem:[%s6163_s1 + $0x208] sm:$0xff] }
  0x64   : > { %967 = vmatprep.mubr.f32.mxu0 %v316_v26  ;;  %4369 = vmatpush1.bf16.msra.mxu0 %v4368_v25  ;;  %v361_v25 = vld [vmem:[%s4759_s19 + $0x260] sm:$0xff]  ;;  %v4395_v26 = vpack.c.bf16 %v666_v21, %v665_v20  ;;  %v435_v20 = vld [vmem:[%s4759_s19 + $0x4b0] sm:$0xff] }
  0x65   : > { %4370 = vmatprep.subr.bf16.mxu0 %v4682_v3  ;;  %1207 = vmatprep.mubr.f32.mxu1 %v556_v36  ;;  %v366_v36 = vld [vmem:[%s4759_s19 + $0x288] sm:$0xff]  ;;  %v441_v21 = vld [vmem:[%s4759_s19 + $0x4e0] sm:$0xff] }
  0x67   : > { %968 = vmatmul.mubr.f32.gmra.mrb[12].mxu0 %v315_v31  ;;  %1208 = vmatmul.mubr.f32.gmra.mrb[12].mxu1 %v555_v37  ;;  %v596_v31 = vld [vmem:[%s4759_s19 + $0x9b8] sm:$0xff]  ;;  %v671_v37 = vld [vmem:[%s6163_s1 + $0x210] sm:$0xff] }
  0x68   : > { %972 = vmatprep.mubr.f32.mxu0 %v321_v33  ;;  %4372 = vmatpush1.bf16.msra.mxu0 %v4371_v32  ;;  %v4400_v32 = vpack.c.bf16 %v670_v30, %v669_v29  ;;  %v595_v33 = vld [vmem:[%s4759_s19 + $0x9b0] sm:$0xff]  ;;  %v374_v29 = vld [vmem:[%s4759_s19 + $0x2c8] sm:$0xff] }
  0x69   : > { %4373 = vmatprep.subr.bf16.mxu0 %v4682_v3  ;;  %1212 = vmatprep.mubr.f32.mxu1 %v561_v43  ;;  %v289_v43 = vld [vmem:[%s4759_s19 + $0x20] sm:$0xff]  ;;  %v450_v30 = vld [vmem:[%s4759_s19 + $0x528] sm:$0xff] }
  0x6a   : > { %4401 = vmatprep.subr.bf16.mxu1 %v4400_v32 }
  0x6b   : > { %973 = vmatmul.mubr.f32.gmra.mrb[14].mxu0 %v320_v38  ;;  %1213 = vmatmul.mubr.f32.gmra.mrb[14].mxu1 %v560_v44  ;;  %v672_v38 = vld [vmem:[%s6163_s1 + $0x218] sm:$0xff]  ;;  %v294_v44 = vld [vmem:[%s4759_s19 + $0x48] sm:$0xff] }
  0x6c   : > { %977 = vmatprep.mubr.f32.mxu0 %v326_v40  ;;  %4375 = vmatpush1.bf16.msra.mxu0 %v4374_v39  ;;  %v601_v39 = vld [vmem:[%s4759_s19 + $0x9e0] sm:$0xff]  ;;  %v4404_v40 = vpack.c.bf16 %v672_v38, %v671_v37  ;;  %v466_v37 = vld [vmem:[%s4759_s19 + $0x5a8] sm:$0xff] }
  0x6d   : > { %4376 = vmatprep.subr.bf16.mxu0 %v4682_v3  ;;  %1217 = vmatprep.mubr.f32.mxu1 %v566_v50  ;;  %v304_v50 = vld [vmem:[%s4759_s19 + $0x98] sm:$0xff]  ;;  %v465_v38 = vld [vmem:[%s4759_s19 + $0x5a0] sm:$0xff] }
  0x6e   : > { %4403 = vmatpush3.bf16.msra.mxu1 %v4400_v32  ;;  %v455_v32 = vld [vmem:[%s4759_s19 + $0x550] sm:$0xff] }
  0x6f   : > { %978 = vmatmul.mubr.f32.gmra.mrb[16].mxu0 %v325_v45  ;;  %1218 = vmatmul.mubr.f32.gmra.mrb[16].mxu1 %v565_v51  ;;  %v370_v45 = vld [vmem:[%s4759_s19 + $0x2a8] sm:$0xff]  ;;  %v380_v51 = vld [vmem:[%s4759_s19 + $0x2f8] sm:$0xff] }
  0x70   : > { %982 = vmatprep.mubr.f32.mxu0 %v331_v47  ;;  %4378 = vmatpush1.bf16.msra.mxu0 %v4377_v46  ;;  %v376_v46 = vld [vmem:[%s4759_s19 + $0x2d8] sm:$0xff]  ;;  %v375_v47 = vld [vmem:[%s4759_s19 + $0x2d0] sm:$0xff] }
  0x71   : > { %4379 = vmatprep.subr.bf16.mxu0 %v4682_v3  ;;  %1222 = vmatprep.mubr.f32.mxu1 %v571_v57  ;;  %v390_v57 = vld [vmem:[%s4759_s19 + $0x348] sm:$0xff] }
  0x72   : > { %4405 = vmatprep.subr.bf16.mxu1 %v4404_v40 }
  0x73   : > { %983 = vmatmul.mubr.f32.gmra.mrb[18].mxu0 %v330_v52  ;;  %1223 = vmatmul.mubr.f32.gmra.mrb[18].mxu1 %v570_v58  ;;  %v386_v52 = vld [vmem:[%s4759_s19 + $0x328] sm:$0xff]  ;;  %v396_v58 = vld [vmem:[%s4759_s19 + $0x378] sm:$0xff] }
  0x74   : > { %987 = vmatprep.mubr.f32.mxu0 %v336_v54  ;;  %4381 = vmatpush1.bf16.msra.mxu0 %v4380_v53  ;;  %v385_v53 = vld [vmem:[%s4759_s19 + $0x320] sm:$0xff]  ;;  %v391_v54 = vld [vmem:[%s4759_s19 + $0x350] sm:$0xff] }
  0x75   : > { %4382 = vmatprep.subr.bf16.mxu0 %v4682_v3  ;;  %1227 = vmatprep.mubr.f32.mxu1 %v576_v0  ;;  %v406_v0 = vld [vmem:[%s4759_s19 + $0x3c8] sm:$0xff] }
  0x76   : > { %4407 = vmatpush3.bf16.msra.mxu1 %v4404_v40  ;;  %v389_v40 = vld [vmem:[%s4759_s19 + $0x340] sm:$0xff] }
  0x77   : > { %988 = vmatmul.mubr.f32.gmra.mrb[20].mxu0 %v335_v59  ;;  %1228 = vmatmul.mubr.f32.gmra.mrb[20].mxu1 %v575_v1  ;;  %v395_v59 = vld [vmem:[%s4759_s19 + $0x370] sm:$0xff]  ;;  %v405_v1 = vld [vmem:[%s4759_s19 + $0x3c0] sm:$0xff] }
  0x78   : > { %992 = vmatprep.mubr.f32.mxu0 %v341_v61  ;;  %4384 = vmatpush1.bf16.msra.mxu0 %v4383_v60  ;;  %v401_v60 = vld [vmem:[%s4759_s19 + $0x3a0] sm:$0xff]  ;;  %v319_v61 = vld [vmem:[%s4759_s19 + $0x110] sm:$0xff] }
  0x79   : > { %4385 = vmatprep.subr.bf16.mxu0 %v4682_v3  ;;  %1232 = vmatprep.mubr.f32.mxu1 %v581_v8  ;;  %v415_v8 = vld [vmem:[%s4759_s19 + $0x410] sm:$0xff] }
  0x7b   : > { %993 = vmatmul.mubr.f32.gmra.mrb[22].mxu0 %v340_v2  ;;  %1233 = vmatmul.mubr.f32.gmra.mrb[22].mxu1 %v580_v9  ;;  %v411_v2 = vld [vmem:[%s4759_s19 + $0x3f0] sm:$0xff]  ;;  %v421_v9 = vld [vmem:[%s4759_s19 + $0x440] sm:$0xff] }
  0x7c   : > { %997 = vmatprep.mubr.f32.mxu0 %v346_v5  ;;  %4387 = vmatpush1.bf16.msra.mxu0 %v4386_v4  ;;  %v329_v4 = vld [vmem:[%s4759_s19 + $0x160] sm:$0xff]  ;;  %v334_v5 = vld [vmem:[%s4759_s19 + $0x188] sm:$0xff] }
  0x7d   : > { %4388 = vmatprep.subr.bf16.mxu0 %v4682_v3  ;;  %1237 = vmatprep.mubr.f32.mxu1 %v586_v15  ;;  %v431_v15 = vld [vmem:[%s4759_s19 + $0x490] sm:$0xff] }
  0x7f   : > { %998 = vmatmul.mubr.f32.gmra.mrb[24].mxu0 %v345_v10  ;;  %1238 = vmatmul.mubr.f32.gmra.mrb[24].mxu1 %v585_v16  ;;  %v339_v10 = vld [vmem:[%s4759_s19 + $0x1b0] sm:$0xff]  ;;  %v349_v16 = vld [vmem:[%s4759_s19 + $0x200] sm:$0xff] }
  0x80   : > { %1002 = vmatprep.mubr.f32.mxu0 %v351_v12  ;;  %4390 = vmatpush1.bf16.msra.mxu0 %v4389_v11  ;;  %v344_v11 = vld [vmem:[%s4759_s19 + $0x1d8] sm:$0xff] }
  0x81   : > { %4391 = vmatprep.subr.bf16.mxu0 %v4682_v3  ;;  %1242 = vmatprep.mubr.f32.mxu1 %v591_v22  ;;  %v420_v12 = vld [vmem:[%s4759_s19 + $0x438] sm:$0xff]  ;;  %v359_v22 = vld [vmem:[%s4759_s19 + $0x250] sm:$0xff] }
  0x83   : > { %1003 = vmatmul.mubr.f32.gmra.mrb[26].mxu0 %v350_v17  ;;  %1243 = vmatmul.mubr.f32.gmra.mrb[26].mxu1 %v590_v23  ;;  %v354_v17 = vld [vmem:[%s4759_s19 + $0x228] sm:$0xff]  ;;  %v364_v23 = vld [vmem:[%s4759_s19 + $0x278] sm:$0xff] }
  0x84   : > { %1007 = vmatprep.mubr.f32.mxu0 %v356_v19  ;;  %4393 = vmatpush1.bf16.msra.mxu0 %v4392_v18  ;;  %v430_v18 = vld [vmem:[%s4759_s19 + $0x488] sm:$0xff]  ;;  %v436_v19 = vld [vmem:[%s4759_s19 + $0x4b8] sm:$0xff] }
  0x85   : > { %4394 = vmatprep.subr.bf16.mxu0 %v4682_v3  ;;  %1247 = vmatprep.mubr.f32.mxu1 %v596_v31  ;;  %v456_v31 = vld [vmem:[%s4759_s19 + $0x558] sm:$0xff] }
  0x87   : > { %1008 = vmatmul.mubr.f32.gmra.mrb[28].mxu0 %v355_v24  ;;  %1248 = vmatmul.mubr.f32.gmra.mrb[28].mxu1 %v595_v33  ;;  %v440_v24 = vld [vmem:[%s4759_s19 + $0x4d8] sm:$0xff]  ;;  %v461_v33 = vld [vmem:[%s4759_s19 + $0x580] sm:$0xff] }
  0x88   : > { %1012 = vmatprep.mubr.f32.mxu0 %v361_v25  ;;  %4396 = vmatpush1.bf16.msra.mxu0 %v4395_v26  ;;  %v446_v25 = vld [vmem:[%s4759_s19 + $0x508] sm:$0xff]  ;;  %v445_v26 = vld [vmem:[%s4759_s19 + $0x500] sm:$0xff] }
  0x89   : > { %4397 = vmatprep.subr.bf16.mxu0 %v4682_v3  ;;  %v365_v3 = vld [vmem:[%s4759_s19 + $0x280] sm:$0xff]  ;;  %1252 = vmatprep.mubr.f32.mxu1 %v601_v39  ;;  %v471_v39 = vld [vmem:[%s4759_s19 + $0x5d0] sm:$0xff] }
  0x8b   : > { %1013 = vmatmul.mubr.f32.gmra.mrb[30].mxu0 %v360_v34  ;;  %1253 = vmatmul.mubr.f32.gmra.mrb[30].mxu1 %v600_v41  ;;  %v379_v34 = vld [vmem:[%s4759_s19 + $0x2f0] sm:$0xff]  ;;  %v394_v41 = vld [vmem:[%s4759_s19 + $0x368] sm:$0xff] }
  0x8c   : > { %1017 = vmatprep.mubr.f32.mxu0 %v366_v36  ;;  %4399 = vmatpush1.bf16.msra.mxu0 %v4398_v35  ;;  %v384_v35 = vld [vmem:[%s4759_s19 + $0x318] sm:$0xff] }
  0x8d   : > { %3968 = vmatprep.mubr.msk.f32.mxu1 %vm680_vm0, %v289_v43  ;;  %v460_v36 = vld [vmem:[%s4759_s19 + $0x578] sm:$0xff]  ;;  %v475_v43 = vld [vmem:[%s4759_s19 + $0x5f0] sm:$0xff] }
  0x8f   : > { %1018 = vmatmul.mubr.f32.gmra.mrb[32].mxu0 %v365_v3  ;;  %3969 = vmatmul.mubr.msk.f32.vlgmr.msra.gmra.mrb[32].mxu1 %vm680_vm0, %v294_v44  ;;  %v470_v3 = vld [vmem:[%s4759_s19 + $0x5c8] sm:$0xff]  ;;  %v481_v44 = vld [vmem:[%s4759_s19 + $0x620] sm:$0xff] }
  0x90   : > { %1022 = vmatprep.mubr.f32.mxu0 %v371_v42  ;;  %3971 = vmatprep.mubr.msk.f32.mxu1 %vm680_vm0, %v299_v49  ;;  %v476_v42 = vld [vmem:[%s4759_s19 + $0x5f8] sm:$0xff]  ;;  %v485_v49 = vld [vmem:[%s4759_s19 + $0x640] sm:$0xff] }
  0x93   : > { %1023 = vmatmul.mubr.f32.gmra.mrb[34].mxu0 %v370_v45  ;;  %3972 = vmatmul.mubr.msk.f32.gmra.mrb[34].mxu1 %vm680_vm0, %v304_v50  ;;  %v399_v45 = vld [vmem:[%s4759_s19 + $0x390] sm:$0xff] }
  0x94   : > { %1027 = vmatprep.mubr.f32.mxu0 %v376_v46  ;;  %3974 = vmatprep.mubr.msk.f32.mxu1 %vm680_vm0, %v309_v55  ;;  %v404_v46 = vld [vmem:[%s4759_s19 + $0x3b8] sm:$0xff]  ;;  %v491_v50 = vld [vmem:[%s4759_s19 + $0x670] sm:$0xff] }
  0x95   : > { %v495_v55 = vld [vmem:[%s4759_s19 + $0x690] sm:$0xff] }
  0x97   : > { %1028 = vmatmul.mubr.f32.gmra.mrb[36].mxu0 %v375_v47  ;;  %3975 = vmatmul.mubr.msk.f32.gmra.mrb[36].mxu1 %vm680_vm0, %v314_v56  ;;  %v480_v47 = vld [vmem:[%s4759_s19 + $0x618] sm:$0xff]  ;;  %v501_v56 = vld [vmem:[%s4759_s19 + $0x6c0] sm:$0xff] }
  0x98   : > { %1032 = vmatprep.mubr.f32.mxu0 %v381_v48  ;;  %3977 = vmatprep.mubr.msk.f32.mxu1 %vm680_vm0, %v319_v61  ;;  %v486_v48 = vld [vmem:[%s4759_s19 + $0x648] sm:$0xff]  ;;  %v505_v61 = vld [vmem:[%s4759_s19 + $0x6e0] sm:$0xff] }
  0x9b   : > { %1033 = vmatmul.mubr.f32.gmra.mrb[38].mxu0 %v380_v51  ;;  %3978 = vmatmul.mubr.msk.f32.gmra.mrb[38].mxu1 %vm680_vm0, %v324_v62  ;;  %v409_v51 = vld [vmem:[%s4759_s19 + $0x3e0] sm:$0xff]  ;;  %v511_v62 = vld [vmem:[%s4759_s19 + $0x710] sm:$0xff] }
  0x9c   : > { %1037 = vmatprep.mubr.f32.mxu0 %v386_v52  ;;  %3980 = vmatprep.mubr.msk.f32.mxu1 %vm680_vm0, %v329_v4  ;;  %v414_v52 = vld [vmem:[%s4759_s19 + $0x408] sm:$0xff]  ;;  %v515_v4 = vld [vmem:[%s4759_s19 + $0x730] sm:$0xff] }
  0x9f   : > { %1038 = vmatmul.mubr.f32.gmra.mrb[40].mxu0 %v385_v53  ;;  %3981 = vmatmul.mubr.msk.f32.gmra.mrb[40].mxu1 %vm680_vm0, %v334_v5  ;;  %v490_v53 = vld [vmem:[%s4759_s19 + $0x668] sm:$0xff]  ;;  %v521_v5 = vld [vmem:[%s4759_s19 + $0x760] sm:$0xff] }
  0xa0   : > { %1042 = vmatprep.mubr.f32.mxu0 %v391_v54  ;;  %3983 = vmatprep.mubr.msk.f32.mxu1 %vm680_vm0, %v339_v10  ;;  %v496_v54 = vld [vmem:[%s4759_s19 + $0x698] sm:$0xff]  ;;  %v287_v10 = vld [vmem:[%s4759_s19 + $0x10] sm:$0xff] }
  0xa3   : > { %1043 = vmatmul.mubr.f32.gmra.mrb[42].mxu0 %v390_v57  ;;  %3984 = vmatmul.mubr.msk.f32.gmra.mrb[42].mxu1 %vm680_vm0, %v344_v11  ;;  %v419_v57 = vld [vmem:[%s4759_s19 + $0x430] sm:$0xff]  ;;  %v293_v11 = vld [vmem:[%s4759_s19 + $0x40] sm:$0xff] }
  0xa4   : > { %1047 = vmatprep.mubr.f32.mxu0 %v396_v58  ;;  %3986 = vmatprep.mubr.msk.f32.mxu1 %vm680_vm0, %v349_v16  ;;  %v424_v58 = vld [vmem:[%s4759_s19 + $0x458] sm:$0xff]  ;;  %v297_v16 = vld [vmem:[%s4759_s19 + $0x60] sm:$0xff] }
  0xa7   : > { %1048 = vmatmul.mubr.f32.gmra.mrb[44].mxu0 %v395_v59  ;;  %3987 = vmatmul.mubr.msk.f32.gmra.mrb[44].mxu1 %vm680_vm0, %v354_v17  ;;  %v500_v59 = vld [vmem:[%s4759_s19 + $0x6b8] sm:$0xff]  ;;  %v303_v17 = vld [vmem:[%s4759_s19 + $0x90] sm:$0xff] }
  0xa8   : > { %1052 = vmatprep.mubr.f32.mxu0 %v401_v60  ;;  %3989 = vmatprep.mubr.msk.f32.mxu1 %vm680_vm0, %v359_v22  ;;  %v506_v60 = vld [vmem:[%s4759_s19 + $0x6e8] sm:$0xff]  ;;  %v307_v22 = vld [vmem:[%s4759_s19 + $0xb0] sm:$0xff] }
  0xab   : > { %1053 = vmatmul.mubr.f32.gmra.mrb[46].mxu0 %v400_v63  ;;  %3990 = vmatmul.mubr.msk.f32.gmra.mrb[46].mxu1 %vm680_vm0, %v364_v23  ;;  %v429_v63 = vld [vmem:[%s4759_s19 + $0x480] sm:$0xff] }
  0xac   : > { %1057 = vmatprep.mubr.f32.mxu0 %v406_v0  ;;  %3992 = vmatprep.mubr.msk.f32.mxu1 %vm680_vm0, %v369_v28  ;;  %v434_v0 = vld [vmem:[%s4759_s19 + $0x4a8] sm:$0xff]  ;;  %v313_v23 = vld [vmem:[%s4759_s19 + $0xe0] sm:$0xff] }
  0xad   : > { %v317_v28 = vld [vmem:[%s4759_s19 + $0x100] sm:$0xff] }
  0xaf   : > { %1058 = vmatmul.mubr.f32.gmra.mrb[48].mxu0 %v405_v1  ;;  %3993 = vmatmul.mubr.msk.f32.gmra.mrb[48].mxu1 %vm680_vm0, %v374_v29  ;;  %v510_v1 = vld [vmem:[%s4759_s19 + $0x708] sm:$0xff]  ;;  %v323_v29 = vld [vmem:[%s4759_s19 + $0x130] sm:$0xff] }
  0xb0   : > { %1062 = vmatprep.mubr.f32.mxu0 %v411_v2  ;;  %3995 = vmatprep.mubr.msk.f32.mxu1 %vm680_vm0, %v379_v34  ;;  %v516_v2 = vld [vmem:[%s4759_s19 + $0x738] sm:$0xff]  ;;  %v327_v34 = vld [vmem:[%s4759_s19 + $0x150] sm:$0xff] }
  0xb3   : > { %1063 = vmatmul.mubr.f32.gmra.mrb[50].mxu0 %v410_v6  ;;  %3996 = vmatmul.mubr.msk.f32.gmra.mrb[50].mxu1 %vm680_vm0, %v384_v35  ;;  %v439_v6 = vld [vmem:[%s4759_s19 + $0x4d0] sm:$0xff]  ;;  %v333_v35 = vld [vmem:[%s4759_s19 + $0x180] sm:$0xff] }
  0xb4   : > { %1067 = vmatprep.mubr.f32.mxu0 %v416_v7  ;;  %3998 = vmatprep.mubr.msk.f32.mxu1 %vm680_vm0, %v389_v40  ;;  %v444_v7 = vld [vmem:[%s4759_s19 + $0x4f8] sm:$0xff]  ;;  %v337_v40 = vld [vmem:[%s4759_s19 + $0x1a0] sm:$0xff] }
  0xb7   : > { %1068 = vmatmul.mubr.f32.gmra.mrb[52].mxu0 %v415_v8  ;;  %3999 = vmatmul.mubr.msk.f32.gmra.mrb[52].mxu1 %vm680_vm0, %v394_v41  ;;  %v520_v8 = vld [vmem:[%s4759_s19 + $0x758] sm:$0xff]  ;;  %v343_v41 = vld [vmem:[%s4759_s19 + $0x1d0] sm:$0xff] }
  0xb8   : > { %1072 = vmatprep.mubr.f32.mxu0 %v421_v9  ;;  %4001 = vmatprep.mubr.msk.f32.mxu1 %vm680_vm0, %v399_v45  ;;  %v288_v9 = vld [vmem:[%s4759_s19 + $0x18] sm:$0xff]  ;;  %v347_v45 = vld [vmem:[%s4759_s19 + $0x1f0] sm:$0xff] }
  0xbb   : > { %1073 = vmatmul.mubr.f32.gmra.mrb[54].mxu0 %v420_v12  ;;  %4002 = vmatmul.mubr.msk.f32.gmra.mrb[54].mxu1 %vm680_vm0, %v404_v46  ;;  %v449_v12 = vld [vmem:[%s4759_s19 + $0x520] sm:$0xff] }
  0xbc   : > { %1077 = vmatprep.mubr.f32.mxu0 %v426_v13  ;;  %4004 = vmatprep.mubr.msk.f32.mxu1 %vm680_vm0, %v409_v51  ;;  %v454_v13 = vld [vmem:[%s4759_s19 + $0x548] sm:$0xff]  ;;  %v353_v46 = vld [vmem:[%s4759_s19 + $0x220] sm:$0xff] }
  0xbd   : > { %v358_v51 = vld [vmem:[%s4759_s19 + $0x248] sm:$0xff] }
  0xbf   : > { %1078 = vmatmul.mubr.f32.gmra.mrb[56].mxu0 %v425_v14  ;;  %4005 = vmatmul.mubr.msk.f32.gmra.mrb[56].mxu1 %vm680_vm0, %v414_v52  ;;  %v292_v14 = vld [vmem:[%s4759_s19 + $0x38] sm:$0xff] }
  0xc0   : > { %1082 = vmatprep.mubr.f32.mxu0 %v431_v15  ;;  %4007 = vmatprep.mubr.msk.f32.mxu1 %vm680_vm0, %v419_v57  ;;  %v298_v15 = vld [vmem:[%s4759_s19 + $0x68] sm:$0xff] }
  0xc3   : > { %1083 = vmatmul.mubr.f32.gmra.mrb[58].mxu0 %v430_v18  ;;  %4008 = vmatmul.mubr.msk.f32.gmra.mrb[58].mxu1 %vm680_vm0, %v424_v58  ;;  %v459_v18 = vld [vmem:[%s4759_s19 + $0x570] sm:$0xff] }
  0xc4   : > { %1087 = vmatprep.mubr.f32.mxu0 %v436_v19  ;;  %4010 = vmatprep.mubr.msk.f32.mxu1 %vm680_vm0, %v429_v63  ;;  %v464_v19 = vld [vmem:[%s4759_s19 + $0x598] sm:$0xff]  ;;  %v519_v58 = vld [vmem:[%s4759_s19 + $0x750] sm:$0xff] }
  0xc7   : > { %1088 = vmatmul.mubr.f32.gmra.mrb[60].mxu0 %v435_v20  ;;  %4011 = vmatmul.mubr.msk.f32.gmra.mrb[60].mxu1 %vm680_vm0, %v434_v0  ;;  %v302_v20 = vld [vmem:[%s4759_s19 + $0x88] sm:$0xff]  ;;  %v368_v0 = vld [vmem:[%s4759_s19 + $0x298] sm:$0xff] }
  0xc8   : > { %1092 = vmatprep.mubr.f32.mxu0 %v441_v21  ;;  %4013 = vmatprep.mubr.msk.f32.mxu1 %vm680_vm0, %v439_v6  ;;  %v308_v21 = vld [vmem:[%s4759_s19 + $0xb8] sm:$0xff] }
  0xcb   : > { %1093 = vmatmul.mubr.f32.gmra.mrb[62].mxu0 %v440_v24  ;;  %4014 = vmatmul.mubr.msk.f32.gmra.mrb[62].mxu1 %vm680_vm0, %v444_v7  ;;  %v469_v24 = vld [vmem:[%s4759_s19 + $0x5c0] sm:$0xff]  ;;  %v367_v7 = vld [vmem:[%s4759_s19 + $0x290] sm:$0xff] }
  0xcc   : > { %1097 = vmatprep.mubr.f32.mxu0 %v446_v25  ;;  %4016 = vmatprep.mubr.msk.f32.mxu1 %vm680_vm0, %v449_v12  ;;  %v474_v25 = vld [vmem:[%s4759_s19 + $0x5e8] sm:$0xff] }
  0xcf   : > { %1098 = vmatmul.mubr.f32.gmra.mrb[64].mxu0 %v445_v26  ;;  %4017 = vmatmul.mubr.msk.f32.gmra.mrb[64].mxu1 %vm680_vm0, %v454_v13  ;;  %v312_v26 = vld [vmem:[%s4759_s19 + $0xd8] sm:$0xff]  ;;  %v2092_v13 = vld [vmem:[%s6165_s3] sm:$0xff] }
  0xd0   : > { %1102 = vmatprep.mubr.f32.mxu0 %v451_v27  ;;  %4019 = vmatprep.mubr.msk.f32.mxu1 %vm680_vm0, %v459_v18  ;;  %v318_v27 = vld [vmem:[%s4759_s19 + $0x108] sm:$0xff]  ;;  %v372_v18 = vld [vmem:[%s4759_s19 + $0x2b8] sm:$0xff] }
  0xd3   : > { %1103 = vmatmul.mubr.f32.gmra.mrb[66].mxu0 %v450_v30  ;;  %4020 = vmatmul.mubr.msk.f32.gmra.mrb[66].mxu1 %vm680_vm0, %v464_v19  ;;  %v479_v30 = vld [vmem:[%s4759_s19 + $0x610] sm:$0xff] }
  0xd4   : > { %1107 = vmatprep.mubr.f32.mxu0 %v456_v31  ;;  %4022 = vmatprep.mubr.msk.f32.mxu1 %vm680_vm0, %v469_v24  ;;  %v484_v31 = vld [vmem:[%s4759_s19 + $0x638] sm:$0xff]  ;;  %v2094_v24 = vld [vmem:[%s6165_s3 + $0x10] sm:$0xff] }
  0xd7   : > { %1108 = vmatmul.mubr.f32.gmra.mrb[68].mxu0 %v455_v32  ;;  %4023 = vmatmul.mubr.msk.f32.gmra.mrb[68].mxu1 %vm680_vm0, %v474_v25  ;;  %v322_v32 = vld [vmem:[%s4759_s19 + $0x128] sm:$0xff]  ;;  %v2095_v25 = vld [vmem:[%s6165_s3 + $0x18] sm:$0xff] }
  0xd8   : > { %1112 = vmatprep.mubr.f32.mxu0 %v461_v33  ;;  %4025 = vmatprep.mubr.msk.f32.mxu1 %vm680_vm0, %v479_v30  ;;  %v328_v33 = vld [vmem:[%s4759_s19 + $0x158] sm:$0xff] }
  0xdb   : > { %1113 = vmatmul.mubr.f32.gmra.mrb[70].mxu0 %v460_v36  ;;  %4026 = vmatmul.mubr.msk.f32.gmra.mrb[70].mxu1 %vm680_vm0, %v484_v31  ;;  %v489_v36 = vld [vmem:[%s4759_s19 + $0x660] sm:$0xff]  ;;  %v383_v31 = vld [vmem:[%s4759_s19 + $0x310] sm:$0xff] }
  0xdc   : > { %1117 = vmatprep.mubr.f32.mxu0 %v466_v37  ;;  %4028 = vmatprep.mubr.msk.f32.mxu1 %vm680_vm0, %v489_v36  ;;  %v494_v37 = vld [vmem:[%s4759_s19 + $0x688] sm:$0xff] }
  0xdd   : > { %v2097_v36 = vld [vmem:[%s6165_s3 + $0x28] sm:$0xff] }
  0xdf   : > { %1118 = vmatmul.mubr.f32.gmra.mrb[72].mxu0 %v465_v38  ;;  %v332_v38 = vld [vmem:[%s4759_s19 + $0x178] sm:$0xff]  ;;  %4029 = vmatmul.mubr.msk.f32.gmra.mrb[72].mxu1 %vm680_vm0, %v494_v37 }
  0xe0   : > { %1122 = vmatprep.mubr.f32.mxu0 %v471_v39  ;;  %v338_v39 = vld [vmem:[%s4759_s19 + $0x1a8] sm:$0xff]  ;;  %v564_v37 = vld [vmem:[%s4759_s19 + $0x8b8] sm:$0xff] }
  0xe3   : > { %1123 = vmatmul.mubr.f32.gmra.mrb[74].mxu0 %v470_v3  ;;  %v499_v3 = vld [vmem:[%s4759_s19 + $0x6b0] sm:$0xff] }
  0xe4   : > { %1127 = vmatprep.mubr.f32.mxu0 %v476_v42  ;;  %4031 = vmatprep.mubr.msk.f32.mxu1 %vm680_vm0, %v499_v3  ;;  %v504_v42 = vld [vmem:[%s4759_s19 + $0x6d8] sm:$0xff] }
  0xe5   : > { %4032 = vmatmul.mubr.msk.f32.gmra.mrb[74].mxu1 %vm680_vm0, %v504_v42  ;;  %v388_v3 = vld [vmem:[%s4759_s19 + $0x338] sm:$0xff] }
  0xe7   : > { %1128 = vmatmul.mubr.f32.gmra.mrb[76].mxu0 %v475_v43  ;;  %v342_v43 = vld [vmem:[%s4759_s19 + $0x1c8] sm:$0xff] }
  0xe8   : > { %1132 = vmatprep.mubr.f32.mxu0 %v481_v44  ;;  %v348_v44 = vld [vmem:[%s4759_s19 + $0x1f8] sm:$0xff] }
  0xeb   : > { %1133 = vmatmul.mubr.f32.gmra.mrb[78].mxu0 %v480_v47  ;;  %v509_v47 = vld [vmem:[%s4759_s19 + $0x700] sm:$0xff] }
  0xec   : > { %1137 = vmatprep.mubr.f32.mxu0 %v486_v48  ;;  %4034 = vmatprep.mubr.msk.f32.mxu1 %vm680_vm0, %v509_v47  ;;  %v514_v48 = vld [vmem:[%s4759_s19 + $0x728] sm:$0xff] }
  0xed   : > { %4035 = vmatmul.mubr.msk.f32.gmra.mrb[76].mxu1 %vm680_vm0, %v514_v48  ;;  %v574_v47 = vld [vmem:[%s4759_s19 + $0x908] sm:$0xff] }
  0xee   : > { %4037 = vmatprep.mubr.msk.f32.mxu1 %vm680_vm0, %v519_v58 }
  0xef   : > { %1138 = vmatmul.mubr.f32.gmra.mrb[80].mxu0 %v485_v49  ;;  %v352_v49 = vld [vmem:[%s4759_s19 + $0x218] sm:$0xff] }
  0xf0   : > { %1142 = vmatprep.mubr.f32.mxu0 %v491_v50 }
  0xf3   : > { %1143 = vmatmul.mubr.f32.gmra.mrb[82].mxu0 %v490_v53 }
  0xf4   : > { %1147 = vmatprep.mubr.f32.mxu0 %v496_v54  ;;  %v357_v54 = vld [vmem:[%s4759_s19 + $0x240] sm:$0xff] }
  0xf7   : > { %1148 = vmatmul.mubr.f32.gmra.mrb[84].mxu0 %v495_v55 }
  0xf8   : > { %1152 = vmatprep.mubr.f32.mxu0 %v501_v56  ;;  %v363_v56 = vld [vmem:[%s4759_s19 + $0x270] sm:$0xff] }
  0xfb   : > { %1153 = vmatmul.mubr.f32.gmra.mrb[86].mxu0 %v500_v59 }
  0xfc   : > { %1157 = vmatprep.mubr.f32.mxu0 %v506_v60  ;;  %v524_v60 = vld [vmem:[%s4759_s19 + $0x778] sm:$0xff] }
  0xfd   : > { %4038 = vmatmul.mubr.msk.f32.gmra.mrb[78].mxu1 %vm680_vm0, %v524_v60  ;;  %v2101_v60 = vld [vmem:[%s6165_s3 + $0x48] sm:$0xff] }
  0xff   : > { %1158 = vmatmul.mubr.f32.gmra.mrb[88].mxu0 %v505_v61 }
 0x100   : > { %1162 = vmatprep.mubr.f32.mxu0 %v511_v62  ;;  %v362_v62 = vld [vmem:[%s4759_s19 + $0x268] sm:$0xff] }
 0x103   : > { %1163 = vmatmul.mubr.f32.gmra.mrb[90].mxu0 %v510_v1 }
 0x104   : > { %1167 = vmatprep.mubr.f32.mxu0 %v516_v2  ;;  %v529_v2 = vld [vmem:[%s4759_s19 + $0x7a0] sm:$0xff] }
 0x105   : > { %4040 = vmatprep.mubr.msk.f32.mxu1 %vm680_vm0, %v529_v2  ;;  %v398_v2 = vld [vmem:[%s4759_s19 + $0x388] sm:$0xff] }
 0x107   : > { %1168 = vmatmul.mubr.f32.gmra.mrb[92].mxu0 %v515_v4 }
 0x108   : > { %1172 = vmatprep.mubr.f32.mxu0 %v521_v5  ;;  %v534_v5 = vld [vmem:[%s4759_s19 + $0x7c8] sm:$0xff] }
 0x109   : > { %4041 = vmatmul.mubr.msk.f32.gmra.mrb[80].mxu1 %vm680_vm0, %v534_v5 }
 0x10b   : > { %1173 = vmatmul.mubr.f32.gmra.mrb[94].mxu0 %v520_v8 }
 0x10c   : > { %1322 = vmatprep.mubr.f32.mxu0 %v288_v9  ;;  %v373_v9 = vld [vmem:[%s4759_s19 + $0x2c0] sm:$0xff] }
 0x10f   : > { %1323 = vmatmul.mubr.f32.vlgmr.msra.gmra.mrb[0].mxu0 %v287_v10 }
 0x110   : > { %1327 = vmatprep.mubr.f32.mxu0 %v293_v11  ;;  %v539_v11 = vld [vmem:[%s4759_s19 + $0x7f0] sm:$0xff] }
 0x111   : > { %4043 = vmatprep.mubr.msk.f32.mxu1 %vm680_vm0, %v539_v11  ;;  %v2103_v11 = vld [vmem:[%s6165_s3 + $0x58] sm:$0xff] }
 0x113   : > { %1328 = vmatmul.mubr.f32.gmra.mrb[2].mxu0 %v292_v14  ;;  %v2093_v14 = vld [vmem:[%s6165_s3 + $0x8] sm:$0xff] }
 0x114   : > { %1332 = vmatprep.mubr.f32.mxu0 %v298_v15  ;;  %v544_v15 = vld [vmem:[%s4759_s19 + $0x818] sm:$0xff] }
 0x115   : > { %4044 = vmatmul.mubr.msk.f32.gmra.mrb[82].mxu1 %vm680_vm0, %v544_v15 }
 0x117   : > { %1333 = vmatmul.mubr.f32.gmra.mrb[4].mxu0 %v297_v16 }
 0x118   : > { %1337 = vmatprep.mubr.f32.mxu0 %v303_v17  ;;  %v4408_v17 = vpack.c.bf16 %v2093_v14, %v2092_v13  ;;  %v403_v14 = vld [vmem:[%s4759_s19 + $0x3b0] sm:$0xff] }
 0x11a   : > { %4409 = vmatprep.subr.bf16.mxu1 %v4408_v17 }
 0x11b   : > { %1338 = vmatmul.mubr.f32.gmra.mrb[6].mxu0 %v302_v20  ;;  %v378_v20 = vld [vmem:[%s4759_s19 + $0x2e8] sm:$0xff]  ;;  %4411 = vmatpush3.bf16.msra.mxu1 %v4408_v17 }
 0x11c   : > { %1342 = vmatprep.mubr.f32.mxu0 %v308_v21 }
 0x11f   : > { %1343 = vmatmul.mubr.f32.gmra.mrb[8].mxu0 %v307_v22  ;;  %v549_v22 = vld [vmem:[%s4759_s19 + $0x840] sm:$0xff] }
 0x120   : > { %1347 = vmatprep.mubr.f32.mxu0 %v313_v23  ;;  %4046 = vmatprep.mubr.msk.f32.mxu1 %vm680_vm0, %v549_v22  ;;  %v2105_v22 = vld [vmem:[%s6165_s3 + $0x68] sm:$0xff] }
 0x122   : > { %v5239_v50 = vpop.f32.mrb[0].mxu1 }
 0x123   : > { %1348 = vmatmul.mubr.f32.gmra.mrb[10].mxu0 %v312_v26  ;;  %v1181_v52 = vpop.f32.mrb[1].mxu1  ;;  %v554_v26 = vld [vmem:[%s4759_s19 + $0x868] sm:$0xff] }
 0x124   : > { %1352 = vmatprep.mubr.f32.mxu0 %v318_v27  ;;  %4047 = vmatmul.mubr.msk.f32.gmra.mrb[84].mxu1 %vm680_vm0, %v554_v26 }
 0x126   : > { %v5242_v53 = vpop.f32.mrb[2].mxu1 }
 0x127   : > { %1353 = vmatmul.mubr.f32.gmra.mrb[12].mxu0 %v317_v28  ;;  %v1186_v55 = vpop.f32.mrb[3].mxu1  ;;  %v4412_v28 = vpack.c.bf16 %v2095_v25, %v2094_v24  ;;  %v408_v25 = vld [vmem:[%s4759_s19 + $0x3d8] sm:$0xff] }
 0x128   : > { %1357 = vmatprep.mubr.f32.mxu0 %v323_v29  ;;  %v377_v29 = vld [vmem:[%s4759_s19 + $0x2e0] sm:$0xff] }
 0x129   : > { %4413 = vmatprep.subr.bf16.mxu1 %v4412_v28 }
 0x12a   : > { %v5246_v57 = vpop.f32.mrb[4].mxu1  ;;  %4415 = vmatpush3.bf16.msra.mxu1 %v4412_v28  ;;  %v407_v28 = vld [vmem:[%s4759_s19 + $0x3d0] sm:$0xff] }
 0x12b   : > { %1358 = vmatmul.mubr.f32.gmra.mrb[14].mxu0 %v322_v32  ;;  %v1191_v59 = vpop.f32.mrb[5].mxu1 }
 0x12c   : > { %1362 = vmatprep.mubr.f32.mxu0 %v328_v33  ;;  %v559_v33 = vld [vmem:[%s4759_s19 + $0x890] sm:$0xff]  ;;  %v2100_v59 = vld [vmem:[%s6165_s3 + $0x40] sm:$0xff] }
 0x12d   : > { %4049 = vmatprep.mubr.msk.f32.mxu1 %vm680_vm0, %v559_v33  ;;  %v418_v33 = vld [vmem:[%s4759_s19 + $0x428] sm:$0xff] }
 0x12e   : > { %v5251_v61 = vpop.f32.mrb[6].mxu1  ;;  %4050 = vmatmul.mubr.msk.f32.gmra.mrb[86].mxu1 %vm680_vm0, %v564_v37  ;;  %v423_v37 = vld [vmem:[%s4759_s19 + $0x450] sm:$0xff] }
 0x12f   : > { %1363 = vmatmul.mubr.f32.gmra.mrb[16].mxu0 %v327_v34  ;;  %v1196_v63 = vpop.f32.mrb[7].mxu1 }
 0x130   : > { %1367 = vmatprep.mubr.f32.mxu0 %v333_v35  ;;  %v2096_v35 = vld [vmem:[%s6165_s3 + $0x20] sm:$0xff]  ;;  %v4424_v63 = vpack.c.bf16 %v2101_v60, %v2100_v59  ;;  %v447_v59 = vld [vmem:[%s4759_s19 + $0x510] sm:$0xff] }
 0x132   : > { %v5256_v1 = vpop.f32.mrb[8].mxu1 }
 0x133   : > { %1368 = vmatmul.mubr.f32.gmra.mrb[18].mxu0 %v332_v38  ;;  %v1201_v4 = vpop.f32.mrb[9].mxu1 }
 0x134   : > { %1372 = vmatprep.mubr.f32.mxu0 %v338_v39  ;;  %v4416_v39 = vpack.c.bf16 %v2097_v36, %v2096_v35  ;;  %v417_v35 = vld [vmem:[%s4759_s19 + $0x420] sm:$0xff] }
 0x136   : > { %v5261_v6 = vpop.f32.mrb[10].mxu1  ;;  %4417 = vmatprep.subr.bf16.mxu1 %v4416_v39 }
 0x137   : > { %1373 = vmatmul.mubr.f32.gmra.mrb[20].mxu0 %v337_v40  ;;  %v1206_v8 = vpop.f32.mrb[11].mxu1  ;;  %v382_v40 = vld [vmem:[%s4759_s19 + $0x308] sm:$0xff]  ;;  %4419 = vmatpush3.bf16.msra.mxu1 %v4416_v39 }
 0x138   : > { %1377 = vmatprep.mubr.f32.mxu0 %v343_v41  ;;  %v2102_v8 = vld [vmem:[%s6165_s3 + $0x50] sm:$0xff]  ;;  %v422_v39 = vld [vmem:[%s4759_s19 + $0x448] sm:$0xff] }
 0x139   : > { %v4428_v13 = vpack.c.bf16 %v2103_v11, %v2102_v8  ;;  %v463_v8 = vld [vmem:[%s4759_s19 + $0x590] sm:$0xff]  ;;  %v468_v11 = vld [vmem:[%s4759_s19 + $0x5b8] sm:$0xff] }
 0x13a   : > { %v5266_v10 = vpop.f32.mrb[12].mxu1 }
 0x13b   : > { %1378 = vmatmul.mubr.f32.gmra.mrb[22].mxu0 %v342_v43  ;;  %v1211_v12 = vpop.f32.mrb[13].mxu1  ;;  %v569_v43 = vld [vmem:[%s4759_s19 + $0x8e0] sm:$0xff] }
 0x13c   : > { %1382 = vmatprep.mubr.f32.mxu0 %v348_v44  ;;  %4052 = vmatprep.mubr.msk.f32.mxu1 %vm680_vm0, %v569_v43  ;;  %v397_v12 = vld [vmem:[%s4759_s19 + $0x380] sm:$0xff] }
 0x13d   : > { %4053 = vmatmul.mubr.msk.f32.gmra.mrb[88].mxu1 %vm680_vm0, %v574_v47 }
 0x13e   : > { %v5277_v16 = vpop.f32.mrb[14].mxu1 }
 0x13f   : > { %1383 = vmatmul.mubr.f32.gmra.mrb[24].mxu0 %v347_v45  ;;  %v1216_v19 = vpop.f32.mrb[15].mxu1  ;;  %v2098_v45 = vld [vmem:[%s6165_s3 + $0x30] sm:$0xff] }
 0x140   : > { %1387 = vmatprep.mubr.f32.mxu0 %v353_v46  ;;  %v2099_v46 = vld [vmem:[%s6165_s3 + $0x38] sm:$0xff]  ;;  %v2104_v19 = vld [vmem:[%s6165_s3 + $0x60] sm:$0xff] }
 0x141   : > { %v4432_v24 = vpack.c.bf16 %v2105_v22, %v2104_v19  ;;  %v472_v19 = vld [vmem:[%s4759_s19 + $0x5d8] sm:$0xff] }
 0x142   : > { %v5282_v21 = vpop.f32.mrb[16].mxu1 }
 0x143   : > { %1388 = vmatmul.mubr.f32.gmra.mrb[26].mxu0 %v352_v49  ;;  %v1221_v23 = vpop.f32.mrb[17].mxu1  ;;  %v4420_v49 = vpack.c.bf16 %v2099_v46, %v2098_v45  ;;  %v432_v45 = vld [vmem:[%s4759_s19 + $0x498] sm:$0xff]  ;;  %v438_v46 = vld [vmem:[%s4759_s19 + $0x4c8] sm:$0xff] }
 0x144   : > { %1392 = vmatprep.mubr.f32.mxu0 %v358_v51  ;;  %v387_v51 = vld [vmem:[%s4759_s19 + $0x330] sm:$0xff]  ;;  %v402_v23 = vld [vmem:[%s4759_s19 + $0x3a8] sm:$0xff] }
 0x145   : > { %4421 = vmatprep.subr.bf16.mxu1 %v4420_v49 }
 0x146   : > { %v5293_v27 = vpop.f32.mrb[18].mxu1  ;;  %4423 = vmatpush3.bf16.msra.mxu1 %v4420_v49  ;;  %v437_v49 = vld [vmem:[%s4759_s19 + $0x4c0] sm:$0xff] }
 0x147   : > { %1393 = vmatmul.mubr.f32.gmra.mrb[28].mxu0 %v357_v54  ;;  %v1226_v30 = vpop.f32.mrb[19].mxu1  ;;  %v393_v54 = vld [vmem:[%s4759_s19 + $0x360] sm:$0xff]  ;;  %4425 = vmatprep.subr.bf16.mxu1 %v4424_v63 }
 0x148   : > { %1397 = vmatprep.mubr.f32.mxu0 %v363_v56  ;;  %v579_v56 = vld [vmem:[%s4759_s19 + $0x930] sm:$0xff]  ;;  %v413_v30 = vld [vmem:[%s4759_s19 + $0x400] sm:$0xff] }
 0x149   : > { %4055 = vmatprep.mubr.msk.f32.mxu1 %vm680_vm0, %v579_v56  ;;  %v448_v56 = vld [vmem:[%s4759_s19 + $0x518] sm:$0xff] }
 0x14a   : > { %v5298_v32 = vpop.f32.mrb[20].mxu1  ;;  %4427 = vmatpush3.bf16.msra.mxu1 %v4424_v63  ;;  %v452_v63 = vld [vmem:[%s4759_s19 + $0x538] sm:$0xff] }
 0x14b   : > { %1398 = vmatmul.mubr.f32.gmra.mrb[30].mxu0 %v362_v62  ;;  %v1231_v34 = vpop.f32.mrb[21].mxu1  ;;  %v584_v62 = vld [vmem:[%s4759_s19 + $0x958] sm:$0xff]  ;;  %4429 = vmatprep.subr.bf16.mxu1 %v4428_v13 }
 0x14c   : > { %1402 = vmatprep.mubr.f32.mxu0 %v368_v0  ;;  %v392_v0 = vld [vmem:[%s4759_s19 + $0x358] sm:$0xff]  ;;  %4056 = vmatmul.mubr.msk.f32.gmra.mrb[90].mxu1 %vm680_vm0, %v584_v62  ;;  %v453_v62 = vld [vmem:[%s4759_s19 + $0x540] sm:$0xff] }
 0x14e   : > { %v5309_v38 = vpop.f32.mrb[22].mxu1  ;;  %4431 = vmatpush3.bf16.msra.mxu1 %v4428_v13  ;;  %v467_v13 = vld [vmem:[%s4759_s19 + $0x5b0] sm:$0xff] }
 0x14f   : > { %1403 = vmatmul.mubr.f32.gmra.mrb[32].mxu0 %v367_v7  ;;  %v1236_v41 = vpop.f32.mrb[23].mxu1  ;;  %v589_v7 = vld [vmem:[%s4759_s19 + $0x980] sm:$0xff]  ;;  %4433 = vmatprep.subr.bf16.mxu1 %v4432_v24 }
 0x150   : > { %1407 = vmatprep.mubr.f32.mxu0 %v373_v9  ;;  %4058 = vmatprep.mubr.msk.f32.mxu1 %vm680_vm0, %v589_v7  ;;  %v594_v9 = vld [vmem:[%s4759_s19 + $0x9a8] sm:$0xff] }
 0x151   : > { %4059 = vmatmul.mubr.msk.f32.gmra.mrb[92].mxu1 %vm680_vm0, %v594_v9  ;;  %v462_v9 = vld [vmem:[%s4759_s19 + $0x588] sm:$0xff] }
 0x152   : > { %v5314_v42 = vpop.f32.mrb[24].mxu1  ;;  %4435 = vmatpush3.bf16.msra.mxu1 %v4432_v24 }
 0x153   : > { %1408 = vmatmul.mubr.f32.gmra.mrb[34].mxu0 %v372_v18  ;;  %v1241_v44 = vpop.f32.mrb[25].mxu1  ;;  %v599_v18 = vld [vmem:[%s4759_s19 + $0x9d0] sm:$0xff] }
 0x154   : > { %1412 = vmatprep.mubr.f32.mxu0 %v378_v20  ;;  %v604_v20 = vld [vmem:[%s4759_s19 + $0x9f8] sm:$0xff]  ;;  %4061 = vmatprep.mubr.msk.f32.mxu1 %vm680_vm0, %v599_v18  ;;  %v433_v44 = vld [vmem:[%s4759_s19 + $0x4a0] sm:$0xff] }
 0x155   : > { %4062 = vmatmul.mubr.msk.f32.gmra.mrb[94].mxu1 %vm680_vm0, %v604_v20  ;;  %v473_v18 = vld [vmem:[%s4759_s19 + $0x5e0] sm:$0xff]  ;;  %v478_v20 = vld [vmem:[%s4759_s19 + $0x608] sm:$0xff] }
 0x156   : > { %v5325_v48 = vpop.f32.mrb[26].mxu1 }
 0x157   : > { %1413 = vmatmul.mubr.f32.gmra.mrb[36].mxu0 %v377_v29  ;;  %6170 = vst [vmem:[#allocation2_spill] sm:$0xff] %v5325_v48  ;;  %v1246_v52 = vpop.f32.mrb[27].mxu1 }
 0x158   : > { %1417 = vmatprep.mubr.f32.mxu0 %v383_v31  ;;  %v412_v31 = vld [vmem:[%s4759_s19 + $0x3f8] sm:$0xff]  ;;  %v443_v52 = vld [vmem:[%s4759_s19 + $0x4f0] sm:$0xff] }
 0x15a   : > { %v5330_v55 = vpop.f32.mrb[28].mxu1 }
 0x15b   : > { %1418 = vmatmul.mubr.f32.gmra.mrb[38].mxu0 %v382_v40  ;;  %6171 = vst [vmem:[#allocation3_spill] sm:$0xff] %v5330_v55  ;;  %v1251_v58 = vpop.f32.mrb[29].mxu1  ;;  %v428_v40 = vld [vmem:[%s4759_s19 + $0x478] sm:$0xff] }
 0x15c   : > { %1422 = vmatprep.mubr.f32.mxu0 %v388_v3  ;;  %v427_v3 = vld [vmem:[%s4759_s19 + $0x470] sm:$0xff] }
 0x15e   : > { %v5344_v4 = vpop.f32.mrb[30].mxu1 }
 0x15f   : > { %1423 = vmatmul.mubr.f32.gmra.mrb[40].mxu0 %v387_v51  ;;  %6172 = vst [vmem:[#allocation4_spill] sm:$0xff] %v5344_v4  ;;  %v1256_v5 = vpop.f32.mrb[31].mxu1 }
 0x160   : > { %1427 = vmatprep.mubr.f32.mxu0 %v393_v54  ;;  %v442_v54 = vld [vmem:[%s4759_s19 + $0x4e8] sm:$0xff]  ;;  %v457_v5 = vld [vmem:[%s4759_s19 + $0x560] sm:$0xff] }
 0x162   : > { %v5358_v15 = vpop.f32.mrb[32].mxu1 }
 0x163   : > { %1428 = vmatmul.mubr.f32.gmra.mrb[42].mxu0 %v392_v0  ;;  %v5360_v17 = vpop.f32.mrb[33].mxu1  ;;  %v458_v0 = vld [vmem:[%s4759_s19 + $0x568] sm:$0xff] }
 0x164   : > { %1432 = vmatprep.mubr.f32.mxu0 %v398_v2 }
 0x166   : > { %v5374_v26 = vpop.f32.mrb[34].mxu1 }
 0x167   : > { %1433 = vmatmul.mubr.f32.gmra.mrb[44].mxu0 %v397_v12  ;;  %v5377_v29 = vpop.f32.mrb[35].mxu1 }
 0x168   : > { %1437 = vmatprep.mubr.f32.mxu0 %v403_v14 }
 0x16a   : > { %v5382_v34 = vpop.f32.mrb[36].mxu1 }
 0x16b   : > { %1438 = vmatmul.mubr.f32.gmra.mrb[46].mxu0 %v402_v23  ;;  %v5385_v36 = vpop.f32.mrb[37].mxu1  ;;  %v477_v23 = vld [vmem:[%s4759_s19 + $0x600] sm:$0xff] }
 0x16c   : > { %1442 = vmatprep.mubr.f32.mxu0 %v408_v25  ;;  %v483_v25 = vld [vmem:[%s4759_s19 + $0x630] sm:$0xff] }
 0x16e   : > { %v5390_v41 = vpop.f32.mrb[38].mxu1 }
 0x16f   : > { %1443 = vmatmul.mubr.f32.gmra.mrb[48].mxu0 %v407_v28  ;;  %v5393_v43 = vpop.f32.mrb[39].mxu1  ;;  %v482_v28 = vld [vmem:[%s4759_s19 + $0x628] sm:$0xff] }
 0x170   : > { %1447 = vmatprep.mubr.f32.mxu0 %v413_v30  ;;  %v488_v30 = vld [vmem:[%s4759_s19 + $0x658] sm:$0xff] }
 0x172   : > { %v5398_v47 = vpop.f32.mrb[40].mxu1 }
 0x173   : > { %1448 = vmatmul.mubr.f32.gmra.mrb[50].mxu0 %v412_v31  ;;  %v5401_v51 = vpop.f32.mrb[41].mxu1 }
 0x174   : > { %1452 = vmatprep.mubr.f32.mxu0 %v418_v33  ;;  %v487_v33 = vld [vmem:[%s4759_s19 + $0x650] sm:$0xff] }
 0x176   : > { %v5406_v58 = vpop.f32.mrb[42].mxu1 }
 0x177   : > { %1453 = vmatmul.mubr.f32.gmra.mrb[52].mxu0 %v417_v35  ;;  %v5409_v60 = vpop.f32.mrb[43].mxu1 }
 0x178   : > { %1457 = vmatprep.mubr.f32.mxu0 %v423_v37  ;;  %v493_v37 = vld [vmem:[%s4759_s19 + $0x680] sm:$0xff] }
 0x17a   : > { %v5414_v2 = vpop.f32.mrb[44].mxu1 }
 0x17b   : > { %1458 = vmatmul.mubr.f32.gmra.mrb[54].mxu0 %v422_v39  ;;  %v5417_v7 = vpop.f32.mrb[45].mxu1  ;;  %v492_v39 = vld [vmem:[%s4759_s19 + $0x678] sm:$0xff] }
 0x17c   : > { %1462 = vmatprep.mubr.f32.mxu0 %v428_v40  ;;  %v498_v40 = vld [vmem:[%s4759_s19 + $0x6a8] sm:$0xff] }
 0x17e   : > { %v5422_v12 = vpop.f32.mrb[46].mxu1 }
 0x17f   : > { %1463 = vmatmul.mubr.f32.gmra.mrb[56].mxu0 %v427_v3  ;;  %v5425_v14 = vpop.f32.mrb[47].mxu1 }
 0x180   : > { %1467 = vmatprep.mubr.f32.mxu0 %v433_v44  ;;  %v497_v44 = vld [vmem:[%s4759_s19 + $0x6a0] sm:$0xff] }
 0x182   : > { %v5430_v22 = vpop.f32.mrb[48].mxu1 }
 0x183   : > { %1468 = vmatmul.mubr.f32.gmra.mrb[58].mxu0 %v432_v45  ;;  %v5433_v24 = vpop.f32.mrb[49].mxu1 }
 0x184   : > { %1472 = vmatprep.mubr.f32.mxu0 %v438_v46  ;;  %v503_v46 = vld [vmem:[%s4759_s19 + $0x6d0] sm:$0xff] }
 0x186   : > { %v5438_v31 = vpop.f32.mrb[50].mxu1 }
 0x187   : > { %1473 = vmatmul.mubr.f32.gmra.mrb[60].mxu0 %v437_v49  ;;  %v5441_v35 = vpop.f32.mrb[51].mxu1  ;;  %v502_v49 = vld [vmem:[%s4759_s19 + $0x6c8] sm:$0xff] }
 0x188   : > { %1477 = vmatprep.mubr.f32.mxu0 %v443_v52  ;;  %v508_v52 = vld [vmem:[%s4759_s19 + $0x6f8] sm:$0xff] }
 0x18a   : > { %v5446_v3 = vpop.f32.mrb[52].mxu1 }
 0x18b   : > { %1478 = vmatmul.mubr.f32.gmra.mrb[62].mxu0 %v442_v54  ;;  %v5449_v45 = vpop.f32.mrb[53].mxu1 }
 0x18c   : > { %1482 = vmatprep.mubr.f32.mxu0 %v448_v56  ;;  %v507_v56 = vld [vmem:[%s4759_s19 + $0x6f0] sm:$0xff] }
 0x18e   : > { %v5454_v54 = vpop.f32.mrb[54].mxu1 }
 0x18f   : > { %1483 = vmatmul.mubr.f32.gmra.mrb[64].mxu0 %v447_v59  ;;  %v5457_v59 = vpop.f32.mrb[55].mxu1 }
 0x190   : > { %1487 = vmatprep.mubr.f32.mxu0 %v453_v62  ;;  %v513_v62 = vld [vmem:[%s4759_s19 + $0x720] sm:$0xff] }
 0x193   : > { %1488 = vmatmul.mubr.f32.gmra.mrb[66].mxu0 %v452_v63  ;;  %v512_v63 = vld [vmem:[%s4759_s19 + $0x718] sm:$0xff] }
 0x194   : > { %1492 = vmatprep.mubr.f32.mxu0 %v458_v0  ;;  %v518_v0 = vld [vmem:[%s4759_s19 + $0x748] sm:$0xff] }
 0x197   : > { %1493 = vmatmul.mubr.f32.gmra.mrb[68].mxu0 %v457_v5  ;;  %v5462_v5 = vpop.f32.mrb[56].mxu1 }
 0x198   : > { %1497 = vmatprep.mubr.f32.mxu0 %v463_v8  ;;  %v517_v8 = vld [vmem:[%s4759_s19 + $0x740] sm:$0xff] }
 0x19b   : > { %1498 = vmatmul.mubr.f32.gmra.mrb[70].mxu0 %v462_v9  ;;  %v5465_v9 = vpop.f32.mrb[57].mxu1 }
 0x19c   : > { %1502 = vmatprep.mubr.f32.mxu0 %v468_v11  ;;  %v523_v11 = vld [vmem:[%s4759_s19 + $0x770] sm:$0xff] }
 0x19f   : > { %1503 = vmatmul.mubr.f32.gmra.mrb[72].mxu0 %v467_v13  ;;  %v522_v13 = vld [vmem:[%s4759_s19 + $0x768] sm:$0xff] }
 0x1a0   : > { %1507 = vmatprep.mubr.f32.mxu0 %v473_v18  ;;  %v528_v18 = vld [vmem:[%s4759_s19 + $0x798] sm:$0xff] }
 0x1a3   : > { %1508 = vmatmul.mubr.f32.gmra.mrb[74].mxu0 %v472_v19  ;;  %v5470_v19 = vpop.f32.mrb[58].mxu1 }
 0x1a4   : > { %1512 = vmatprep.mubr.f32.mxu0 %v478_v20  ;;  %v527_v20 = vld [vmem:[%s4759_s19 + $0x790] sm:$0xff] }
 0x1a7   : > { %1513 = vmatmul.mubr.f32.gmra.mrb[76].mxu0 %v477_v23  ;;  %v5473_v23 = vpop.f32.mrb[59].mxu1 }
 0x1a8   : > { %1517 = vmatprep.mubr.f32.mxu0 %v483_v25  ;;  %v533_v25 = vld [vmem:[%s4759_s19 + $0x7c0] sm:$0xff] }
 0x1ab   : > { %1518 = vmatmul.mubr.f32.gmra.mrb[78].mxu0 %v482_v28  ;;  %v532_v28 = vld [vmem:[%s4759_s19 + $0x7b8] sm:$0xff] }
 0x1ac   : > { %1522 = vmatprep.mubr.f32.mxu0 %v488_v30  ;;  %v538_v30 = vld [vmem:[%s4759_s19 + $0x7e8] sm:$0xff] }
 0x1af   : > { %1523 = vmatmul.mubr.f32.gmra.mrb[80].mxu0 %v487_v33  ;;  %v5478_v33 = vpop.f32.mrb[60].mxu1 }
 0x1b0   : > { %1527 = vmatprep.mubr.f32.mxu0 %v493_v37  ;;  %v537_v37 = vld [vmem:[%s4759_s19 + $0x7e0] sm:$0xff] }
 0x1b3   : > { %1528 = vmatmul.mubr.f32.gmra.mrb[82].mxu0 %v492_v39  ;;  %v5481_v39 = vpop.f32.mrb[61].mxu1 }
 0x1b4   : > { %1532 = vmatprep.mubr.f32.mxu0 %v498_v40  ;;  %v543_v40 = vld [vmem:[%s4759_s19 + $0x810] sm:$0xff] }
 0x1b7   : > { %1533 = vmatmul.mubr.f32.gmra.mrb[84].mxu0 %v497_v44  ;;  %v542_v44 = vld [vmem:[%s4759_s19 + $0x808] sm:$0xff] }
 0x1b8   : > { %1537 = vmatprep.mubr.f32.mxu0 %v503_v46  ;;  %v548_v46 = vld [vmem:[%s4759_s19 + $0x838] sm:$0xff] }
 0x1bb   : > { %1538 = vmatmul.mubr.f32.gmra.mrb[86].mxu0 %v502_v49  ;;  %v5486_v49 = vpop.f32.mrb[62].mxu1 }
 0x1bc   : > { %1542 = vmatprep.mubr.f32.mxu0 %v508_v52  ;;  %v547_v52 = vld [vmem:[%s4759_s19 + $0x830] sm:$0xff] }
 0x1bf   : > { %1543 = vmatmul.mubr.f32.gmra.mrb[88].mxu0 %v507_v56  ;;  %v5489_v56 = vpop.f32.mrb[63].mxu1 }
 0x1c0   : > { %1547 = vmatprep.mubr.f32.mxu0 %v513_v62  ;;  %v553_v62 = vld [vmem:[%s4759_s19 + $0x860] sm:$0xff] }
 0x1c3   : > { %1548 = vmatmul.mubr.f32.gmra.mrb[90].mxu0 %v512_v63  ;;  %v5495_v63 = vld [vmem:[%s6164_s2] ss:$0 sm:$0xff] }
 0x1c4   : > { %1552 = vmatprep.mubr.f32.mxu0 %v518_v0  ;;  %v552_v0 = vld [vmem:[%s4759_s19 + $0x858] sm:$0xff] }
 0x1c7   : > { %1553 = vmatmul.mubr.f32.gmra.mrb[92].mxu0 %v517_v8  ;;  %v558_v8 = vld [vmem:[%s4759_s19 + $0x888] sm:$0xff] }
 0x1c8   : > { %1557 = vmatprep.mubr.f32.mxu0 %v523_v11 }
 0x1cb   : > { %1558 = vmatmul.mubr.f32.gmra.mrb[94].mxu0 %v522_v13 }
 0x1cc   : > { %1562 = vmatprep.mubr.f32.mxu0 %v528_v18 }
 0x1cf   : > { %1563 = vmatmul.mubr.f32.gmra.mrb[96].mxu0 %v527_v20  ;;  %v5500_v20 = vpop.f32.mrb[64].mxu1 }
 0x1d0   : > { %1567 = vmatprep.mubr.f32.mxu0 %v533_v25  ;;  %v557_v25 = vld [vmem:[%s4759_s19 + $0x880] sm:$0xff] }
 0x1d3   : > { %1568 = vmatmul.mubr.f32.gmra.mrb[98].mxu0 %v532_v28  ;;  %v5503_v28 = vpop.f32.mrb[65].mxu1 }
 0x1d4   : > { %1572 = vmatprep.mubr.f32.mxu0 %v538_v30 }
 0x1d7   : > { %1573 = vmatmul.mubr.f32.gmra.mrb[100].mxu0 %v537_v37  ;;  %v563_v37 = vld [vmem:[%s4759_s19 + $0x8b0] sm:$0xff] }
 0x1d8   : > { %1577 = vmatprep.mubr.f32.mxu0 %v543_v40 }
 0x1db   : > { %1578 = vmatmul.mubr.f32.gmra.mrb[102].mxu0 %v542_v44 }
 0x1dc   : > { %1582 = vmatprep.mubr.f32.mxu0 %v548_v46 }
 0x1df   : > { %1583 = vmatmul.mubr.f32.gmra.mrb[104].mxu0 %v547_v52 }
 0x1e0   : > { %1587 = vmatprep.mubr.f32.mxu0 %v553_v62  ;;  %v562_v62 = vld [vmem:[%s4759_s19 + $0x8a8] sm:$0xff] }
 0x1e2   : > { %v1324_v11 = vpop.f32.mrb[0].mxu0 }
 0x1e3   : > { %v4488_v13 = vadd.f32 %v5495_v63, %v1324_v11  ;;  %v1326_v18 = vpop.f32.mrb[1].mxu0  ;;  %1588 = vmatmul.mubr.f32.gmra.mrb[106].mxu0 %v552_v0 }
 0x1e4   : > { %1592 = vmatprep.mubr.f32.mxu0 %v558_v8  ;;  %v568_v8 = vld [vmem:[%s4759_s19 + $0x8d8] sm:$0xff] }
 0x1e5   : > { %v1710_v30 = vadd.f32 %v4488_v13, %v5360_v17 }
 0x1e6   : > { %v1329_v40 = vpop.f32.mrb[2].mxu0 }
 0x1e7   : > { %v2028_v44 = vmax.f32 %v1710_v30, 0.0  ;;  %v4489_v46 = vadd.f32 %v5495_v63, %v1329_v40  ;;  %v1331_v52 = vpop.f32.mrb[3].mxu0  ;;  %1593 = vmatmul.mubr.f32.gmra.mrb[108].mxu0 %v557_v25  ;;  %v5513_v30 = vpop.f32.mrb[66].mxu1  ;;  %v567_v25 = vld [vmem:[%s4759_s19 + $0x8d0] sm:$0xff] }
 0x1e8   : > { %1597 = vmatprep.mubr.f32.mxu0 %v563_v37  ;;  %v5516_v37 = vpop.f32.mrb[67].mxu1 }
 0x1e9   : > { %v1715_v0 = vadd.f32 %v4489_v46, %v5358_v15  ;;  %4092 = vmatprep.mubr.msk.f32.mxu1 %vm2113_vm1, %v2028_v44  ;;  %v573_v15 = vld [vmem:[%s4759_s19 + $0x900] sm:$0xff] }
 0x1ea   : > { %v1334_v11 = vpop.f32.mrb[4].mxu0 }
 0x1eb   : > { %v2029_v18 = vmax.f32 %v1715_v0, 0.0  ;;  %v4490_v17 = vadd.f32 %v5495_v63, %v1334_v11  ;;  %v1336_v13 = vpop.f32.mrb[5].mxu0  ;;  %1598 = vmatmul.mubr.f32.gmra.mrb[110].mxu0 %v562_v62  ;;  %v572_v62 = vld [vmem:[%s4759_s19 + $0x8f8] sm:$0xff]  ;;  %v578_v11 = vld [vmem:[%s4759_s19 + $0x928] sm:$0xff] }
 0x1ec   : > { %1602 = vmatprep.mubr.f32.mxu0 %v568_v8 }
 0x1ed   : > { %v1720_v40 = vadd.f32 %v4490_v17, %v5377_v29  ;;  %4093 = vmatmul.mubr.msk.f32.vlgmr.msra.gmra.mrb[96].mxu1 %vm2113_vm1, %v2029_v18 }
 0x1ee   : > { %v1339_v44 = vpop.f32.mrb[6].mxu0 }
 0x1ef   : > { %v2030_v46 = vmax.f32 %v1720_v40, 0.0  ;;  %v4491_v52 = vadd.f32 %v5495_v63, %v1339_v44  ;;  %v1341_v0 = vpop.f32.mrb[7].mxu0  ;;  %1603 = vmatmul.mubr.f32.gmra.mrb[112].mxu0 %v567_v25  ;;  %v5527_v40 = vpop.f32.mrb[68].mxu1  ;;  %v577_v25 = vld [vmem:[%s4759_s19 + $0x920] sm:$0xff] }
 0x1f0   : > { %1607 = vmatprep.mubr.f32.mxu0 %v573_v15  ;;  %v5530_v15 = vpop.f32.mrb[69].mxu1 }
 0x1f1   : > { %v1725_v8 = vadd.f32 %v4491_v52, %v5374_v26  ;;  %4095 = vmatprep.mubr.msk.f32.mxu1 %vm2113_vm1, %v2030_v46  ;;  %v583_v26 = vld [vmem:[%s4759_s19 + $0x950] sm:$0xff] }
 0x1f2   : > { %v1344_v13 = vpop.f32.mrb[8].mxu0 }
 0x1f3   : > { %v2031_v29 = vmax.f32 %v1725_v8, 0.0  ;;  %v4492_v18 = vadd.f32 %v5495_v63, %v1344_v13  ;;  %v1346_v17 = vpop.f32.mrb[9].mxu0  ;;  %1608 = vmatmul.mubr.f32.gmra.mrb[114].mxu0 %v572_v62  ;;  %v582_v62 = vld [vmem:[%s4759_s19 + $0x948] sm:$0xff]  ;;  %v588_v13 = vld [vmem:[%s4759_s19 + $0x978] sm:$0xff] }
 0x1f4   : > { %1612 = vmatprep.mubr.f32.mxu0 %v578_v11 }
 0x1f5   : > { %v1730_v44 = vadd.f32 %v4492_v18, %v5385_v36  ;;  %4096 = vmatmul.mubr.msk.f32.gmra.mrb[98].mxu1 %vm2113_vm1, %v2031_v29 }
 0x1f6   : > { %v1349_v46 = vpop.f32.mrb[10].mxu0 }
 0x1f7   : > { %v2032_v52 = vmax.f32 %v1730_v44, 0.0  ;;  %v4493_v0 = vadd.f32 %v5495_v63, %v1349_v46  ;;  %v1351_v8 = vpop.f32.mrb[11].mxu0  ;;  %1613 = vmatmul.mubr.f32.gmra.mrb[116].mxu0 %v577_v25  ;;  %v5541_v44 = vpop.f32.mrb[70].mxu1  ;;  %v587_v25 = vld [vmem:[%s4759_s19 + $0x970] sm:$0xff] }
 0x1f8   : > { %1617 = vmatprep.mubr.f32.mxu0 %v583_v26  ;;  %v5544_v26 = vpop.f32.mrb[71].mxu1 }
 0x1f9   : > { %v1735_v11 = vadd.f32 %v4493_v0, %v5382_v34  ;;  %4098 = vmatprep.mubr.msk.f32.mxu1 %vm2113_vm1, %v2032_v52  ;;  %v593_v34 = vld [vmem:[%s4759_s19 + $0x9a0] sm:$0xff] }
 0x1fa   : > { %v1354_v17 = vpop.f32.mrb[12].mxu0 }
 0x1fb   : > { %v2033_v36 = vmax.f32 %v1735_v11, 0.0  ;;  %v4494_v29 = vadd.f32 %v5495_v63, %v1354_v17  ;;  %v1356_v18 = vpop.f32.mrb[13].mxu0  ;;  %1618 = vmatmul.mubr.f32.gmra.mrb[118].mxu0 %v582_v62  ;;  %v592_v62 = vld [vmem:[%s4759_s19 + $0x998] sm:$0xff]  ;;  %v598_v17 = vld [vmem:[%s4759_s19 + $0x9c8] sm:$0xff] }
 0x1fc   : > { %1622 = vmatprep.mubr.f32.mxu0 %v588_v13 }
 0x1fd   : > { %v1740_v46 = vadd.f32 %v4494_v29, %v5393_v43  ;;  %4099 = vmatmul.mubr.msk.f32.gmra.mrb[100].mxu1 %vm2113_vm1, %v2033_v36 }
 0x1fe   : > { %v1359_v52 = vpop.f32.mrb[14].mxu0 }
 0x1ff   : > { %v2034_v0 = vmax.f32 %v1740_v46, 0.0  ;;  %v4495_v8 = vadd.f32 %v5495_v63, %v1359_v52  ;;  %v1361_v11 = vpop.f32.mrb[15].mxu0  ;;  %1623 = vmatmul.mubr.f32.gmra.mrb[120].mxu0 %v587_v25  ;;  %v5555_v46 = vpop.f32.mrb[72].mxu1  ;;  %v597_v52 = vld [vmem:[%s4759_s19 + $0x9c0] sm:$0xff] }
 0x200   : > { %1627 = vmatprep.mubr.f32.mxu0 %v593_v34  ;;  %v5558_v25 = vpop.f32.mrb[73].mxu1 }
 0x201   : > { %v1745_v13 = vadd.f32 %v4495_v8, %v5390_v41  ;;  %4101 = vmatprep.mubr.msk.f32.mxu1 %vm2113_vm1, %v2034_v0  ;;  %v603_v41 = vld [vmem:[%s4759_s19 + $0x9f0] sm:$0xff] }
 0x202   : > { %v1364_v18 = vpop.f32.mrb[16].mxu0 }
 0x203   : > { %v2035_v43 = vmax.f32 %v1745_v13, 0.0  ;;  %v4496_v36 = vadd.f32 %v5495_v63, %v1364_v18  ;;  %v1366_v29 = vpop.f32.mrb[17].mxu0  ;;  %1628 = vmatmul.mubr.f32.gmra.mrb[122].mxu0 %v592_v62  ;;  %v602_v18 = vld [vmem:[%s4759_s19 + $0x9e8] sm:$0xff] }
 0x204   : > { %1632 = vmatprep.mubr.f32.mxu0 %v598_v17 }
 0x205   : > { %v1750_v34 = vadd.f32 %v4496_v36, %v5401_v51  ;;  %4102 = vmatmul.mubr.msk.f32.gmra.mrb[102].mxu1 %vm2113_vm1, %v2035_v43  ;;  %v5568_v43 = vpop.f32.mrb[74].mxu1 }
 0x206   : > { %v1369_v0 = vpop.f32.mrb[18].mxu0  ;;  %v5570_v36 = vpop.f32.mrb[75].mxu1 }
 0x207   : > { %v2036_v8 = vmax.f32 %v1750_v34, 0.0  ;;  %v4497_v11 = vadd.f32 %v5495_v63, %v1369_v0  ;;  %v1371_v13 = vpop.f32.mrb[19].mxu0  ;;  %1633 = vmatmul.mubr.f32.gmra.mrb[124].mxu0 %v597_v52 }
 0x208   : > { %1637 = vmatprep.mubr.f32.mxu0 %v603_v41 }
 0x209   : > { %v1755_v62 = vadd.f32 %v4497_v11, %v5398_v47  ;;  %4104 = vmatprep.mubr.msk.f32.mxu1 %vm2113_vm1, %v2036_v8 }
 0x20a   : > { %v1374_v17 = vpop.f32.mrb[20].mxu0 }
 0x20b   : > { %v2037_v29 = vmax.f32 %v1755_v62, 0.0  ;;  %v4498_v4 = vadd.f32 %v5495_v63, %v1374_v17  ;;  %v1376_v51 = vpop.f32.mrb[21].mxu0  ;;  %1638 = vmatmul.mubr.f32.gmra.mrb[126].mxu0 %v602_v18  ;;  %v5578_v17 = vpop.f32.mrb[76].mxu1 }
 0x20c   : > { %v5580_v51 = vpop.f32.mrb[77].mxu1 }
 0x20d   : > { %v1760_v34 = vadd.f32 %v4498_v4, %v5409_v60  ;;  %4105 = vmatmul.mubr.msk.f32.gmra.mrb[104].mxu1 %vm2113_vm1, %v2037_v29 }
 0x20e   : > { %v1379_v52 = vpop.f32.mrb[22].mxu0 }
 0x20f   : > { %v2038_v41 = vmax.f32 %v1760_v34, 0.0  ;;  %v4499_v47 = vadd.f32 %v5495_v63, %v1379_v52  ;;  %v1381_v0 = vpop.f32.mrb[23].mxu0 }
 0x211   : > { %v1765_v8 = vadd.f32 %v4499_v47, %v5406_v58  ;;  %4107 = vmatprep.mubr.msk.f32.mxu1 %vm2113_vm1, %v2038_v41 }
 0x212   : > { %v1384_v11 = vpop.f32.mrb[24].mxu0 }
 0x213   : > { %v2039_v13 = vmax.f32 %v1765_v8, 0.0  ;;  %v4500_v18 = vadd.f32 %v5495_v63, %v1384_v11  ;;  %v1386_v62 = vpop.f32.mrb[25].mxu0  ;;  %v5588_v11 = vpop.f32.mrb[78].mxu1 }
 0x214   : > { %v5590_v62 = vpop.f32.mrb[79].mxu1 }
 0x215   : > { %v1770_v4 = vadd.f32 %v4500_v18, %v5417_v7  ;;  %4108 = vmatmul.mubr.msk.f32.gmra.mrb[106].mxu1 %vm2113_vm1, %v2039_v13 }
 0x216   : > { %v1389_v60 = vpop.f32.mrb[26].mxu0 }
 0x217   : > { %v2040_v29 = vmax.f32 %v1770_v4, 0.0  ;;  %v4501_v34 = vadd.f32 %v5495_v63, %v1389_v60  ;;  %v1391_v58 = vpop.f32.mrb[27].mxu0 }
 0x219   : > { %v1775_v52 = vadd.f32 %v4501_v34, %v5414_v2  ;;  %4110 = vmatprep.mubr.msk.f32.mxu1 %vm2113_vm1, %v2040_v29 }
 0x21a   : > { %v1394_v41 = vpop.f32.mrb[28].mxu0 }
 0x21b   : > { %v2041_v47 = vmax.f32 %v1775_v52, 0.0  ;;  %v4502_v0 = vadd.f32 %v5495_v63, %v1394_v41  ;;  %v1396_v8 = vpop.f32.mrb[29].mxu0  ;;  %v5598_v41 = vpop.f32.mrb[80].mxu1 }
 0x21c   : > { %v5600_v8 = vpop.f32.mrb[81].mxu1 }
 0x21d   : > { %v1780_v7 = vadd.f32 %v4502_v0, %v5425_v14  ;;  %4111 = vmatmul.mubr.msk.f32.gmra.mrb[108].mxu1 %vm2113_vm1, %v2041_v47 }
 0x21e   : > { %v1399_v13 = vpop.f32.mrb[30].mxu0 }
 0x21f   : > { %v2042_v18 = vmax.f32 %v1780_v7, 0.0  ;;  %v4503_v4 = vadd.f32 %v5495_v63, %v1399_v13  ;;  %v1401_v2 = vpop.f32.mrb[31].mxu0 }
 0x221   : > { %v1785_v60 = vadd.f32 %v4503_v4, %v5422_v12  ;;  %4113 = vmatprep.mubr.msk.f32.mxu1 %vm2113_vm1, %v2042_v18 }
 0x222   : > { %v1404_v29 = vpop.f32.mrb[32].mxu0 }
 0x223   : > { %v2043_v34 = vmax.f32 %v1785_v60, 0.0  ;;  %v4504_v58 = vadd.f32 %v5495_v63, %v1404_v29  ;;  %v1406_v52 = vpop.f32.mrb[33].mxu0  ;;  %v5608_v29 = vpop.f32.mrb[82].mxu1 }
 0x224   : > { %v5610_v52 = vpop.f32.mrb[83].mxu1 }
 0x225   : > { %v1790_v14 = vadd.f32 %v4504_v58, %v5433_v24  ;;  %4114 = vmatmul.mubr.msk.f32.gmra.mrb[110].mxu1 %vm2113_vm1, %v2043_v34 }
 0x226   : > { %v1409_v47 = vpop.f32.mrb[34].mxu0 }
 0x227   : > { %v2044_v0 = vmax.f32 %v1790_v14, 0.0  ;;  %v4505_v7 = vadd.f32 %v5495_v63, %v1409_v47  ;;  %v1411_v12 = vpop.f32.mrb[35].mxu0 }
 0x229   : > { %v1795_v13 = vadd.f32 %v4505_v7, %v5430_v22  ;;  %4116 = vmatprep.mubr.msk.f32.mxu1 %vm2113_vm1, %v2044_v0 }
 0x22a   : > { %v1414_v18 = vpop.f32.mrb[36].mxu0 }
 0x22b   : > { %v2045_v4 = vmax.f32 %v1795_v13, 0.0  ;;  %v4506_v2 = vadd.f32 %v5495_v63, %v1414_v18  ;;  %v1416_v60 = vpop.f32.mrb[37].mxu0  ;;  %v5618_v18 = vpop.f32.mrb[84].mxu1 }
 0x22c   : > { %v5620_v60 = vpop.f32.mrb[85].mxu1 }
 0x22d   : > { %v1800_v24 = vadd.f32 %v4506_v2, %v5441_v35  ;;  %4117 = vmatmul.mubr.msk.f32.gmra.mrb[112].mxu1 %vm2113_vm1, %v2045_v4  ;;  %v5624_v2 = vpop.f32.mrb[86].mxu1 }
 0x22e   : > { %v1419_v34 = vpop.f32.mrb[38].mxu0 }
 0x22f   : > { %v2046_v58 = vmax.f32 %v1800_v24, 0.0  ;;  %v4507_v14 = vadd.f32 %v5495_v63, %v1419_v34  ;;  %v1421_v22 = vpop.f32.mrb[39].mxu0 }
 0x231   : > { %v1805_v47 = vadd.f32 %v4507_v14, %v5438_v31  ;;  %4119 = vmatprep.mubr.msk.f32.mxu1 %vm2113_vm1, %v2046_v58  ;;  %v5627_v58 = vpop.f32.mrb[87].mxu1 }
 0x232   : > { %v1424_v0 = vpop.f32.mrb[40].mxu0  ;;  %v5629_v14 = vpop.f32.mrb[88].mxu1 }
 0x233   : > { %v2047_v7 = vmax.f32 %v1805_v47, 0.0  ;;  %v4508_v12 = vadd.f32 %v5495_v63, %v1424_v0  ;;  %v1426_v13 = vpop.f32.mrb[41].mxu0  ;;  %v5633_v47 = vpop.f32.mrb[89].mxu1 }
 0x234   : > { %v5635_v0 = vpop.f32.mrb[90].mxu1 }
 0x235   : > { %v1810_v35 = vadd.f32 %v4508_v12, %v5449_v45  ;;  %4120 = vmatmul.mubr.msk.f32.gmra.mrb[114].mxu1 %vm2113_vm1, %v2047_v7  ;;  %6173 = vst [vmem:[#allocation5_spill] sm:$0xff] %v5635_v0 }
 0x236   : > { %v1429_v4 = vpop.f32.mrb[42].mxu0 }
 0x237   : > { %v2048_v24 = vmax.f32 %v1810_v35, 0.0  ;;  %v4509_v31 = vadd.f32 %v5495_v63, %v1429_v4  ;;  %v1431_v34 = vpop.f32.mrb[43].mxu0  ;;  %v5638_v35 = vpop.f32.mrb[91].mxu1 }
 0x238   : > { %v5640_v4 = vpop.f32.mrb[92].mxu1 }
 0x239   : > { %v1815_v22 = vadd.f32 %v4509_v31, %v5446_v3  ;;  %4122 = vmatprep.mubr.msk.f32.mxu1 %vm2113_vm1, %v2048_v24  ;;  %6174 = vst [vmem:[#allocation6_spill] sm:$0xff] %v5640_v4  ;;  %v5644_v3 = vpop.f32.mrb[93].mxu1 }
 0x23a   : > { %v1434_v45 = vpop.f32.mrb[44].mxu0  ;;  %v5646_v31 = vpop.f32.mrb[94].mxu1 }
 0x23b   : > { %v2049_v7 = vmax.f32 %v1815_v22, 0.0  ;;  %v4510_v12 = vadd.f32 %v5495_v63, %v1434_v45  ;;  %v1436_v13 = vpop.f32.mrb[45].mxu0  ;;  %6175 = vst [vmem:[#allocation7_spill] sm:$0xff] %v5646_v31  ;;  %v5649_v0 = vpop.f32.mrb[95].mxu1 }
 0x23d   : > { %v1820_v34 = vadd.f32 %v4510_v12, %v5457_v59  ;;  %4123 = vmatmul.mubr.msk.f32.gmra.mrb[116].mxu1 %vm2113_vm1, %v2049_v7 }
 0x23e   : > { %v1439_v24 = vpop.f32.mrb[46].mxu0 }
 0x23f   : > { %v2050_v55 = vmax.f32 %v1820_v34, 0.0  ;;  %v4511_v48 = vadd.f32 %v5495_v63, %v1439_v24  ;;  %v1441_v22 = vpop.f32.mrb[47].mxu0 }
 0x241   : > { %v1825_v45 = vadd.f32 %v4511_v48, %v5454_v54  ;;  %4125 = vmatprep.mubr.msk.f32.mxu1 %vm2113_vm1, %v2050_v55  ;;  %v2755_v48 = vld [vmem:[%s6167_s5] sm:$0xff]  ;;  %v2756_v55 = vld [vmem:[%s6167_s5 + $0x8] sm:$0xff] }
 0x242   : > { %v1444_v13 = vpop.f32.mrb[48].mxu0  ;;  %v4436_v54 = vpack.c.bf16 %v2756_v55, %v2755_v48 }
 0x243   : > { %v2051_v4 = vmax.f32 %v1825_v45, 0.0  ;;  %v4512_v59 = vadd.f32 %v5495_v63, %v1444_v13  ;;  %v1446_v7 = vpop.f32.mrb[49].mxu0 }
 0x244   : > { %4437 = vmatprep.subr.bf16.mxu1 %v4436_v54 }
 0x245   : > { %v1830_v12 = vadd.f32 %v4512_v59, %v5465_v9  ;;  %4126 = vmatmul.mubr.msk.f32.gmra.mrb[118].mxu1 %vm2113_vm1, %v2051_v4 }
 0x246   : > { %v1449_v31 = vpop.f32.mrb[50].mxu0  ;;  %4439 = vmatpush3.bf16.msra.mxu1 %v4436_v54 }
 0x247   : > { %v2052_v34 = vmax.f32 %v1830_v12, 0.0  ;;  %v4513_v24 = vadd.f32 %v5495_v63, %v1449_v31  ;;  %v1451_v22 = vpop.f32.mrb[51].mxu0 }
 0x249   : > { %v1835_v45 = vadd.f32 %v4513_v24, %v5462_v5  ;;  %4128 = vmatprep.mubr.msk.f32.mxu1 %vm2113_vm1, %v2052_v34 }
 0x24a   : > { %v1454_v9 = vpop.f32.mrb[52].mxu0 }
 0x24b   : > { %v2053_v4 = vmax.f32 %v1835_v45, 0.0  ;;  %v4514_v13 = vadd.f32 %v5495_v63, %v1454_v9  ;;  %v1456_v31 = vpop.f32.mrb[53].mxu0  ;;  %v2757_v9 = vld [vmem:[%s6167_s5 + $0x10] sm:$0xff] }
 0x24d   : > { %v1840_v59 = vadd.f32 %v4514_v13, %v5473_v23  ;;  %4129 = vmatmul.mubr.msk.f32.gmra.mrb[120].mxu1 %vm2113_vm1, %v2053_v4 }
 0x24e   : > { %v1459_v7 = vpop.f32.mrb[54].mxu0 }
 0x24f   : > { %v2054_v12 = vmax.f32 %v1840_v59, 0.0  ;;  %v4515_v22 = vadd.f32 %v5495_v63, %v1459_v7  ;;  %v1461_v48 = vpop.f32.mrb[55].mxu0 }
 0x251   : > { %v1845_v5 = vadd.f32 %v4515_v22, %v5470_v19  ;;  %4131 = vmatprep.mubr.msk.f32.mxu1 %vm2113_vm1, %v2054_v12  ;;  %v2758_v19 = vld [vmem:[%s6167_s5 + $0x18] sm:$0xff]  ;;  %v2759_v12 = vld [vmem:[%s6167_s5 + $0x20] sm:$0xff]  ;;  %v2760_v22 = vld [vmem:[%s6167_s5 + $0x28] sm:$0xff] }
 0x252   : > { %v1464_v34 = vpop.f32.mrb[56].mxu0  ;;  %v4440_v59 = vpack.c.bf16 %v2758_v19, %v2757_v9 }
 0x253   : > { %v2055_v24 = vmax.f32 %v1845_v5, 0.0  ;;  %v4516_v55 = vadd.f32 %v5495_v63, %v1464_v34  ;;  %v1466_v45 = vpop.f32.mrb[57].mxu0 }
 0x254   : > { %4441 = vmatprep.subr.bf16.mxu1 %v4440_v59  ;;  %v2761_v45 = vld [vmem:[%s6167_s5 + $0x30] sm:$0xff] }
 0x255   : > { %v1850_v54 = vadd.f32 %v4516_v55, %v5481_v39  ;;  %4132 = vmatmul.mubr.msk.f32.gmra.mrb[122].mxu1 %vm2113_vm1, %v2055_v24  ;;  %v4444_v24 = vpack.c.bf16 %v2760_v22, %v2759_v12 }
 0x256   : > { %v1469_v23 = vpop.f32.mrb[58].mxu0  ;;  %4443 = vmatpush3.bf16.msra.mxu1 %v4440_v59  ;;  %v2764_v59 = vld [vmem:[%s6167_s5 + $0x48] sm:$0xff] }
 0x257   : > { %v2056_v4 = vmax.f32 %v1850_v54, 0.0  ;;  %v4517_v13 = vadd.f32 %v5495_v63, %v1469_v23  ;;  %v1471_v31 = vpop.f32.mrb[59].mxu0  ;;  %4445 = vmatprep.subr.bf16.mxu1 %v4444_v24  ;;  %v2762_v54 = vld [vmem:[%s6167_s5 + $0x38] sm:$0xff] }
 0x258   : > { %v2763_v31 = vld [vmem:[%s6167_s5 + $0x40] sm:$0xff] }
 0x259   : > { %v1855_v7 = vadd.f32 %v4517_v13, %v5478_v33  ;;  %4134 = vmatprep.mubr.msk.f32.mxu1 %vm2113_vm1, %v2056_v4  ;;  %v4448_v4 = vpack.c.bf16 %v2762_v54, %v2761_v45  ;;  %v4452_v22 = vpack.c.bf16 %v2764_v59, %v2763_v31 }
 0x25a   : > { %v1474_v39 = vpop.f32.mrb[60].mxu0  ;;  %4447 = vmatpush3.bf16.msra.mxu1 %v4444_v24 }
 0x25b   : > { %v2057_v48 = vmax.f32 %v1855_v7, 0.0  ;;  %v4518_v5 = vadd.f32 %v5495_v63, %v1474_v39  ;;  %v1476_v34 = vpop.f32.mrb[61].mxu0  ;;  %4449 = vmatprep.subr.bf16.mxu1 %v4448_v4 }
 0x25d   : > { %v1860_v33 = vadd.f32 %v4518_v5, %v5489_v56  ;;  %4135 = vmatmul.mubr.msk.f32.gmra.mrb[124].mxu1 %vm2113_vm1, %v2057_v48 }
 0x25e   : > { %v1479_v55 = vpop.f32.mrb[62].mxu0  ;;  %4451 = vmatpush3.bf16.msra.mxu1 %v4448_v4 }
 0x25f   : > { %v2058_v23 = vmax.f32 %v1860_v33, 0.0  ;;  %v4519_v9 = vadd.f32 %v5495_v63, %v1479_v55  ;;  %v1481_v19 = vpop.f32.mrb[63].mxu0  ;;  %4453 = vmatprep.subr.bf16.mxu1 %v4452_v22 }
 0x261   : > { %v1865_v56 = vadd.f32 %v4519_v9, %v5486_v49  ;;  %4137 = vmatprep.mubr.msk.f32.mxu1 %vm2113_vm1, %v2058_v23 }
 0x262   : > { %v1484_v13 = vpop.f32.mrb[64].mxu0  ;;  %4455 = vmatpush3.bf16.msra.mxu1 %v4452_v22 }
 0x263   : > { %v2059_v7 = vmax.f32 %v1865_v56, 0.0  ;;  %v4520_v39 = vadd.f32 %v5495_v63, %v1484_v13  ;;  %v1486_v12 = vpop.f32.mrb[65].mxu0 }
 0x265   : > { %v1870_v49 = vadd.f32 %v4520_v39, %v5503_v28  ;;  %4138 = vmatmul.mubr.msk.f32.gmra.mrb[126].mxu1 %vm2113_vm1, %v2059_v7 }
 0x266   : > { %v1489_v48 = vpop.f32.mrb[66].mxu0 }
 0x267   : > { %v2060_v5 = vmax.f32 %v1870_v49, 0.0  ;;  %v4521_v34 = vadd.f32 %v5495_v63, %v1489_v48  ;;  %v1491_v24 = vpop.f32.mrb[67].mxu0 }
 0x269   : > { %v1875_v33 = vadd.f32 %v4521_v34, %v5500_v20  ;;  %4140 = vmatprep.mubr.msk.f32.mxu1 %vm2113_vm1, %v2060_v5 }
 0x26a   : > { %v1494_v55 = vpop.f32.mrb[68].mxu0 }
 0x26b   : > { %v2061_v45 = vmax.f32 %v1875_v33, 0.0  ;;  %v4522_v54 = vadd.f32 %v5495_v63, %v1494_v55  ;;  %v1496_v23 = vpop.f32.mrb[69].mxu0 }
 0x26d   : > { %v1880_v28 = vadd.f32 %v4522_v54, %v5516_v37  ;;  %4141 = vmatmul.mubr.msk.f32.gmra.mrb[128].mxu1 %vm2113_vm1, %v2061_v45 }
 0x26e   : > { %v1499_v9 = vpop.f32.mrb[70].mxu0 }
 0x26f   : > { %v2062_v19 = vmax.f32 %v1880_v28, 0.0  ;;  %v4523_v4 = vadd.f32 %v5495_v63, %v1499_v9  ;;  %v1501_v56 = vpop.f32.mrb[71].mxu0 }
 0x271   : > { %v1885_v13 = vadd.f32 %v4523_v4, %v5513_v30  ;;  %4143 = vmatprep.mubr.msk.f32.mxu1 %vm2113_vm1, %v2062_v19 }
 0x272   : > { %v1504_v20 = vpop.f32.mrb[72].mxu0 }
 0x273   : > { %v2063_v31 = vmax.f32 %v1885_v13, 0.0  ;;  %v4524_v59 = vadd.f32 %v5495_v63, %v1504_v20  ;;  %v1506_v7 = vpop.f32.mrb[73].mxu0 }
 0x275   : > { %v1890_v39 = vadd.f32 %v4524_v59, %v5530_v15  ;;  %4144 = vmatmul.mubr.msk.f32.gmra.mrb[130].mxu1 %vm2113_vm1, %v2063_v31 }
 0x276   : > { %v1509_v37 = vpop.f32.mrb[74].mxu0 }
 0x277   : > { %v2064_v12 = vmax.f32 %v1890_v39, 0.0  ;;  %v4525_v22 = vadd.f32 %v5495_v63, %v1509_v37  ;;  %v1511_v49 = vpop.f32.mrb[75].mxu0 }
 0x279   : > { %v1895_v48 = vadd.f32 %v4525_v22, %v5527_v40  ;;  %4146 = vmatprep.mubr.msk.f32.mxu1 %vm2113_vm1, %v2064_v12 }
 0x27a   : > { %v1514_v30 = vpop.f32.mrb[76].mxu0 }
 0x27b   : > { %v2065_v5 = vmax.f32 %v1895_v48, 0.0  ;;  %v4526_v34 = vadd.f32 %v5495_v63, %v1514_v30  ;;  %v1516_v24 = vpop.f32.mrb[77].mxu0 }
 0x27d   : > { %v1900_v33 = vadd.f32 %v4526_v34, %v5544_v26  ;;  %4147 = vmatmul.mubr.msk.f32.gmra.mrb[132].mxu1 %vm2113_vm1, %v2065_v5 }
 0x27e   : > { %v1519_v15 = vpop.f32.mrb[78].mxu0 }
 0x27f   : > { %v2066_v55 = vmax.f32 %v1900_v33, 0.0  ;;  %v4527_v45 = vadd.f32 %v5495_v63, %v1519_v15  ;;  %v1521_v54 = vpop.f32.mrb[79].mxu0 }
 0x281   : > { %v1905_v23 = vadd.f32 %v4527_v45, %v5541_v44  ;;  %4149 = vmatprep.mubr.msk.f32.mxu1 %vm2113_vm1, %v2066_v55 }
 0x282   : > { %v1524_v40 = vpop.f32.mrb[80].mxu0 }
 0x283   : > { %v2067_v28 = vmax.f32 %v1905_v23, 0.0  ;;  %v4528_v9 = vadd.f32 %v5495_v63, %v1524_v40  ;;  %v1526_v19 = vpop.f32.mrb[81].mxu0 }
 0x285   : > { %v1910_v4 = vadd.f32 %v4528_v9, %v5558_v25  ;;  %4150 = vmatmul.mubr.msk.f32.gmra.mrb[134].mxu1 %vm2113_vm1, %v2067_v28 }
 0x286   : > { %v1529_v26 = vpop.f32.mrb[82].mxu0 }
 0x287   : > { %v2068_v56 = vmax.f32 %v1910_v4, 0.0  ;;  %v4529_v13 = vadd.f32 %v5495_v63, %v1529_v26  ;;  %v1531_v20 = vpop.f32.mrb[83].mxu0  ;;  %v1180_v26 = vadd.f32 %v5495_v63, %v5239_v50  ;;  %v1190_v50 = vadd.f32 %v5495_v63, %v5246_v57 }
 0x288   : > { %v1200_v57 = vadd.f32 %v5495_v63, %v5256_v1  ;;  %v1210_v1 = vadd.f32 %v5495_v63, %v5266_v10 }
 0x289   : > { %v1915_v31 = vadd.f32 %v4529_v13, %v5555_v46  ;;  %4152 = vmatprep.mubr.msk.f32.mxu1 %vm2113_vm1, %v2068_v56 }
 0x28a   : > { %v1534_v44 = vpop.f32.mrb[84].mxu0 }
 0x28b   : > { %v2069_v59 = vmax.f32 %v1915_v31, 0.0  ;;  %v4530_v7 = vadd.f32 %v5495_v63, %v1534_v44  ;;  %v1536_v39 = vpop.f32.mrb[85].mxu0 }
 0x28d   : > { %v1920_v37 = vadd.f32 %v4530_v7, %v5570_v36  ;;  %4153 = vmatmul.mubr.msk.f32.gmra.mrb[136].mxu1 %vm2113_vm1, %v2069_v59 }
 0x28e   : > { %v1539_v25 = vpop.f32.mrb[86].mxu0 }
 0x28f   : > { %v2070_v12 = vmax.f32 %v1920_v37, 0.0  ;;  %v4531_v22 = vadd.f32 %v5495_v63, %v1539_v25  ;;  %v1541_v49 = vpop.f32.mrb[87].mxu0 }
 0x291   : > { %v1925_v48 = vadd.f32 %v4531_v22, %v5568_v43  ;;  %4155 = vmatprep.mubr.msk.f32.mxu1 %vm2113_vm1, %v2070_v12 }
 0x292   : > { %v1544_v46 = vpop.f32.mrb[88].mxu0 }
 0x293   : > { %v2071_v30 = vmax.f32 %v1925_v48, 0.0  ;;  %v4532_v5 = vadd.f32 %v5495_v63, %v1544_v46  ;;  %v1546_v34 = vpop.f32.mrb[89].mxu0 }
 0x295   : > { %v1930_v24 = vadd.f32 %v4532_v5, %v5580_v51  ;;  %4156 = vmatmul.mubr.msk.f32.gmra.mrb[138].mxu1 %vm2113_vm1, %v2071_v30 }
 0x296   : > { %v1549_v36 = vpop.f32.mrb[90].mxu0 }
 0x297   : > { %v2072_v33 = vmax.f32 %v1930_v24, 0.0  ;;  %v4533_v15 = vadd.f32 %v5495_v63, %v1549_v36  ;;  %v1551_v55 = vpop.f32.mrb[91].mxu0 }
 0x299   : > { %v1935_v45 = vadd.f32 %v4533_v15, %v5578_v17  ;;  %4158 = vmatprep.mubr.msk.f32.mxu1 %vm2113_vm1, %v2072_v33 }
 0x29a   : > { %v1554_v43 = vpop.f32.mrb[92].mxu0 }
 0x29b   : > { %v2073_v54 = vmax.f32 %v1935_v45, 0.0  ;;  %v4534_v23 = vadd.f32 %v5495_v63, %v1554_v43  ;;  %v1556_v40 = vpop.f32.mrb[93].mxu0 }
 0x29d   : > { %v1940_v28 = vadd.f32 %v4534_v23, %v5590_v62  ;;  %4159 = vmatmul.mubr.msk.f32.gmra.mrb[140].mxu1 %vm2113_vm1, %v2073_v54  ;;  %v1185_v62 = vadd.f32 %v5495_v63, %v5242_v53  ;;  %v1195_v53 = vadd.f32 %v5495_v63, %v5251_v61  ;;  %v1205_v61 = vadd.f32 %v5495_v63, %v5261_v6 }
 0x29e   : > { %v1559_v51 = vpop.f32.mrb[94].mxu0  ;;  %v1215_v6 = vadd.f32 %v5495_v63, %v5277_v16 }
 0x29f   : > { %v2074_v9 = vmax.f32 %v1940_v28, 0.0  ;;  %v4535_v19 = vadd.f32 %v5495_v63, %v1559_v51  ;;  %v1561_v4 = vpop.f32.mrb[95].mxu0 }
 0x2a1   : > { %v1945_v17 = vadd.f32 %v4535_v19, %v5588_v11  ;;  %4161 = vmatprep.mubr.msk.f32.mxu1 %vm2113_vm1, %v2074_v9 }
 0x2a2   : > { %v1564_v56 = vpop.f32.mrb[96].mxu0 }
 0x2a3   : > { %v2075_v13 = vmax.f32 %v1945_v17, 0.0  ;;  %v1565_v20 = vadd.f32 %v1564_v56, %v1180_v26  ;;  %v1566_v31 = vpop.f32.mrb[97].mxu0 }
 0x2a5   : > { %v1950_v44 = vadd.f32 %v5600_v8, %v1565_v20  ;;  %4162 = vmatmul.mubr.msk.f32.gmra.mrb[142].mxu1 %vm2113_vm1, %v2075_v13  ;;  %v1225_v20 = vadd.f32 %v5495_v63, %v5293_v27 }
 0x2a6   : > { %v1569_v59 = vpop.f32.mrb[98].mxu0 }
 0x2a7   : > { %v2076_v7 = vmax.f32 %v1950_v44, 0.0  ;;  %v1570_v39 = vadd.f32 %v1569_v59, %v1185_v62  ;;  %v1571_v37 = vpop.f32.mrb[99].mxu0 }
 0x2a9   : > { %v1955_v11 = vadd.f32 %v5598_v41, %v1570_v39  ;;  %4164 = vmatprep.mubr.msk.f32.mxu1 %vm2113_vm1, %v2076_v7 }
 0x2aa   : > { %v1574_v25 = vpop.f32.mrb[100].mxu0 }
 0x2ab   : > { %v2077_v12 = vmax.f32 %v1955_v11, 0.0  ;;  %v1575_v22 = vadd.f32 %v1574_v25, %v1190_v50  ;;  %v1576_v49 = vpop.f32.mrb[101].mxu0 }
 0x2ad   : > { %v1960_v8 = vadd.f32 %v5610_v52, %v1575_v22  ;;  %4165 = vmatmul.mubr.msk.f32.gmra.mrb[144].mxu1 %vm2113_vm1, %v2077_v12 }
 0x2ae   : > { %v1579_v48 = vpop.f32.mrb[102].mxu0 }
 0x2af   : > { %v2078_v46 = vmax.f32 %v1960_v8, 0.0  ;;  %v1580_v30 = vadd.f32 %v1579_v48, %v1195_v53  ;;  %v1581_v5 = vpop.f32.mrb[103].mxu0  ;;  %v6176_v48 = vld [vmem:[#allocation5_spill] sm:$0xff] }
 0x2b1   : > { %v1965_v41 = vadd.f32 %v5608_v29, %v1580_v30  ;;  %4167 = vmatprep.mubr.msk.f32.mxu1 %vm2113_vm1, %v2078_v46 }
 0x2b2   : > { %v1584_v34 = vpop.f32.mrb[104].mxu0 }
 0x2b3   : > { %v2079_v24 = vmax.f32 %v1965_v41, 0.0  ;;  %v1585_v36 = vadd.f32 %v1584_v34, %v1200_v57  ;;  %v1586_v33 = vpop.f32.mrb[105].mxu0 }
 0x2b5   : > { %v1970_v52 = vadd.f32 %v5620_v60, %v1585_v36  ;;  %4168 = vmatmul.mubr.msk.f32.gmra.mrb[146].mxu1 %vm2113_vm1, %v2079_v24 }
 0x2b6   : > { %v1589_v15 = vpop.f32.mrb[106].mxu0 }
 0x2b7   : > { %v2080_v55 = vmax.f32 %v1970_v52, 0.0  ;;  %v1590_v45 = vadd.f32 %v1589_v15, %v1205_v61  ;;  %v1591_v43 = vpop.f32.mrb[107].mxu0  ;;  %v6178_v15 = vld [vmem:[#allocation3_spill] sm:$0xff] }
 0x2b9   : > { %v1975_v29 = vadd.f32 %v5618_v18, %v1590_v45  ;;  %4170 = vmatprep.mubr.msk.f32.mxu1 %vm2113_vm1, %v2080_v55  ;;  %v1220_v18 = vadd.f32 %v5495_v63, %v5282_v21  ;;  %v1250_v55 = vadd.f32 %v5495_v63, %v6178_v15  ;;  %v6179_v45 = vld [vmem:[#allocation6_spill] sm:$0xff] }
 0x2ba   : > { %v1594_v54 = vpop.f32.mrb[108].mxu0 }
 0x2bb   : > { %v2081_v23 = vmax.f32 %v1975_v29, 0.0  ;;  %v1595_v40 = vadd.f32 %v1594_v54, %v1210_v1  ;;  %v1596_v28 = vpop.f32.mrb[109].mxu0 }
 0x2bd   : > { %v1980_v60 = vadd.f32 %v5627_v58, %v1595_v40  ;;  %4171 = vmatmul.mubr.msk.f32.gmra.mrb[148].mxu1 %vm2113_vm1, %v2081_v23 }
 0x2be   : > { %v1599_v51 = vpop.f32.mrb[110].mxu0 }
 0x2bf   : > { %v2082_v9 = vmax.f32 %v1980_v60, 0.0  ;;  %v1600_v19 = vadd.f32 %v1599_v51, %v1215_v6  ;;  %v1601_v4 = vpop.f32.mrb[111].mxu0  ;;  %v5820_v6 = vld [vmem:[%s6166_s4] ss:$0 sm:$0xff] }
 0x2c0   : > { %v5785_v10 = vpop.f32.mrb[96].mxu1 }
 0x2c1   : > { %v1985_v26 = vadd.f32 %v5624_v2, %v1600_v19  ;;  %v2372_v17 = vpop.f32.mrb[97].mxu1  ;;  %4173 = vmatprep.mubr.msk.f32.mxu1 %vm2113_vm1, %v2082_v9  ;;  %v1230_v2 = vadd.f32 %v5495_v63, %v5298_v32 }
 0x2c2   : > { %v1604_v56 = vpop.f32.mrb[112].mxu0 }
 0x2c3   : > { %v2083_v16 = vmax.f32 %v1985_v26, 0.0  ;;  %v1605_v13 = vadd.f32 %v1604_v56, %v1220_v18  ;;  %v1606_v58 = vpop.f32.mrb[113].mxu0  ;;  %v2373_v18 = vadd.f32 %v5820_v6, %v2372_v17  ;;  %v6181_v56 = vld [vmem:[#allocation7_spill] sm:$0xff] }
 0x2c5   : > { %v1990_v31 = vadd.f32 %v5633_v47, %v1605_v13  ;;  %4174 = vmatmul.mubr.msk.f32.gmra.mrb[150].mxu1 %vm2113_vm1, %v2083_v16  ;;  %v1235_v47 = vadd.f32 %v5495_v63, %v5309_v38 }
 0x2c6   : > { %v1609_v62 = vpop.f32.mrb[114].mxu0 }
 0x2c7   : > { %v2084_v44 = vmax.f32 %v1990_v31, 0.0  ;;  %v1610_v59 = vadd.f32 %v1609_v62, %v1225_v20  ;;  %v1611_v21 = vpop.f32.mrb[115].mxu0 }
 0x2c8   : > { %v4097_v7 = vpop.f32.mrb[98].mxu1 }
 0x2c9   : > { %v1995_v39 = vadd.f32 %v5629_v14, %v1610_v59  ;;  %v2382_v37 = vpop.f32.mrb[99].mxu1  ;;  %4176 = vmatprep.mubr.msk.f32.mxu1 %vm2113_vm1, %v2084_v44  ;;  %v1240_v14 = vadd.f32 %v5495_v63, %v5314_v42  ;;  %v2388_v17 = vadd.f32 %v4097_v7, %v5820_v6 }
 0x2ca   : > { %v1614_v50 = vpop.f32.mrb[116].mxu0  ;;  %v2383_v20 = vadd.f32 %v5820_v6, %v2382_v37 }
 0x2cb   : > { %v2085_v11 = vmax.f32 %v1995_v39, 0.0  ;;  %v1615_v27 = vadd.f32 %v1614_v50, %v1230_v2  ;;  %v1616_v25 = vpop.f32.mrb[117].mxu0 }
 0x2cc   : > { %v2693_v62 = vmax.f32 %v2383_v20, 0.0 }
 0x2cd   : > { %v2000_v12 = vadd.f32 %v5638_v35, %v1615_v27  ;;  %4177 = vmatmul.mubr.msk.f32.gmra.mrb[152].mxu1 %vm2113_vm1, %v2085_v11  ;;  %v6177_v35 = vld [vmem:[#allocation2_spill] sm:$0xff] }
 0x2ce   : > { %v1619_v22 = vpop.f32.mrb[118].mxu0  ;;  %v1245_v34 = vadd.f32 %v5495_v63, %v6177_v35 }
 0x2cf   : > { %v2086_v49 = vmax.f32 %v2000_v12, 0.0  ;;  %v1620_v53 = vadd.f32 %v1619_v22, %v1235_v47  ;;  %v1621_v32 = vpop.f32.mrb[119].mxu0 }
 0x2d0   : > { %v4100_v8 = vpop.f32.mrb[100].mxu1 }
 0x2d1   : > { %v2005_v46 = vadd.f32 %v6176_v48, %v1620_v53  ;;  %v2392_v30 = vpop.f32.mrb[101].mxu1  ;;  %4179 = vmatprep.mubr.msk.f32.mxu1 %vm2113_vm1, %v2086_v49  ;;  %v2398_v2 = vadd.f32 %v4100_v8, %v5820_v6 }
 0x2d2   : > { %v1624_v5 = vpop.f32.mrb[120].mxu0  ;;  %v2393_v44 = vadd.f32 %v5820_v6, %v2392_v30 }
 0x2d3   : > { %v2087_v57 = vmax.f32 %v2005_v46, 0.0  ;;  %v1625_v38 = vadd.f32 %v1624_v5, %v1240_v14  ;;  %v1626_v41 = vpop.f32.mrb[121].mxu0  ;;  %v2696_v7 = vmax.f32 %v2398_v2, 0.0 }
 0x2d4   : > { %v2695_v39 = vmax.f32 %v2393_v44, 0.0 }
 0x2d5   : > { %v2010_v24 = vadd.f32 %v5644_v3, %v1625_v38  ;;  %4180 = vmatmul.mubr.msk.f32.gmra.mrb[154].mxu1 %vm2113_vm1, %v2087_v57  ;;  %v6180_v3 = vld [vmem:[#allocation4_spill] sm:$0xff] }
 0x2d6   : > { %v1629_v36 = vpop.f32.mrb[122].mxu0  ;;  %v1255_v28 = vadd.f32 %v5495_v63, %v6180_v3  ;;  %v2378_v63 = vadd.f32 %v5785_v10, %v5820_v6  ;;  %v2694_v10 = vmax.f32 %v2388_v17, 0.0 }
 0x2d7   : > { %v2088_v33 = vmax.f32 %v2010_v24, 0.0  ;;  %v1630_v61 = vadd.f32 %v1629_v36, %v1245_v34  ;;  %v1631_v42 = vpop.f32.mrb[123].mxu0 }
 0x2d8   : > { %v4103_v52 = vpop.f32.mrb[102].mxu1  ;;  %v2692_v31 = vmax.f32 %v2378_v63, 0.0 }
 0x2d9   : > { %v2015_v43 = vadd.f32 %v6179_v45, %v1630_v61  ;;  %v2402_v1 = vpop.f32.mrb[103].mxu1  ;;  %4182 = vmatprep.mubr.msk.f32.mxu1 %vm2113_vm1, %v2088_v33  ;;  %v2408_v50 = vadd.f32 %v4103_v52, %v5820_v6 }
 0x2da   : > { %v1634_v29 = vpop.f32.mrb[124].mxu0  ;;  %v2403_v37 = vadd.f32 %v5820_v6, %v2402_v1 }
 0x2db   : > { %v2089_v54 = vmax.f32 %v2015_v43, 0.0  ;;  %v1635_v23 = vadd.f32 %v1634_v29, %v1250_v55  ;;  %v1636_v40 = vpop.f32.mrb[125].mxu0  ;;  %v2698_v12 = vmax.f32 %v2408_v50, 0.0 }
 0x2dc   : > { %v2697_v11 = vmax.f32 %v2403_v37, 0.0 }
 0x2dd   : > { %v2020_v60 = vadd.f32 %v5649_v0, %v1635_v23  ;;  %4183 = vmatmul.mubr.msk.f32.gmra.mrb[156].mxu1 %vm2113_vm1, %v2089_v54  ;;  %v2691_v0 = vmax.f32 %v2373_v18, 0.0 }
 0x2de   : > { %v1639_v51 = vpop.f32.mrb[126].mxu0 }
 0x2df   : > { %v2090_v9 = vmax.f32 %v2020_v60, 0.0  ;;  %v1640_v19 = vadd.f32 %v1639_v51, %v1255_v28  ;;  %v1641_v4 = vpop.f32.mrb[127].mxu0 }
 0x2e0   : > { %v4106_v26 = vpop.f32.mrb[104].mxu1 }
 0x2e1   : > { %v2025_v16 = vadd.f32 %v6181_v56, %v1640_v19  ;;  %v2412_v13 = vpop.f32.mrb[105].mxu1  ;;  %4185 = vmatprep.mubr.msk.f32.mxu1 %vm2113_vm1, %v2090_v9  ;;  %v2418_v22 = vadd.f32 %v4106_v26, %v5820_v6 }
 0x2e2   : > { %v2413_v27 = vadd.f32 %v5820_v6, %v2412_v13 }
 0x2e3   : > { %v2091_v58 = vmax.f32 %v2025_v16, 0.0  ;;  %v2700_v32 = vmax.f32 %v2418_v22, 0.0 }
 0x2e4   : > { %v2699_v49 = vmax.f32 %v2413_v27, 0.0 }
 0x2e5   : > { %4186 = vmatmul.mubr.msk.f32.gmra.mrb[158].mxu1 %vm2113_vm1, %v2091_v58 }
 0x2e6   : > { %4208 = vmatprep.mubr.msk.f32.mxu1 %vm2772_vm2, %v2691_v0 }
 0x2e8   : > { %v4109_v59 = vpop.f32.mrb[106].mxu1 }
 0x2e9   : > { %v2422_v21 = vpop.f32.mrb[107].mxu1  ;;  %4209 = vmatmul.mubr.msk.f32.vlgmr.msra.gmra.mrb[160].mxu1 %vm2772_vm2, %v2692_v31  ;;  %v2428_v8 = vadd.f32 %v4109_v59, %v5820_v6 }
 0x2ea   : > { %4211 = vmatprep.mubr.msk.f32.mxu1 %vm2772_vm2, %v2693_v62  ;;  %v2423_v53 = vadd.f32 %v5820_v6, %v2422_v21 }
 0x2eb   : > { %v2702_v5 = vmax.f32 %v2428_v8, 0.0 }
 0x2ec   : > { %v2701_v14 = vmax.f32 %v2423_v53, 0.0 }
 0x2ed   : > { %4212 = vmatmul.mubr.msk.f32.gmra.mrb[162].mxu1 %vm2772_vm2, %v2694_v10 }
 0x2ee   : > { %4214 = vmatprep.mubr.msk.f32.mxu1 %vm2772_vm2, %v2695_v39 }
 0x2f0   : > { %v4112_v25 = vpop.f32.mrb[108].mxu1 }
 0x2f1   : > { %v2432_v47 = vpop.f32.mrb[109].mxu1  ;;  %4215 = vmatmul.mubr.msk.f32.gmra.mrb[164].mxu1 %vm2772_vm2, %v2696_v7  ;;  %v2438_v57 = vadd.f32 %v4112_v25, %v5820_v6 }
 0x2f2   : > { %4217 = vmatprep.mubr.msk.f32.mxu1 %vm2772_vm2, %v2697_v11  ;;  %v2433_v48 = vadd.f32 %v5820_v6, %v2432_v47 }
 0x2f3   : > { %v2704_v35 = vmax.f32 %v2438_v57, 0.0 }
 0x2f4   : > { %v2703_v38 = vmax.f32 %v2433_v48, 0.0 }
 0x2f5   : > { %4218 = vmatmul.mubr.msk.f32.gmra.mrb[166].mxu1 %vm2772_vm2, %v2698_v12 }
 0x2f6   : > { %4220 = vmatprep.mubr.msk.f32.mxu1 %vm2772_vm2, %v2699_v49 }
 0x2f8   : > { %v4115_v46 = vpop.f32.mrb[110].mxu1 }
 0x2f9   : > { %v2442_v30 = vpop.f32.mrb[111].mxu1  ;;  %4221 = vmatmul.mubr.msk.f32.gmra.mrb[168].mxu1 %vm2772_vm2, %v2700_v32  ;;  %v2448_v34 = vadd.f32 %v4115_v46, %v5820_v6 }
 0x2fa   : > { %4223 = vmatprep.mubr.msk.f32.mxu1 %vm2772_vm2, %v2701_v14  ;;  %v2443_v41 = vadd.f32 %v5820_v6, %v2442_v30 }
 0x2fb   : > { %v2706_v42 = vmax.f32 %v2448_v34, 0.0 }
 0x2fc   : > { %v2705_v24 = vmax.f32 %v2443_v41, 0.0 }
 0x2fd   : > { %4224 = vmatmul.mubr.msk.f32.gmra.mrb[170].mxu1 %vm2772_vm2, %v2702_v5 }
 0x2fe   : > { %4226 = vmatprep.mubr.msk.f32.mxu1 %vm2772_vm2, %v2703_v38 }
 0x300   : > { %v4118_v36 = vpop.f32.mrb[112].mxu1 }
 0x301   : > { %v2452_v33 = vpop.f32.mrb[113].mxu1  ;;  %4227 = vmatmul.mubr.msk.f32.gmra.mrb[172].mxu1 %vm2772_vm2, %v2704_v35  ;;  %v2458_v52 = vadd.f32 %v4118_v36, %v5820_v6 }
 0x302   : > { %v2453_v61 = vadd.f32 %v5820_v6, %v2452_v33  ;;  %4229 = vmatprep.mubr.msk.f32.mxu1 %vm2772_vm2, %v2705_v24 }
 0x303   : > { %v2708_v55 = vmax.f32 %v2458_v52, 0.0 }
 0x304   : > { %v2707_v15 = vmax.f32 %v2453_v61, 0.0 }
 0x305   : > { %4230 = vmatmul.mubr.msk.f32.gmra.mrb[174].mxu1 %vm2772_vm2, %v2706_v42 }
 0x306   : > { %4232 = vmatprep.mubr.msk.f32.mxu1 %vm2772_vm2, %v2707_v15 }
 0x308   : > { %v4121_v45 = vpop.f32.mrb[114].mxu1 }
 0x309   : > { %v2468_v43 = vadd.f32 %v4121_v45, %v5820_v6  ;;  %v2462_v1 = vpop.f32.mrb[115].mxu1  ;;  %4233 = vmatmul.mubr.msk.f32.gmra.mrb[176].mxu1 %vm2772_vm2, %v2708_v55 }
 0x30a   : > { %v2463_v29 = vadd.f32 %v5820_v6, %v2462_v1 }
 0x30b   : > { %v2710_v23 = vmax.f32 %v2468_v43, 0.0 }
 0x30c   : > { %v2709_v54 = vmax.f32 %v2463_v29, 0.0 }
 0x30e   : > { %4235 = vmatprep.mubr.msk.f32.mxu1 %vm2772_vm2, %v2709_v54 }
 0x30f   : > { %4236 = vmatmul.mubr.msk.f32.gmra.mrb[178].mxu1 %vm2772_vm2, %v2710_v23 }
 0x310   : > { %v4124_v40 = vpop.f32.mrb[116].mxu1 }
 0x311   : > { %v2478_v3 = vadd.f32 %v4124_v40, %v5820_v6  ;;  %v2472_v28 = vpop.f32.mrb[117].mxu1 }
 0x312   : > { %v2473_v60 = vadd.f32 %v5820_v6, %v2472_v28 }
 0x313   : > { %v2712_v9 = vmax.f32 %v2478_v3, 0.0 }
 0x314   : > { %v2711_v51 = vmax.f32 %v2473_v60, 0.0 }
 0x316   : > { %4238 = vmatprep.mubr.msk.f32.mxu1 %vm2772_vm2, %v2711_v51 }
 0x317   : > { %4239 = vmatmul.mubr.msk.f32.gmra.mrb[180].mxu1 %vm2772_vm2, %v2712_v9 }
 0x318   : > { %v4127_v19 = vpop.f32.mrb[118].mxu1 }
 0x319   : > { %v2488_v4 = vadd.f32 %v4127_v19, %v5820_v6  ;;  %v2482_v18 = vpop.f32.mrb[119].mxu1 }
 0x31a   : > { %v2483_v26 = vadd.f32 %v5820_v6, %v2482_v18 }
 0x31b   : > { %v2714_v16 = vmax.f32 %v2488_v4, 0.0 }
 0x31c   : > { %v2713_v56 = vmax.f32 %v2483_v26, 0.0 }
 0x31e   : > { %4241 = vmatprep.mubr.msk.f32.mxu1 %vm2772_vm2, %v2713_v56 }
 0x31f   : > { %4242 = vmatmul.mubr.msk.f32.gmra.mrb[182].mxu1 %vm2772_vm2, %v2714_v16 }
 0x320   : > { %v4130_v13 = vpop.f32.mrb[120].mxu1 }
 0x321   : > { %v2498_v63 = vadd.f32 %v4130_v13, %v5820_v6  ;;  %v2492_v58 = vpop.f32.mrb[121].mxu1 }
 0x322   : > { %v2493_v0 = vadd.f32 %v5820_v6, %v2492_v58 }
 0x323   : > { %v2716_v31 = vmax.f32 %v2498_v63, 0.0 }
 0x324   : > { %v2715_v20 = vmax.f32 %v2493_v0, 0.0 }
 0x326   : > { %4244 = vmatprep.mubr.msk.f32.mxu1 %vm2772_vm2, %v2715_v20 }
 0x327   : > { %4245 = vmatmul.mubr.msk.f32.gmra.mrb[184].mxu1 %vm2772_vm2, %v2716_v31 }
 0x328   : > { %v4133_v17 = vpop.f32.mrb[122].mxu1 }
 0x329   : > { %v2508_v62 = vadd.f32 %v4133_v17, %v5820_v6  ;;  %v2502_v44 = vpop.f32.mrb[123].mxu1 }
 0x32a   : > { %v2503_v59 = vadd.f32 %v5820_v6, %v2502_v44 }
 0x32b   : > { %v2718_v10 = vmax.f32 %v2508_v62, 0.0 }
 0x32c   : > { %v2717_v21 = vmax.f32 %v2503_v59, 0.0 }
 0x32e   : > { %4247 = vmatprep.mubr.msk.f32.mxu1 %vm2772_vm2, %v2717_v21 }
 0x32f   : > { %4248 = vmatmul.mubr.msk.f32.gmra.mrb[186].mxu1 %vm2772_vm2, %v2718_v10 }
 0x330   : > { %v4136_v2 = vpop.f32.mrb[124].mxu1 }
 0x331   : > { %v2518_v39 = vadd.f32 %v4136_v2, %v5820_v6  ;;  %v2512_v37 = vpop.f32.mrb[125].mxu1 }
 0x332   : > { %v2513_v7 = vadd.f32 %v5820_v6, %v2512_v37 }
 0x333   : > { %v2720_v11 = vmax.f32 %v2518_v39, 0.0 }
 0x334   : > { %v2719_v50 = vmax.f32 %v2513_v7, 0.0 }
 0x336   : > { %4250 = vmatprep.mubr.msk.f32.mxu1 %vm2772_vm2, %v2719_v50 }
 0x337   : > { %4251 = vmatmul.mubr.msk.f32.gmra.mrb[188].mxu1 %vm2772_vm2, %v2720_v11 }
 0x338   : > { %v4139_v27 = vpop.f32.mrb[126].mxu1 }
 0x339   : > { %v2528_v25 = vadd.f32 %v4139_v27, %v5820_v6  ;;  %v2522_v47 = vpop.f32.mrb[127].mxu1 }
 0x33a   : > { %v2523_v12 = vadd.f32 %v5820_v6, %v2522_v47 }
 0x33b   : > { %v2722_v49 = vmax.f32 %v2528_v25, 0.0 }
 0x33c   : > { %v2721_v22 = vmax.f32 %v2523_v12, 0.0 }
 0x33e   : > { %4253 = vmatprep.mubr.msk.f32.mxu1 %vm2772_vm2, %v2721_v22 }
 0x33f   : > { %4254 = vmatmul.mubr.msk.f32.gmra.mrb[190].mxu1 %vm2772_vm2, %v2722_v49 }
 0x340   : > { %v4142_v53 = vpop.f32.mrb[128].mxu1 }
 0x341   : > { %v2538_v32 = vadd.f32 %v4142_v53, %v5820_v6  ;;  %v2532_v8 = vpop.f32.mrb[129].mxu1 }
 0x342   : > { %v2533_v14 = vadd.f32 %v5820_v6, %v2532_v8 }
 0x343   : > { %v2724_v46 = vmax.f32 %v2538_v32, 0.0 }
 0x344   : > { %v2723_v48 = vmax.f32 %v2533_v14, 0.0 }
 0x346   : > { %4256 = vmatprep.mubr.msk.f32.mxu1 %vm2772_vm2, %v2723_v48 }
 0x347   : > { %4257 = vmatmul.mubr.msk.f32.gmra.mrb[192].mxu1 %vm2772_vm2, %v2724_v46 }
 0x348   : > { %v4145_v30 = vpop.f32.mrb[130].mxu1 }
 0x349   : > { %v2548_v5 = vadd.f32 %v4145_v30, %v5820_v6  ;;  %v2542_v57 = vpop.f32.mrb[131].mxu1 }
 0x34a   : > { %v2543_v38 = vadd.f32 %v5820_v6, %v2542_v57 }
 0x34b   : > { %v2726_v35 = vmax.f32 %v2548_v5, 0.0 }
 0x34c   : > { %v2725_v41 = vmax.f32 %v2543_v38, 0.0 }
 0x34e   : > { %4259 = vmatprep.mubr.msk.f32.mxu1 %vm2772_vm2, %v2725_v41 }
 0x34f   : > { %4260 = vmatmul.mubr.msk.f32.gmra.mrb[194].mxu1 %vm2772_vm2, %v2726_v35 }
 0x350   : > { %v4148_v34 = vpop.f32.mrb[132].mxu1 }
 0x351   : > { %v2558_v24 = vadd.f32 %v4148_v34, %v5820_v6  ;;  %v2552_v36 = vpop.f32.mrb[133].mxu1 }
 0x352   : > { %v2553_v33 = vadd.f32 %v5820_v6, %v2552_v36 }
 0x353   : > { %v2728_v42 = vmax.f32 %v2558_v24, 0.0 }
 0x354   : > { %v2727_v61 = vmax.f32 %v2553_v33, 0.0 }
 0x356   : > { %4262 = vmatprep.mubr.msk.f32.mxu1 %vm2772_vm2, %v2727_v61 }
 0x357   : > { %4263 = vmatmul.mubr.msk.f32.gmra.mrb[196].mxu1 %vm2772_vm2, %v2728_v42 }
 0x358   : > { %v4151_v52 = vpop.f32.mrb[134].mxu1 }
 0x359   : > { %v2568_v15 = vadd.f32 %v4151_v52, %v5820_v6  ;;  %v2562_v55 = vpop.f32.mrb[135].mxu1 }
 0x35a   : > { %v2563_v45 = vadd.f32 %v5820_v6, %v2562_v55 }
 0x35b   : > { %v2730_v1 = vmax.f32 %v2568_v15, 0.0 }
 0x35c   : > { %v2729_v43 = vmax.f32 %v2563_v45, 0.0 }
 0x35e   : > { %4265 = vmatprep.mubr.msk.f32.mxu1 %vm2772_vm2, %v2729_v43 }
 0x35f   : > { %4266 = vmatmul.mubr.msk.f32.gmra.mrb[198].mxu1 %vm2772_vm2, %v2730_v1 }
 0x360   : > { %v4154_v29 = vpop.f32.mrb[136].mxu1 }
 0x361   : > { %v2578_v54 = vadd.f32 %v4154_v29, %v5820_v6  ;;  %v2572_v23 = vpop.f32.mrb[137].mxu1 }
 0x362   : > { %v2573_v40 = vadd.f32 %v5820_v6, %v2572_v23 }
 0x363   : > { %v2732_v28 = vmax.f32 %v2578_v54, 0.0 }
 0x364   : > { %v2731_v3 = vmax.f32 %v2573_v40, 0.0 }
 0x366   : > { %4268 = vmatprep.mubr.msk.f32.mxu1 %vm2772_vm2, %v2731_v3 }
 0x367   : > { %4269 = vmatmul.mubr.msk.f32.gmra.mrb[200].mxu1 %vm2772_vm2, %v2732_v28 }
 0x368   : > { %v4157_v60 = vpop.f32.mrb[138].mxu1 }
 0x369   : > { %v2588_v51 = vadd.f32 %v4157_v60, %v5820_v6  ;;  %v2582_v9 = vpop.f32.mrb[139].mxu1 }
 0x36a   : > { %v2583_v19 = vadd.f32 %v5820_v6, %v2582_v9 }
 0x36b   : > { %v2734_v18 = vmax.f32 %v2588_v51, 0.0  ;;  %v5957_v51 = vld [vmem:[%s6168_s6] ss:$0 sm:$0xff] }
 0x36c   : > { %v2733_v4 = vmax.f32 %v2583_v19, 0.0 }
 0x36e   : > { %4271 = vmatprep.mubr.msk.f32.mxu1 %vm2772_vm2, %v2733_v4 }
 0x36f   : > { %4272 = vmatmul.mubr.msk.f32.gmra.mrb[202].mxu1 %vm2772_vm2, %v2734_v18 }
 0x370   : > { %v4160_v26 = vpop.f32.mrb[140].mxu1 }
 0x371   : > { %v2598_v56 = vadd.f32 %v4160_v26, %v5820_v6  ;;  %v2592_v16 = vpop.f32.mrb[141].mxu1 }
 0x372   : > { %v2593_v13 = vadd.f32 %v5820_v6, %v2592_v16 }
 0x373   : > { %v2736_v58 = vmax.f32 %v2598_v56, 0.0 }
 0x374   : > { %v2735_v63 = vmax.f32 %v2593_v13, 0.0 }
 0x376   : > { %4274 = vmatprep.mubr.msk.f32.mxu1 %vm2772_vm2, %v2735_v63 }
 0x377   : > { %4275 = vmatmul.mubr.msk.f32.gmra.mrb[204].mxu1 %vm2772_vm2, %v2736_v58 }
 0x378   : > { %v4163_v0 = vpop.f32.mrb[142].mxu1 }
 0x379   : > { %v2608_v20 = vadd.f32 %v4163_v0, %v5820_v6  ;;  %v2602_v31 = vpop.f32.mrb[143].mxu1 }
 0x37a   : > { %v2603_v17 = vadd.f32 %v5820_v6, %v2602_v31 }
 0x37b   : > { %v2738_v44 = vmax.f32 %v2608_v20, 0.0 }
 0x37c   : > { %v2737_v62 = vmax.f32 %v2603_v17, 0.0 }
 0x37e   : > { %4277 = vmatprep.mubr.msk.f32.mxu1 %vm2772_vm2, %v2737_v62 }
 0x37f   : > { %4278 = vmatmul.mubr.msk.f32.gmra.mrb[206].mxu1 %vm2772_vm2, %v2738_v44 }
 0x380   : > { %v4166_v59 = vpop.f32.mrb[144].mxu1 }
 0x381   : > { %v2618_v21 = vadd.f32 %v4166_v59, %v5820_v6  ;;  %v2612_v10 = vpop.f32.mrb[145].mxu1 }
 0x382   : > { %v2613_v2 = vadd.f32 %v5820_v6, %v2612_v10 }
 0x383   : > { %v2740_v37 = vmax.f32 %v2618_v21, 0.0 }
 0x384   : > { %v2739_v39 = vmax.f32 %v2613_v2, 0.0 }
 0x386   : > { %4280 = vmatprep.mubr.msk.f32.mxu1 %vm2772_vm2, %v2739_v39 }
 0x387   : > { %4281 = vmatmul.mubr.msk.f32.gmra.mrb[208].mxu1 %vm2772_vm2, %v2740_v37 }
 0x388   : > { %v4169_v7 = vpop.f32.mrb[146].mxu1 }
 0x389   : > { %v2628_v50 = vadd.f32 %v4169_v7, %v5820_v6  ;;  %v2622_v11 = vpop.f32.mrb[147].mxu1 }
 0x38a   : > { %v2623_v27 = vadd.f32 %v5820_v6, %v2622_v11 }
 0x38b   : > { %v2742_v47 = vmax.f32 %v2628_v50, 0.0 }
 0x38c   : > { %v2741_v25 = vmax.f32 %v2623_v27, 0.0 }
 0x38e   : > { %4283 = vmatprep.mubr.msk.f32.mxu1 %vm2772_vm2, %v2741_v25 }
 0x38f   : > { %4284 = vmatmul.mubr.msk.f32.gmra.mrb[210].mxu1 %vm2772_vm2, %v2742_v47 }
 0x390   : > { %v4172_v12 = vpop.f32.mrb[148].mxu1 }
 0x391   : > { %v2638_v22 = vadd.f32 %v4172_v12, %v5820_v6  ;;  %v2632_v49 = vpop.f32.mrb[149].mxu1 }
 0x392   : > { %v2633_v53 = vadd.f32 %v5820_v6, %v2632_v49 }
 0x393   : > { %v2744_v8 = vmax.f32 %v2638_v22, 0.0 }
 0x394   : > { %v2743_v32 = vmax.f32 %v2633_v53, 0.0 }
 0x396   : > { %4286 = vmatprep.mubr.msk.f32.mxu1 %vm2772_vm2, %v2743_v32 }
 0x397   : > { %4287 = vmatmul.mubr.msk.f32.gmra.mrb[212].mxu1 %vm2772_vm2, %v2744_v8 }
 0x398   : > { %v4175_v14 = vpop.f32.mrb[150].mxu1 }
 0x399   : > { %v2648_v48 = vadd.f32 %v4175_v14, %v5820_v6  ;;  %v2642_v46 = vpop.f32.mrb[151].mxu1 }
 0x39a   : > { %v2643_v30 = vadd.f32 %v5820_v6, %v2642_v46 }
 0x39b   : > { %v2746_v57 = vmax.f32 %v2648_v48, 0.0 }
 0x39c   : > { %v2745_v5 = vmax.f32 %v2643_v30, 0.0 }
 0x39e   : > { %4289 = vmatprep.mubr.msk.f32.mxu1 %vm2772_vm2, %v2745_v5 }
 0x39f   : > { %4290 = vmatmul.mubr.msk.f32.gmra.mrb[214].mxu1 %vm2772_vm2, %v2746_v57 }
 0x3a0   : > { %v4178_v38 = vpop.f32.mrb[152].mxu1 }
 0x3a1   : > { %v2658_v41 = vadd.f32 %v4178_v38, %v5820_v6  ;;  %v2652_v35 = vpop.f32.mrb[153].mxu1 }
 0x3a2   : > { %v2653_v34 = vadd.f32 %v5820_v6, %v2652_v35 }
 0x3a3   : > { %v2748_v36 = vmax.f32 %v2658_v41, 0.0 }
 0x3a4   : > { %v2747_v24 = vmax.f32 %v2653_v34, 0.0 }
 0x3a6   : > { %4292 = vmatprep.mubr.msk.f32.mxu1 %vm2772_vm2, %v2747_v24 }
 0x3a7   : > { %4293 = vmatmul.mubr.msk.f32.gmra.mrb[216].mxu1 %vm2772_vm2, %v2748_v36 }
 0x3a8   : > { %v4181_v33 = vpop.f32.mrb[154].mxu1 }
 0x3a9   : > { %v2668_v61 = vadd.f32 %v4181_v33, %v5820_v6  ;;  %v2662_v42 = vpop.f32.mrb[155].mxu1 }
 0x3aa   : > { %v2663_v52 = vadd.f32 %v5820_v6, %v2662_v42 }
 0x3ab   : > { %v2750_v55 = vmax.f32 %v2668_v61, 0.0 }
 0x3ac   : > { %v2749_v15 = vmax.f32 %v2663_v52, 0.0 }
 0x3ae   : > { %4295 = vmatprep.mubr.msk.f32.mxu1 %vm2772_vm2, %v2749_v15 }
 0x3af   : > { %4296 = vmatmul.mubr.msk.f32.gmra.mrb[218].mxu1 %vm2772_vm2, %v2750_v55 }
 0x3b0   : > { %v4184_v45 = vpop.f32.mrb[156].mxu1 }
 0x3b1   : > { %v2678_v43 = vadd.f32 %v4184_v45, %v5820_v6  ;;  %v2672_v1 = vpop.f32.mrb[157].mxu1 }
 0x3b2   : > { %v2673_v29 = vadd.f32 %v5820_v6, %v2672_v1 }
 0x3b3   : > { %v2752_v23 = vmax.f32 %v2678_v43, 0.0 }
 0x3b4   : > { %v2751_v54 = vmax.f32 %v2673_v29, 0.0 }
 0x3b6   : > { %4298 = vmatprep.mubr.msk.f32.mxu1 %vm2772_vm2, %v2751_v54 }
 0x3b7   : > { %4299 = vmatmul.mubr.msk.f32.gmra.mrb[220].mxu1 %vm2772_vm2, %v2752_v23 }
 0x3b8   : > { %v4187_v40 = vpop.f32.mrb[158].mxu1 }
 0x3b9   : > { %v2688_v3 = vadd.f32 %v4187_v40, %v5820_v6  ;;  %v2682_v28 = vpop.f32.mrb[159].mxu1 }
 0x3ba   : > { %v2683_v60 = vadd.f32 %v5820_v6, %v2682_v28 }
 0x3bb   : > { %v2754_v4 = vmax.f32 %v2688_v3, 0.0 }
 0x3bc   : > { %v2753_v9 = vmax.f32 %v2683_v60, 0.0  ;;  %v4210_v19 = vpop.f32.mrb[160].mxu1 }
 0x3bd   : > { %v3037_v18 = vadd.f32 %v4210_v19, %v5957_v51  ;;  %v3031_v26 = vpop.f32.mrb[161].mxu1 }
 0x3be   : > { %v3032_v6 = vadd.f32 %v5957_v51, %v3031_v26  ;;  %4301 = vmatprep.mubr.msk.f32.mxu1 %vm2772_vm2, %v2753_v9 }
 0x3bf   : > { %v3351_v56 = vmax.f32 %v3037_v18, 0.0  ;;  %4302 = vmatmul.mubr.msk.f32.gmra.mrb[222].mxu1 %vm2772_vm2, %v2754_v4 }
 0x3c0   : > { %v3350_v16 = vmax.f32 %v3032_v6, 0.0  ;;  %v4213_v13 = vpop.f32.mrb[162].mxu1 }
 0x3c1   : > { %3415 = vst.msk [vmem:[%s5964_s18 + $0x8] sm:$0xff] %vm680_vm0, %v3351_v56  ;;  %v3047_v63 = vadd.f32 %v4213_v13, %v5957_v51  ;;  %v3041_v58 = vpop.f32.mrb[163].mxu1 }
 0x3c2   : > { %3414 = vst.msk [vmem:[%s5964_s18] sm:$0xff] %vm680_vm0, %v3350_v16  ;;  %v3042_v0 = vadd.f32 %v5957_v51, %v3041_v58 }
 0x3c3   : > { %v3353_v20 = vmax.f32 %v3047_v63, 0.0 }
 0x3c4   : > { %v3352_v31 = vmax.f32 %v3042_v0, 0.0  ;;  %v4216_v17 = vpop.f32.mrb[164].mxu1 }
 0x3c5   : > { %3417 = vst.msk [vmem:[%s5964_s18 + $0x18] sm:$0xff] %vm680_vm0, %v3353_v20  ;;  %v3057_v62 = vadd.f32 %v4216_v17, %v5957_v51  ;;  %v3051_v44 = vpop.f32.mrb[165].mxu1 }
 0x3c6   : > { %3416 = vst.msk [vmem:[%s5964_s18 + $0x10] sm:$0xff] %vm680_vm0, %v3352_v31  ;;  %v3052_v59 = vadd.f32 %v5957_v51, %v3051_v44 }
 0x3c7   : > { %v3355_v21 = vmax.f32 %v3057_v62, 0.0 }
 0x3c8   : > { %v3354_v10 = vmax.f32 %v3052_v59, 0.0  ;;  %v4219_v2 = vpop.f32.mrb[166].mxu1 }
 0x3c9   : > { %3419 = vst.msk [vmem:[%s5964_s18 + $0x28] sm:$0xff] %vm680_vm0, %v3355_v21  ;;  %v3067_v39 = vadd.f32 %v4219_v2, %v5957_v51  ;;  %v3061_v37 = vpop.f32.mrb[167].mxu1 }
 0x3ca   : > { %3418 = vst.msk [vmem:[%s5964_s18 + $0x20] sm:$0xff] %vm680_vm0, %v3354_v10  ;;  %v3062_v7 = vadd.f32 %v5957_v51, %v3061_v37 }
 0x3cb   : > { %v3357_v50 = vmax.f32 %v3067_v39, 0.0 }
 0x3cc   : > { %v3356_v11 = vmax.f32 %v3062_v7, 0.0  ;;  %v4222_v27 = vpop.f32.mrb[168].mxu1 }
 0x3cd   : > { %3421 = vst.msk [vmem:[%s5964_s18 + $0x38] sm:$0xff] %vm680_vm0, %v3357_v50  ;;  %v3077_v25 = vadd.f32 %v4222_v27, %v5957_v51  ;;  %v3071_v47 = vpop.f32.mrb[169].mxu1 }
 0x3ce   : > { %3420 = vst.msk [vmem:[%s5964_s18 + $0x30] sm:$0xff] %vm680_vm0, %v3356_v11  ;;  %v3072_v12 = vadd.f32 %v5957_v51, %v3071_v47 }
 0x3cf   : > { %v3359_v22 = vmax.f32 %v3077_v25, 0.0 }
 0x3d0   : > { %v3358_v49 = vmax.f32 %v3072_v12, 0.0  ;;  %v4225_v53 = vpop.f32.mrb[170].mxu1 }
 0x3d1   : > { %3423 = vst.msk [vmem:[%s5964_s18 + $0x48] sm:$0xff] %vm680_vm0, %v3359_v22  ;;  %v3087_v32 = vadd.f32 %v4225_v53, %v5957_v51  ;;  %v3081_v8 = vpop.f32.mrb[171].mxu1 }
 0x3d2   : > { %3422 = vst.msk [vmem:[%s5964_s18 + $0x40] sm:$0xff] %vm680_vm0, %v3358_v49  ;;  %v3082_v14 = vadd.f32 %v5957_v51, %v3081_v8 }
 0x3d3   : > { %v3361_v48 = vmax.f32 %v3087_v32, 0.0 }
 0x3d4   : > { %v3360_v46 = vmax.f32 %v3082_v14, 0.0  ;;  %v4228_v30 = vpop.f32.mrb[172].mxu1 }
 0x3d5   : > { %3425 = vst.msk [vmem:[%s5964_s18 + $0x58] sm:$0xff] %vm680_vm0, %v3361_v48  ;;  %v3097_v5 = vadd.f32 %v4228_v30, %v5957_v51  ;;  %v3091_v57 = vpop.f32.mrb[173].mxu1 }
 0x3d6   : > { %3424 = vst.msk [vmem:[%s5964_s18 + $0x50] sm:$0xff] %vm680_vm0, %v3360_v46  ;;  %v3092_v38 = vadd.f32 %v5957_v51, %v3091_v57 }
 0x3d7   : > { %v3363_v41 = vmax.f32 %v3097_v5, 0.0 }
 0x3d8   : > { %v3362_v35 = vmax.f32 %v3092_v38, 0.0  ;;  %v4231_v34 = vpop.f32.mrb[174].mxu1 }
 0x3d9   : > { %3427 = vst.msk [vmem:[%s5964_s18 + $0x68] sm:$0xff] %vm680_vm0, %v3363_v41  ;;  %v3107_v24 = vadd.f32 %v4231_v34, %v5957_v51  ;;  %v3101_v36 = vpop.f32.mrb[175].mxu1 }
 0x3da   : > { %3426 = vst.msk [vmem:[%s5964_s18 + $0x60] sm:$0xff] %vm680_vm0, %v3362_v35  ;;  %v3102_v33 = vadd.f32 %v5957_v51, %v3101_v36 }
 0x3db   : > { %v3365_v61 = vmax.f32 %v3107_v24, 0.0 }
 0x3dc   : > { %v3364_v42 = vmax.f32 %v3102_v33, 0.0  ;;  %v4234_v52 = vpop.f32.mrb[176].mxu1 }
 0x3dd   : > { %3429 = vst.msk [vmem:[%s5964_s18 + $0x78] sm:$0xff] %vm680_vm0, %v3365_v61  ;;  %v3117_v15 = vadd.f32 %v4234_v52, %v5957_v51  ;;  %v3111_v55 = vpop.f32.mrb[177].mxu1 }
 0x3de   : > { %3428 = vst.msk [vmem:[%s5964_s18 + $0x70] sm:$0xff] %vm680_vm0, %v3364_v42  ;;  %v3112_v45 = vadd.f32 %v5957_v51, %v3111_v55 }
 0x3df   : > { %v3367_v43 = vmax.f32 %v3117_v15, 0.0 }
 0x3e0   : > { %v3366_v1 = vmax.f32 %v3112_v45, 0.0 }
 0x3e1   : > { %3431 = vst.msk [vmem:[%s5964_s18 + $0x88] sm:$0xff] %vm680_vm0, %v3367_v43 }
 0x3e2   : > { %3430 = vst.msk [vmem:[%s5964_s18 + $0x80] sm:$0xff] %vm680_vm0, %v3366_v1  ;;  %v4237_v29 = vpop.f32.mrb[178].mxu1 }
 0x3e3   : > { %v3127_v54 = vadd.f32 %v4237_v29, %v5957_v51  ;;  %v3121_v23 = vpop.f32.mrb[179].mxu1 }
 0x3e4   : > { %v3122_v40 = vadd.f32 %v5957_v51, %v3121_v23 }
 0x3e5   : > { %v3369_v3 = vmax.f32 %v3127_v54, 0.0 }
 0x3e6   : > { %v3368_v28 = vmax.f32 %v3122_v40, 0.0 }
 0x3e7   : > { %3433 = vst.msk [vmem:[%s5964_s18 + $0x98] sm:$0xff] %vm680_vm0, %v3369_v3 }
 0x3e8   : > { %3432 = vst.msk [vmem:[%s5964_s18 + $0x90] sm:$0xff] %vm680_vm0, %v3368_v28 }
 0x3ea   : > { %v4240_v60 = vpop.f32.mrb[180].mxu1 }
 0x3eb   : > { %v3137_v9 = vadd.f32 %v4240_v60, %v5957_v51  ;;  %v3131_v19 = vpop.f32.mrb[181].mxu1 }
 0x3ec   : > { %v3132_v4 = vadd.f32 %v5957_v51, %v3131_v19 }
 0x3ed   : > { %v3371_v18 = vmax.f32 %v3137_v9, 0.0 }
 0x3ee   : > { %v3370_v26 = vmax.f32 %v3132_v4, 0.0 }
 0x3ef   : > { %3435 = vst.msk [vmem:[%s5964_s18 + $0xa8] sm:$0xff] %vm680_vm0, %v3371_v18 }
 0x3f0   : > { %3434 = vst.msk [vmem:[%s5964_s18 + $0xa0] sm:$0xff] %vm680_vm0, %v3370_v26 }
 0x3f2   : > { %v4243_v6 = vpop.f32.mrb[182].mxu1 }
 0x3f3   : > { %v3147_v56 = vadd.f32 %v4243_v6, %v5957_v51  ;;  %v3141_v16 = vpop.f32.mrb[183].mxu1 }
 0x3f4   : > { %v3142_v13 = vadd.f32 %v5957_v51, %v3141_v16 }
 0x3f5   : > { %v3373_v63 = vmax.f32 %v3147_v56, 0.0 }
 0x3f6   : > { %v3372_v58 = vmax.f32 %v3142_v13, 0.0 }
 0x3f7   : > { %3437 = vst.msk [vmem:[%s5964_s18 + $0xb8] sm:$0xff] %vm680_vm0, %v3373_v63 }
 0x3f8   : > { %3436 = vst.msk [vmem:[%s5964_s18 + $0xb0] sm:$0xff] %vm680_vm0, %v3372_v58 }
 0x3fa   : > { %v4246_v0 = vpop.f32.mrb[184].mxu1 }
 0x3fb   : > { %v3157_v20 = vadd.f32 %v4246_v0, %v5957_v51  ;;  %v3151_v31 = vpop.f32.mrb[185].mxu1 }
 0x3fc   : > { %v3152_v17 = vadd.f32 %v5957_v51, %v3151_v31 }
 0x3fd   : > { %v3375_v62 = vmax.f32 %v3157_v20, 0.0 }
 0x3fe   : > { %v3374_v44 = vmax.f32 %v3152_v17, 0.0 }
 0x3ff   : > { %3439 = vst.msk [vmem:[%s5964_s18 + $0xc8] sm:$0xff] %vm680_vm0, %v3375_v62 }
 0x400   : > { %3438 = vst.msk [vmem:[%s5964_s18 + $0xc0] sm:$0xff] %vm680_vm0, %v3374_v44 }
 0x402   : > { %v4249_v59 = vpop.f32.mrb[186].mxu1 }
 0x403   : > { %v3167_v21 = vadd.f32 %v4249_v59, %v5957_v51  ;;  %v3161_v10 = vpop.f32.mrb[187].mxu1 }
 0x404   : > { %v3162_v2 = vadd.f32 %v5957_v51, %v3161_v10 }
 0x405   : > { %v3377_v39 = vmax.f32 %v3167_v21, 0.0 }
 0x406   : > { %v3376_v37 = vmax.f32 %v3162_v2, 0.0 }
 0x407   : > { %3441 = vst.msk [vmem:[%s5964_s18 + $0xd8] sm:$0xff] %vm680_vm0, %v3377_v39 }
 0x408   : > { %3440 = vst.msk [vmem:[%s5964_s18 + $0xd0] sm:$0xff] %vm680_vm0, %v3376_v37 }
 0x40a   : > { %v4252_v7 = vpop.f32.mrb[188].mxu1 }
 0x40b   : > { %v3177_v50 = vadd.f32 %v4252_v7, %v5957_v51  ;;  %v3171_v11 = vpop.f32.mrb[189].mxu1 }
 0x40c   : > { %v3172_v27 = vadd.f32 %v5957_v51, %v3171_v11 }
 0x40d   : > { %v3379_v25 = vmax.f32 %v3177_v50, 0.0 }
 0x40e   : > { %v3378_v47 = vmax.f32 %v3172_v27, 0.0 }
 0x40f   : > { %3443 = vst.msk [vmem:[%s5964_s18 + $0xe8] sm:$0xff] %vm680_vm0, %v3379_v25 }
 0x410   : > { %3442 = vst.msk [vmem:[%s5964_s18 + $0xe0] sm:$0xff] %vm680_vm0, %v3378_v47 }
 0x412   : > { %v4255_v12 = vpop.f32.mrb[190].mxu1 }
 0x413   : > { %v3187_v22 = vadd.f32 %v4255_v12, %v5957_v51  ;;  %v3181_v49 = vpop.f32.mrb[191].mxu1 }
 0x414   : > { %v3182_v53 = vadd.f32 %v5957_v51, %v3181_v49 }
 0x415   : > { %v3381_v32 = vmax.f32 %v3187_v22, 0.0 }
 0x416   : > { %v3380_v8 = vmax.f32 %v3182_v53, 0.0 }
 0x417   : > { %3445 = vst.msk [vmem:[%s5964_s18 + $0xf8] sm:$0xff] %vm680_vm0, %v3381_v32 }
 0x418   : > { %3444 = vst.msk [vmem:[%s5964_s18 + $0xf0] sm:$0xff] %vm680_vm0, %v3380_v8 }
 0x41a   : > { %v4258_v14 = vpop.f32.mrb[192].mxu1 }
 0x41b   : > { %v3197_v48 = vadd.f32 %v4258_v14, %v5957_v51  ;;  %v3191_v46 = vpop.f32.mrb[193].mxu1 }
 0x41c   : > { %v3192_v30 = vadd.f32 %v5957_v51, %v3191_v46 }
 0x41d   : > { %v3383_v5 = vmax.f32 %v3197_v48, 0.0 }
 0x41e   : > { %v3382_v57 = vmax.f32 %v3192_v30, 0.0 }
 0x41f   : > { %3447 = vst.msk [vmem:[%s5964_s18 + $0x108] sm:$0xff] %vm680_vm0, %v3383_v5 }
 0x420   : > { %3446 = vst.msk [vmem:[%s5964_s18 + $0x100] sm:$0xff] %vm680_vm0, %v3382_v57 }
 0x422   : > { %v4261_v38 = vpop.f32.mrb[194].mxu1 }
 0x423   : > { %v3207_v41 = vadd.f32 %v4261_v38, %v5957_v51  ;;  %v3201_v35 = vpop.f32.mrb[195].mxu1 }
 0x424   : > { %v3202_v34 = vadd.f32 %v5957_v51, %v3201_v35 }
 0x425   : > { %v3385_v24 = vmax.f32 %v3207_v41, 0.0 }
 0x426   : > { %v3384_v36 = vmax.f32 %v3202_v34, 0.0 }
 0x427   : > { %3449 = vst.msk [vmem:[%s5964_s18 + $0x118] sm:$0xff] %vm680_vm0, %v3385_v24 }
 0x428   : > { %3448 = vst.msk [vmem:[%s5964_s18 + $0x110] sm:$0xff] %vm680_vm0, %v3384_v36 }
 0x42a   : > { %v4264_v33 = vpop.f32.mrb[196].mxu1 }
 0x42b   : > { %v3217_v61 = vadd.f32 %v4264_v33, %v5957_v51  ;;  %v3211_v42 = vpop.f32.mrb[197].mxu1 }
 0x42c   : > { %v3212_v52 = vadd.f32 %v5957_v51, %v3211_v42 }
 0x42d   : > { %v3387_v15 = vmax.f32 %v3217_v61, 0.0 }
 0x42e   : > { %v3386_v55 = vmax.f32 %v3212_v52, 0.0 }
 0x42f   : > { %3451 = vst.msk [vmem:[%s5964_s18 + $0x128] sm:$0xff] %vm680_vm0, %v3387_v15 }
 0x430   : > { %3450 = vst.msk [vmem:[%s5964_s18 + $0x120] sm:$0xff] %vm680_vm0, %v3386_v55 }
 0x432   : > { %v4267_v45 = vpop.f32.mrb[198].mxu1 }
 0x433   : > { %v3227_v43 = vadd.f32 %v4267_v45, %v5957_v51  ;;  %v3221_v1 = vpop.f32.mrb[199].mxu1 }
 0x434   : > { %v3222_v29 = vadd.f32 %v5957_v51, %v3221_v1 }
 0x435   : > { %v3389_v54 = vmax.f32 %v3227_v43, 0.0 }
 0x436   : > { %v3388_v23 = vmax.f32 %v3222_v29, 0.0 }
 0x437   : > { %3453 = vst.msk [vmem:[%s5964_s18 + $0x138] sm:$0xff] %vm680_vm0, %v3389_v54 }
 0x438   : > { %3452 = vst.msk [vmem:[%s5964_s18 + $0x130] sm:$0xff] %vm680_vm0, %v3388_v23 }
 0x43a   : > { %v4270_v40 = vpop.f32.mrb[200].mxu1 }
 0x43b   : > { %v3237_v3 = vadd.f32 %v4270_v40, %v5957_v51  ;;  %v3231_v28 = vpop.f32.mrb[201].mxu1 }
 0x43c   : > { %v3232_v60 = vadd.f32 %v5957_v51, %v3231_v28 }
 0x43d   : > { %v3391_v9 = vmax.f32 %v3237_v3, 0.0 }
 0x43e   : > { %v3390_v19 = vmax.f32 %v3232_v60, 0.0 }
 0x43f   : > { %3455 = vst.msk [vmem:[%s5964_s18 + $0x148] sm:$0xff] %vm680_vm0, %v3391_v9 }
 0x440   : > { %3454 = vst.msk [vmem:[%s5964_s18 + $0x140] sm:$0xff] %vm680_vm0, %v3390_v19 }
 0x442   : > { %v4273_v4 = vpop.f32.mrb[202].mxu1 }
 0x443   : > { %v3247_v18 = vadd.f32 %v4273_v4, %v5957_v51  ;;  %v3241_v26 = vpop.f32.mrb[203].mxu1 }
 0x444   : > { %v3242_v6 = vadd.f32 %v5957_v51, %v3241_v26 }
 0x445   : > { %v3393_v56 = vmax.f32 %v3247_v18, 0.0 }
 0x446   : > { %v3392_v16 = vmax.f32 %v3242_v6, 0.0 }
 0x447   : > { %3457 = vst.msk [vmem:[%s5964_s18 + $0x158] sm:$0xff] %vm680_vm0, %v3393_v56 }
 0x448   : > { %3456 = vst.msk [vmem:[%s5964_s18 + $0x150] sm:$0xff] %vm680_vm0, %v3392_v16 }
 0x44a   : > { %v4276_v13 = vpop.f32.mrb[204].mxu1 }
 0x44b   : > { %v3257_v63 = vadd.f32 %v4276_v13, %v5957_v51  ;;  %v3251_v58 = vpop.f32.mrb[205].mxu1 }
 0x44c   : > { %v3252_v0 = vadd.f32 %v5957_v51, %v3251_v58 }
 0x44d   : > { %v3395_v20 = vmax.f32 %v3257_v63, 0.0 }
 0x44e   : > { %v3394_v31 = vmax.f32 %v3252_v0, 0.0 }
 0x44f   : > { %3459 = vst.msk [vmem:[%s5964_s18 + $0x168] sm:$0xff] %vm680_vm0, %v3395_v20 }
 0x450   : > { %3458 = vst.msk [vmem:[%s5964_s18 + $0x160] sm:$0xff] %vm680_vm0, %v3394_v31 }
 0x452   : > { %v4279_v17 = vpop.f32.mrb[206].mxu1 }
 0x453   : > { %v3267_v62 = vadd.f32 %v4279_v17, %v5957_v51  ;;  %v3261_v44 = vpop.f32.mrb[207].mxu1 }
 0x454   : > { %v3262_v59 = vadd.f32 %v5957_v51, %v3261_v44 }
 0x455   : > { %v3397_v21 = vmax.f32 %v3267_v62, 0.0 }
 0x456   : > { %v3396_v10 = vmax.f32 %v3262_v59, 0.0 }
 0x457   : > { %3461 = vst.msk [vmem:[%s5964_s18 + $0x178] sm:$0xff] %vm680_vm0, %v3397_v21 }
 0x458   : > { %3460 = vst.msk [vmem:[%s5964_s18 + $0x170] sm:$0xff] %vm680_vm0, %v3396_v10 }
 0x45a   : > { %v4282_v2 = vpop.f32.mrb[208].mxu1 }
 0x45b   : > { %v3277_v39 = vadd.f32 %v4282_v2, %v5957_v51  ;;  %v3271_v37 = vpop.f32.mrb[209].mxu1 }
 0x45c   : > { %v3272_v7 = vadd.f32 %v5957_v51, %v3271_v37 }
 0x45d   : > { %v3399_v50 = vmax.f32 %v3277_v39, 0.0 }
 0x45e   : > { %v3398_v11 = vmax.f32 %v3272_v7, 0.0 }
 0x45f   : > { %3463 = vst.msk [vmem:[%s5964_s18 + $0x188] sm:$0xff] %vm680_vm0, %v3399_v50 }
 0x460   : > { %3462 = vst.msk [vmem:[%s5964_s18 + $0x180] sm:$0xff] %vm680_vm0, %v3398_v11 }
 0x462   : > { %v4285_v27 = vpop.f32.mrb[210].mxu1 }
 0x463   : > { %v3287_v25 = vadd.f32 %v4285_v27, %v5957_v51  ;;  %v3281_v47 = vpop.f32.mrb[211].mxu1 }
 0x464   : > { %v3282_v12 = vadd.f32 %v5957_v51, %v3281_v47 }
 0x465   : > { %v3401_v22 = vmax.f32 %v3287_v25, 0.0 }
 0x466   : > { %v3400_v49 = vmax.f32 %v3282_v12, 0.0 }
 0x467   : > { %3465 = vst.msk [vmem:[%s5964_s18 + $0x198] sm:$0xff] %vm680_vm0, %v3401_v22 }
 0x468   : > { %3464 = vst.msk [vmem:[%s5964_s18 + $0x190] sm:$0xff] %vm680_vm0, %v3400_v49 }
 0x46a   : > { %v4288_v53 = vpop.f32.mrb[212].mxu1 }
 0x46b   : > { %v3297_v32 = vadd.f32 %v4288_v53, %v5957_v51  ;;  %v3291_v8 = vpop.f32.mrb[213].mxu1 }
 0x46c   : > { %v3292_v14 = vadd.f32 %v5957_v51, %v3291_v8 }
 0x46d   : > { %v3403_v48 = vmax.f32 %v3297_v32, 0.0 }
 0x46e   : > { %v3402_v46 = vmax.f32 %v3292_v14, 0.0 }
 0x46f   : > { %3467 = vst.msk [vmem:[%s5964_s18 + $0x1a8] sm:$0xff] %vm680_vm0, %v3403_v48 }
 0x470   : > { %3466 = vst.msk [vmem:[%s5964_s18 + $0x1a0] sm:$0xff] %vm680_vm0, %v3402_v46 }
 0x472   : > { %v4291_v30 = vpop.f32.mrb[214].mxu1 }
 0x473   : > { %v3307_v5 = vadd.f32 %v4291_v30, %v5957_v51  ;;  %v3301_v57 = vpop.f32.mrb[215].mxu1 }
 0x474   : > { %v3302_v38 = vadd.f32 %v5957_v51, %v3301_v57 }
 0x475   : > { %v3405_v41 = vmax.f32 %v3307_v5, 0.0 }
 0x476   : > { %v3404_v35 = vmax.f32 %v3302_v38, 0.0 }
 0x477   : > { %3469 = vst.msk [vmem:[%s5964_s18 + $0x1b8] sm:$0xff] %vm680_vm0, %v3405_v41 }
 0x478   : > { %3468 = vst.msk [vmem:[%s5964_s18 + $0x1b0] sm:$0xff] %vm680_vm0, %v3404_v35 }
 0x47a   : > { %v4294_v34 = vpop.f32.mrb[216].mxu1 }
 0x47b   : > { %v3317_v24 = vadd.f32 %v4294_v34, %v5957_v51  ;;  %v3311_v36 = vpop.f32.mrb[217].mxu1 }
 0x47c   : > { %v3312_v33 = vadd.f32 %v5957_v51, %v3311_v36 }
 0x47d   : > { %v3407_v61 = vmax.f32 %v3317_v24, 0.0 }
 0x47e   : > { %v3406_v42 = vmax.f32 %v3312_v33, 0.0 }
 0x47f   : > { %3471 = vst.msk [vmem:[%s5964_s18 + $0x1c8] sm:$0xff] %vm680_vm0, %v3407_v61 }
 0x480   : > { %3470 = vst.msk [vmem:[%s5964_s18 + $0x1c0] sm:$0xff] %vm680_vm0, %v3406_v42 }
 0x482   : > { %v4297_v52 = vpop.f32.mrb[218].mxu1 }
 0x483   : > { %v3327_v15 = vadd.f32 %v4297_v52, %v5957_v51  ;;  %v3321_v55 = vpop.f32.mrb[219].mxu1 }
 0x484   : > { %v3322_v45 = vadd.f32 %v5957_v51, %v3321_v55 }
 0x485   : > { %v3409_v43 = vmax.f32 %v3327_v15, 0.0 }
 0x486   : > { %v3408_v1 = vmax.f32 %v3322_v45, 0.0 }
 0x487   : > { %3473 = vst.msk [vmem:[%s5964_s18 + $0x1d8] sm:$0xff] %vm680_vm0, %v3409_v43 }
 0x488   : > { %3472 = vst.msk [vmem:[%s5964_s18 + $0x1d0] sm:$0xff] %vm680_vm0, %v3408_v1 }
 0x48a   : > { %v4300_v29 = vpop.f32.mrb[220].mxu1 }
 0x48b   : > { %v3337_v54 = vadd.f32 %v4300_v29, %v5957_v51  ;;  %v3331_v23 = vpop.f32.mrb[221].mxu1 }
 0x48c   : > { %v3332_v40 = vadd.f32 %v5957_v51, %v3331_v23 }
 0x48d   : > { %v3411_v3 = vmax.f32 %v3337_v54, 0.0 }
 0x48e   : > { %v3410_v28 = vmax.f32 %v3332_v40, 0.0 }
 0x48f   : > { %3475 = vst.msk [vmem:[%s5964_s18 + $0x1e8] sm:$0xff] %vm680_vm0, %v3411_v3 }
 0x490   : > { %3474 = vst.msk [vmem:[%s5964_s18 + $0x1e0] sm:$0xff] %vm680_vm0, %v3410_v28 }
 0x492   : > { %v4303_v60 = vpop.f32.mrb[222].mxu1 }
 0x493   : > { %v3347_v9 = vadd.f32 %v4303_v60, %v5957_v51  ;;  %v3341_v19 = vpop.f32.mrb[223].mxu1 }
 0x494   : > { %v3342_v4 = vadd.f32 %v5957_v51, %v3341_v19 }
 0x495   : > { %v3413_v18 = vmax.f32 %v3347_v9, 0.0 }
 0x496   : > { %v3412_v26 = vmax.f32 %v3342_v4, 0.0 }
 0x497   : > { %3477 = vst.msk [vmem:[%s5964_s18 + $0x1f8] sm:$0xff] %vm680_vm0, %v3413_v18 }
 0x498   : > { %3476 = vst.msk [vmem:[%s5964_s18 + $0x1f0] sm:$0xff] %vm680_vm0, %v3412_v26 }
 0x499 PF: > { %s17_s24 = sadd.s32 1, %s4680_s24  }
 0x49a   : > { %p14_p4 = scmp.ge.s32.totalorder %s17_s24, 4  }
 0x49c   :  { %16 = sbr.rel (!%p14_p4) target bundleno = 1 (0x1), region = 78 }

</bundles_post_ra>
